<compile_context>
chip_gen: v6e
topology: v6e:2x2x1
jax: 0.10.0
libtpu: 0.0.40
codegen_flags: <defaults>
</compile_context>

<pallas_src>
import functools
import math

import numpy as np

import jax
import jax.numpy as jnp
from jax.experimental import pallas as pl
from jax.experimental.pallas import tpu as pltpu

LN_EPS = 1e-5


def _tpu_vmem_bytes():
    try:
        return int(pltpu.get_tpu_info().vmem_capacity_bytes)
    except Exception:
        return 64 * 1024 * 1024          # conservative fallback (v7x-sized)


_VMEM_BYTES = _tpu_vmem_bytes()
VMEM_LIMIT = min(_VMEM_BYTES * 3 // 4, 100 * 1024 * 1024)
MAX_TILE_M = 1024 if _VMEM_BYTES >= 100 * 1024 * 1024 else 512
MIN_GRID_STEPS = 2                        # v7x: 2 TensorCores -> want >=2 steps


# ----------------------------- small helpers --------------------------------
def _round_up(x, m):
    return (x + m - 1) // m * m


def _tile_rows(M, row_align=8):
    """Near-even M tiling: >= MIN_GRID_STEPS steps, <= MAX_TILE_M rows each."""
    n = max(MIN_GRID_STEPS, pl.cdiv(M, MAX_TILE_M))
    n = min(n, max(1, pl.cdiv(M, row_align)))
    tile = _round_up(pl.cdiv(M, n), row_align)
    return tile, _round_up(M, tile)


def _pad_rows(x, Mp):
    return x if x.shape[0] == Mp else jnp.pad(x, ((0, Mp - x.shape[0]), (0, 0)))


def _layernorm(y, gamma, beta):
    mean = jnp.mean(y, axis=-1, keepdims=True)
    var = jnp.mean(jnp.square(y - mean), axis=-1, keepdims=True)
    return (y - mean) * jax.lax.rsqrt(var + LN_EPS) * gamma + beta


def _bf16(x):
    return x.astype(jnp.bfloat16)


# ----- kernel 1: patch projection + LayerNorm + 7-layer MLP chain (fused) ----
def _patch_embed_kernel(x_ref, pw_ref, pb_ref, g_ref, be_ref,
                        w1_ref, b1_ref, w2_ref, b2_ref, o_ref, *, n_layers):
    y = jnp.dot(_bf16(x_ref[...]), pw_ref[...],
                preferred_element_type=jnp.float32) + pb_ref[...]
    y = _layernorm(y, g_ref[...], be_ref[...])
    for l in range(n_layers):                 # static unroll, weights resident
        h = jnp.dot(_bf16(y), w1_ref[l], preferred_element_type=jnp.float32) + b1_ref[l]
        h = jnp.maximum(h, 0.0)
        y = jnp.dot(_bf16(h), w2_ref[l], preferred_element_type=jnp.float32) + b2_ref[l]
    o_ref[...] = y.astype(o_ref.dtype)


def patch_embed(patches, p):
    M, K = patches.shape
    D = p["proj_w"].shape[1]
    n_layers, _, HP = p["pe_w1"].shape
    tile_m, Mp = _tile_rows(M)
    xp = _pad_rows(patches, Mp)
    const2 = lambda i: (0, 0)
    const3 = lambda i: (0, 0, 0)
    out = pl.pallas_call(
        functools.partial(_patch_embed_kernel, n_layers=n_layers),
        out_shape=jax.ShapeDtypeStruct((Mp, D), jnp.float32),
        grid=(Mp // tile_m,),
        in_specs=[
            pl.BlockSpec((tile_m, K), lambda i: (i, 0)),
            pl.BlockSpec((K, D), const2),
            pl.BlockSpec((1, D), const2),
            pl.BlockSpec((1, D), const2),
            pl.BlockSpec((1, D), const2),
            pl.BlockSpec((n_layers, D, HP), const3),
            pl.BlockSpec((n_layers, 1, HP), const3),
            pl.BlockSpec((n_layers, HP, D), const3),
            pl.BlockSpec((n_layers, 1, D), const3),
        ],
        out_specs=pl.BlockSpec((tile_m, D), lambda i: (i, 0)),
        compiler_params=pltpu.CompilerParams(
            dimension_semantics=("parallel",), vmem_limit_bytes=VMEM_LIMIT),
        cost_estimate=pl.CostEstimate(
            flops=2 * Mp * K * D + 4 * n_layers * Mp * D * HP,
            transcendentals=0,
            bytes_accessed=4 * Mp * (K + D) + 2 * (K * D + 2 * n_layers * D * HP)
                           + 4 * (4 * D + n_layers * (HP + D))),
    )(xp, p["proj_w"], p["proj_b"], p["pe_norm_g"], p["pe_norm_b"],
      p["pe_w1"], p["pe_b1"], p["pe_w2"], p["pe_b2"])
    return out[:M]


# ----- kernel 2: fused MHA block (QKV + batched-head attn + out proj + LN) ---
def _attn_block_kernel(x_ref, wqkv_ref, bqkv_ref, wo_ref, bo_ref,
                       g_ref, be_ref, o_ref, *, num_heads, dim):
    x = x_ref[0]                                              # (L, D) f32
    L = x.shape[0]
    hd = dim // num_heads
    # packed QKV projection; lane width padded to a multiple of 128 at init and
    # the softmax scale already folded into the Q columns.
    qkv = jnp.dot(_bf16(x), wqkv_ref[...],
                  preferred_element_type=jnp.float32) + bqkv_ref[...]

    def to_heads(z):                                          # (L, D) -> (H, L, hd)
        return z.reshape(L, num_heads, hd).transpose(1, 0, 2)

    q = to_heads(qkv[:, 0 * dim:1 * dim])
    k = to_heads(qkv[:, 1 * dim:2 * dim])
    v = to_heads(qkv[:, 2 * dim:3 * dim])

    s = jnp.einsum('hqd,hkd->hqk', _bf16(q), _bf16(k),
                   preferred_element_type=jnp.float32)        # (H, L, L)
    s = s - jnp.max(s, axis=-1, keepdims=True)
    pr = jnp.exp(s)
    pr = pr * pl.reciprocal(jnp.sum(pr, axis=-1, keepdims=True), approx=True)
    ctx = jnp.einsum('hqk,hkd->hqd', _bf16(pr), _bf16(v),
                     preferred_element_type=jnp.float32)      # (H, L, hd)
    ctx = ctx.transpose(1, 0, 2).reshape(L, dim)              # (L, D)

    attn = jnp.dot(_bf16(ctx), wo_ref[...],
                   preferred_element_type=jnp.float32) + bo_ref[...]
    o_ref[0] = _layernorm(x + attn, g_ref[...], be_ref[...]).astype(o_ref.dtype)


def attention_block(x_bld, p, *, num_heads):
    B, L, D = x_bld.shape
    QKVP = p["attn_wqkv"].shape[1]
    const2 = lambda b: (0, 0)
    return pl.pallas_call(
        functools.partial(_attn_block_kernel, num_heads=num_heads, dim=D),
        out_shape=jax.ShapeDtypeStruct((B, L, D), jnp.float32),
        grid=(B,),
        in_specs=[
            pl.BlockSpec((1, L, D), lambda b: (b, 0, 0)),
            pl.BlockSpec((D, QKVP), const2),
            pl.BlockSpec((1, QKVP), const2),
            pl.BlockSpec((D, D), const2),
            pl.BlockSpec((1, D), const2),
            pl.BlockSpec((1, D), const2),
            pl.BlockSpec((1, D), const2),
        ],
        out_specs=pl.BlockSpec((1, L, D), lambda b: (b, 0, 0)),
        compiler_params=pltpu.CompilerParams(
            dimension_semantics=("parallel",), vmem_limit_bytes=VMEM_LIMIT),
        cost_estimate=pl.CostEstimate(
            flops=2 * B * L * D * QKVP + 4 * B * L * L * D + 2 * B * L * D * D,
            transcendentals=B * num_heads * L * L,
            bytes_accessed=8 * B * L * D + 2 * (D * QKVP + D * D)
                           + 4 * (QKVP + 3 * D)),
    )(x_bld, p["attn_wqkv"], p["attn_bqkv"], p["attn_wo"], p["attn_bo"],
      p["norm1_g"], p["norm1_b"])


# ----- kernel 3: 8-layer residual MLP chain (+ shared norm2), fused ----------
def _res_mlp_chain_kernel(x_ref, w1_ref, b1_ref, w2_ref, b2_ref,
                          g_ref, be_ref, o_ref, *, n_layers):
    x = x_ref[...]
    g, be = g_ref[...], be_ref[...]
    for l in range(n_layers):                 # static unroll, weights resident
        h = jnp.dot(_bf16(x), w1_ref[l], preferred_element_type=jnp.float32) + b1_ref[l]
        h = jnp.maximum(h, 0.0)
        y = jnp.dot(_bf16(h), w2_ref[l], preferred_element_type=jnp.float32) + b2_ref[l]
        x = _layernorm(x + y, g, be)
    o_ref[...] = x.astype(o_ref.dtype)


def res_mlp_chain(x2d, p):
    M, D = x2d.shape
    n_layers, _, HP = p["blk_w1"].shape
    tile_m, Mp = _tile_rows(M)
    xp = _pad_rows(x2d, Mp)
    const2 = lambda i: (0, 0)
    const3 = lambda i: (0, 0, 0)
    out = pl.pallas_call(
        functools.partial(_res_mlp_chain_kernel, n_layers=n_layers),
        out_shape=jax.ShapeDtypeStruct((Mp, D), jnp.float32),
        grid=(Mp // tile_m,),
        in_specs=[
            pl.BlockSpec((tile_m, D), lambda i: (i, 0)),
            pl.BlockSpec((n_layers, D, HP), const3),
            pl.BlockSpec((n_layers, 1, HP), const3),
            pl.BlockSpec((n_layers, HP, D), const3),
            pl.BlockSpec((n_layers, 1, D), const3),
            pl.BlockSpec((1, D), const2),
            pl.BlockSpec((1, D), const2),
        ],
        out_specs=pl.BlockSpec((tile_m, D), lambda i: (i, 0)),
        compiler_params=pltpu.CompilerParams(
            dimension_semantics=("parallel",), vmem_limit_bytes=VMEM_LIMIT),
        cost_estimate=pl.CostEstimate(
            flops=4 * n_layers * Mp * D * HP,
            transcendentals=0,
            bytes_accessed=8 * Mp * D + 4 * n_layers * D * HP
                           + 4 * n_layers * (HP + D) + 8 * D),
    )(xp, p["blk_w1"], p["blk_b1"], p["blk_w2"], p["blk_b2"],
      p["norm2_g"], p["norm2_b"])
    return out[:M]


# ----- kernel 4: head + bilinear upsample, lane-dense transposed output ------
def _head_interp_kernel(t_ref, wh_ref, bh_ref, it_ref, o_ref):
    t = t_ref[0]                                              # (L, D)
    y = jnp.dot(_bf16(t), wh_ref[...],
                preferred_element_type=jnp.float32) + bh_ref[...]       # (L, NC)
    # (NC, H*W) = y^T @ interp^T : contraction over L, lane-dense store (H*W).
    o_ref[0] = jax.lax.dot_general(
        y, it_ref[...], (((0,), (0,)), ((), ())),
        preferred_element_type=jnp.float32).astype(o_ref.dtype)


def head_and_upsample(tokens, p, H, W):
    B, L, D = tokens.shape
    NC = p["head_w"].shape[1]
    HW = p["interp_t"].shape[1]
    const2 = lambda b: (0, 0)
    out = pl.pallas_call(
        _head_interp_kernel,
        out_shape=jax.ShapeDtypeStruct((B, NC, HW), jnp.float32),
        grid=(B,),
        in_specs=[
            pl.BlockSpec((1, L, D), lambda b: (b, 0, 0)),
            pl.BlockSpec((D, NC), const2),
            pl.BlockSpec((1, NC), const2),
            pl.BlockSpec((L, HW), const2),
        ],
        out_specs=pl.BlockSpec((1, NC, HW), lambda b: (b, 0, 0)),
        compiler_params=pltpu.CompilerParams(
            dimension_semantics=("parallel",), vmem_limit_bytes=VMEM_LIMIT),
        cost_estimate=pl.CostEstimate(
            flops=2 * B * L * D * NC + 2 * B * NC * L * HW,
            transcendentals=0,
            bytes_accessed=4 * (B * L * D + B * NC * HW + L * HW) + 2 * D * NC),
    )(tokens, p["head_w"], p["head_b"], p["interp_t"])
    # (B, NC, H*W) -> (B, H, W, NC)
    return out.reshape(B, NC, H, W).transpose(0, 2, 3, 1)


# -------------------------- parameter construction ---------------------------
def _bilinear_matrix(out_size, in_size):
    """1-D resampling matrix matching F.interpolate(bilinear, align_corners=False)."""
    A = np.zeros((out_size, in_size), np.float32)
    scale = in_size / out_size
    for i in range(out_size):
        src = scale * (i + 0.5) - 0.5
        src = max(src, 0.0)
        i0 = min(int(np.floor(src)), in_size - 1)
        i1 = min(i0 + 1, in_size - 1)
        lam = src - i0
        A[i, i0] += 1.0 - lam
        A[i, i1] += lam
    return A


def _linear_init(key, fan_in, shape_w, shape_b):
    kw, kb = jax.random.split(key)
    bound = 1.0 / math.sqrt(fan_in)
    w = jax.random.uniform(kw, shape_w, jnp.float32, -bound, bound)
    b = jax.random.uniform(kb, shape_b, jnp.float32, -bound, bound)
    return w, b


def init_params(key, in_channels, patch_size, embed_dim, num_heads, mlp_ratio,
                num_classes, H, W):
    D = embed_dim
    hid15 = int(D * 1.5)
    hidm = int(D * mlp_ratio)
    HP = _round_up(max(hid15, hidm, 1), 128)       # lane-padded hidden width
    QKVP = _round_up(3 * D, 128)                   # lane-padded packed QKV width
    keys = iter(jax.random.split(key, 64))
    p = {}

    k_in = patch_size * patch_size * in_channels
    pw, pb = _linear_init(next(keys), k_in, (k_in, D), (D,))
    p["proj_w"] = pw.astype(jnp.bfloat16)
    p["proj_b"] = pb.reshape(1, D)
    p["pe_norm_g"] = jnp.ones((1, D), jnp.float32)
    p["pe_norm_b"] = jnp.zeros((1, D), jnp.float32)

    def mlp_stack(hiddens):
        w1s, b1s, w2s, b2s = [], [], [], []
        for hid in hiddens:
            w1, b1 = _linear_init(next(keys), D, (D, hid), (hid,))
            w2, b2 = _linear_init(next(keys), hid, (hid, D), (D,))
            w1s.append(jnp.pad(w1, ((0, 0), (0, HP - hid))))   # zero cols: exact
            b1s.append(jnp.pad(b1, ((0, HP - hid),)))
            w2s.append(jnp.pad(w2, ((0, HP - hid), (0, 0))))   # zero rows: exact
            b2s.append(b2)
        return (jnp.stack(w1s).astype(jnp.bfloat16), jnp.stack(b1s)[:, None, :],
                jnp.stack(w2s).astype(jnp.bfloat16), jnp.stack(b2s)[:, None, :])

    # PatchEmbedding.layers: 7x (D -> 1.5D -> D), no residual / no norm
    p["pe_w1"], p["pe_b1"], p["pe_w2"], p["pe_b2"] = mlp_stack([hid15] * 7)

    # MultiheadAttention: packed QKV, 1/sqrt(head_dim) folded into the Q part
    wqkv, bqkv = _linear_init(next(keys), D, (D, 3 * D), (3 * D,))
    scale = 1.0 / math.sqrt(D // num_heads)
    wqkv = wqkv.at[:, :D].multiply(scale)
    bqkv = bqkv.at[:D].multiply(scale)
    p["attn_wqkv"] = jnp.pad(wqkv, ((0, 0), (0, QKVP - 3 * D))).astype(jnp.bfloat16)
    p["attn_bqkv"] = jnp.pad(bqkv, ((0, QKVP - 3 * D),)).reshape(1, QKVP)
    wo, bo = _linear_init(next(keys), D, (D, D), (D,))
    p["attn_wo"] = wo.astype(jnp.bfloat16)
    p["attn_bo"] = bo.reshape(1, D)
    p["norm1_g"] = jnp.ones((1, D), jnp.float32)
    p["norm1_b"] = jnp.zeros((1, D), jnp.float32)
    p["norm2_g"] = jnp.ones((1, D), jnp.float32)
    p["norm2_b"] = jnp.zeros((1, D), jnp.float32)

    # block.mlp (mlp_ratio hidden) + 7 mlp_layers (1.5D hidden), all residual+norm2
    p["blk_w1"], p["blk_b1"], p["blk_w2"], p["blk_b2"] = mlp_stack([hidm] + [hid15] * 7)

    wh, bh = _linear_init(next(keys), D, (D, num_classes), (num_classes,))
    p["head_w"] = wh.astype(jnp.bfloat16)
    p["head_b"] = bh.reshape(1, num_classes)

    pH, pW = H // patch_size, W // patch_size
    interp = np.kron(_bilinear_matrix(H, pH), _bilinear_matrix(W, pW))   # (H*W, L)
    p["interp_t"] = jnp.asarray(interp.T, jnp.float32)                    # (L, H*W)
    return p


# ------------------------------- forward pass --------------------------------
def swin_forward(x, params, *, patch_size, num_heads):
    B, H, W, C = x.shape
    pH, pW = H // patch_size, W // patch_size
    L = pH * pW
    M = B * L
    D = params["proj_w"].shape[1]

    # PatchEmbedding: Conv2d(kernel=stride=patch) == patchify (pure layout) + matmul.
    patches = x.astype(jnp.float32).reshape(B, pH, patch_size, pW, patch_size, C)
    patches = patches.transpose(0, 1, 3, 2, 4, 5).reshape(M, patch_size * patch_size * C)

    t = patch_embed(patches, params)                                     # (M, D)
    t = attention_block(t.reshape(B, L, D), params, num_heads=num_heads) # (B, L, D)
    t = res_mlp_chain(t.reshape(M, D), params)                           # (M, D)
    return head_and_upsample(t.reshape(B, L, D), params, H, W)           # (B, H, W, NC)


if __name__ == "__main__":
    key = jax.random.PRNGKey(0)
    B, H, W, C = 2, 16, 16, 4
    patch_size, embed_dim, num_heads, mlp_ratio, num_classes = 4, 32, 4, 2.0, 8

    pkey, xkey = jax.random.split(key)
    params = init_params(pkey, C, patch_size, embed_dim, num_heads, mlp_ratio,
                         num_classes, H, W)
    x = jax.random.uniform(xkey, (B, H, W, C), dtype=jnp.float32)

    fwd = jax.jit(functools.partial(swin_forward, patch_size=patch_size,
                                    num_heads=num_heads))
    out = fwd(x, params)
    jax.block_until_ready(out)

    assert out.shape == (B, H, W, num_classes)
    assert out.dtype == jnp.float32
    assert bool(jnp.all(jnp.isfinite(out)))
    print("KERNEL_OK")
</pallas_src>

<mosaic_0001>
module attributes {stable_mosaic.version = 11 : i64} {
  func.func @_attn_block_kernel(%arg0: i32, %arg1: memref<1x16x32xf32, #tpu.memory_space<vmem>>, %arg2: memref<32x128xbf16, #tpu.memory_space<vmem>>, %arg3: memref<1x128xf32, #tpu.memory_space<vmem>>, %arg4: memref<32x32xbf16, #tpu.memory_space<vmem>>, %arg5: memref<1x32xf32, #tpu.memory_space<vmem>>, %arg6: memref<1x32xf32, #tpu.memory_space<vmem>>, %arg7: memref<1x32xf32, #tpu.memory_space<vmem>>, %arg8: memref<1x16x32xf32, #tpu.memory_space<vmem>>) attributes {dimension_semantics = [#tpu.dimension_semantics<parallel>], iteration_bounds = array<i64: 2>, scalar_prefetch = 0 : i64, scratch_operands = 0 : i64, tpu.core_type = #tpu.core_type<tc>, window_params = [{transform_indices = @transform_0, window_bounds = array<i64: 1, 16, 32>}, {pipeline_mode = #tpu.pipeline_mode<synchronous>, transform_indices = @transform_1, window_bounds = array<i64: 32, 128>}, {pipeline_mode = #tpu.pipeline_mode<synchronous>, transform_indices = @transform_2, window_bounds = array<i64: 1, 128>}, {pipeline_mode = #tpu.pipeline_mode<synchronous>, transform_indices = @transform_3, window_bounds = array<i64: 32, 32>}, {pipeline_mode = #tpu.pipeline_mode<synchronous>, transform_indices = @transform_4, window_bounds = array<i64: 1, 32>}, {pipeline_mode = #tpu.pipeline_mode<synchronous>, transform_indices = @transform_5, window_bounds = array<i64: 1, 32>}, {pipeline_mode = #tpu.pipeline_mode<synchronous>, transform_indices = @transform_6, window_bounds = array<i64: 1, 32>}, {transform_indices = @transform_7, window_bounds = array<i64: 1, 16, 32>}]} {
    %c0 = arith.constant 0 : index
    %c0_0 = arith.constant 0 : index
    %c0_1 = arith.constant 0 : index
    %0 = vector.load %arg1[%c0, %c0_0, %c0_1] : memref<1x16x32xf32, #tpu.memory_space<vmem>>, vector<1x16x32xf32>
    %1 = vector.shape_cast %0 : vector<1x16x32xf32> to vector<16x32xf32>
    %2 = arith.truncf %1 : vector<16x32xf32> to vector<16x32xbf16>
    %c0_2 = arith.constant 0 : index
    %c0_3 = arith.constant 0 : index
    %3 = vector.load %arg2[%c0_2, %c0_3] : memref<32x128xbf16, #tpu.memory_space<vmem>>, vector<32x128xbf16>
    %cst = arith.constant dense<0.000000e+00> : vector<16x128xf32>
    %4 = tpu.matmul %2, %3, %cst {dimension_numbers = #tpu.dot_dimension_numbers<[1], [0], [0], [1], [0, 0, 1, 1], [], []>} : vector<16x32xbf16>, vector<32x128xbf16>, vector<16x128xf32> -> vector<16x128xf32>
    %c0_4 = arith.constant 0 : index
    %c0_5 = arith.constant 0 : index
    %5 = vector.load %arg3[%c0_4, %c0_5] : memref<1x128xf32, #tpu.memory_space<vmem>>, vector<1x128xf32>
    %6 = vector.broadcast %5 : vector<1x128xf32> to vector<16x128xf32>
    %7 = arith.addf %4, %6 : vector<16x128xf32>
    %8 = vector.extract_strided_slice %7 {offsets = [0, 0], sizes = [16, 32], strides = [1, 1]} : vector<16x128xf32> to vector<16x32xf32>
    %9 = vector.shape_cast %8 : vector<16x32xf32> to vector<16x4x8xf32>
    %10 = tpu.transpose %9, [1, 0, 2] : vector<16x4x8xf32> -> vector<4x16x8xf32>
    %11 = vector.extract_strided_slice %7 {offsets = [0, 32], sizes = [16, 32], strides = [1, 1]} : vector<16x128xf32> to vector<16x32xf32>
    %12 = vector.shape_cast %11 : vector<16x32xf32> to vector<16x4x8xf32>
    %13 = tpu.transpose %12, [1, 0, 2] : vector<16x4x8xf32> -> vector<4x16x8xf32>
    %14 = vector.extract_strided_slice %7 {offsets = [0, 64], sizes = [16, 32], strides = [1, 1]} : vector<16x128xf32> to vector<16x32xf32>
    %15 = vector.shape_cast %14 : vector<16x32xf32> to vector<16x4x8xf32>
    %16 = tpu.transpose %15, [1, 0, 2] : vector<16x4x8xf32> -> vector<4x16x8xf32>
    %17 = arith.truncf %10 : vector<4x16x8xf32> to vector<4x16x8xbf16>
    %18 = arith.truncf %13 : vector<4x16x8xf32> to vector<4x16x8xbf16>
    "tpu.trace_start"() <{level = 10 : i32, message = "hqd,hkd->hqk"}> : () -> ()
    %cst_6 = arith.constant dense<0.000000e+00> : vector<4x16x16xf32>
    %19 = tpu.matmul %17, %18, %cst_6 {dimension_numbers = #tpu.dot_dimension_numbers<[2], [2], [1], [1], [0, 0, 0, 1, 1, 1], [0], [0]>} : vector<4x16x8xbf16>, vector<4x16x8xbf16>, vector<4x16x16xf32> -> vector<4x16x16xf32>
    "tpu.trace_stop"() : () -> ()
    %cst_7 = arith.constant dense<0xFF800000> : vector<4x16xf32>
    %20 = vector.multi_reduction <maximumf>, %19, %cst_7 [2] : vector<4x16x16xf32> to vector<4x16xf32>
    %21 = vector.shape_cast %20 : vector<4x16xf32> to vector<4x16x1xf32>
    %22 = vector.broadcast %21 : vector<4x16x1xf32> to vector<4x16x16xf32>
    %23 = arith.subf %19, %22 : vector<4x16x16xf32>
    %24 = math.exp %23 : vector<4x16x16xf32>
    %cst_8 = arith.constant dense<0.000000e+00> : vector<4x16xf32>
    %25 = vector.multi_reduction <add>, %24, %cst_8 [2] : vector<4x16x16xf32> to vector<4x16xf32>
    %26 = vector.shape_cast %25 : vector<4x16xf32> to vector<4x16x1xf32>
    %27 = tpu.reciprocal %26 {approx = true} : vector<4x16x1xf32> -> vector<4x16x1xf32>
    %28 = vector.broadcast %27 : vector<4x16x1xf32> to vector<4x16x16xf32>
    %29 = arith.mulf %24, %28 : vector<4x16x16xf32>
    %30 = arith.truncf %29 : vector<4x16x16xf32> to vector<4x16x16xbf16>
    %31 = arith.truncf %16 : vector<4x16x8xf32> to vector<4x16x8xbf16>
    "tpu.trace_start"() <{level = 10 : i32, message = "hqk,hkd->hqd"}> : () -> ()
    %cst_9 = arith.constant dense<0.000000e+00> : vector<4x16x8xf32>
    %32 = tpu.matmul %30, %31, %cst_9 {dimension_numbers = #tpu.dot_dimension_numbers<[2], [1], [1], [2], [0, 0, 0, 1, 1, 2], [0], [0]>} : vector<4x16x16xbf16>, vector<4x16x8xbf16>, vector<4x16x8xf32> -> vector<4x16x8xf32>
    "tpu.trace_stop"() : () -> ()
    %33 = tpu.transpose %32, [1, 0, 2] : vector<4x16x8xf32> -> vector<16x4x8xf32>
    %34 = vector.shape_cast %33 : vector<16x4x8xf32> to vector<16x32xf32>
    %35 = arith.truncf %34 : vector<16x32xf32> to vector<16x32xbf16>
    %c0_10 = arith.constant 0 : index
    %c0_11 = arith.constant 0 : index
    %36 = vector.load %arg4[%c0_10, %c0_11] : memref<32x32xbf16, #tpu.memory_space<vmem>>, vector<32x32xbf16>
    %cst_12 = arith.constant dense<0.000000e+00> : vector<16x32xf32>
    %37 = tpu.matmul %35, %36, %cst_12 {dimension_numbers = #tpu.dot_dimension_numbers<[1], [0], [0], [1], [0, 0, 1, 1], [], []>} : vector<16x32xbf16>, vector<32x32xbf16>, vector<16x32xf32> -> vector<16x32xf32>
    %c0_13 = arith.constant 0 : index
    %c0_14 = arith.constant 0 : index
    %38 = vector.load %arg5[%c0_13, %c0_14] : memref<1x32xf32, #tpu.memory_space<vmem>>, vector<1x32xf32>
    %39 = vector.broadcast %38 : vector<1x32xf32> to vector<16x32xf32>
    %40 = arith.addf %37, %39 : vector<16x32xf32>
    %41 = arith.addf %1, %40 : vector<16x32xf32>
    %c0_15 = arith.constant 0 : index
    %c0_16 = arith.constant 0 : index
    %42 = vector.load %arg6[%c0_15, %c0_16] : memref<1x32xf32, #tpu.memory_space<vmem>>, vector<1x32xf32>
    %c0_17 = arith.constant 0 : index
    %c0_18 = arith.constant 0 : index
    %43 = vector.load %arg7[%c0_17, %c0_18] : memref<1x32xf32, #tpu.memory_space<vmem>>, vector<1x32xf32>
    %cst_19 = arith.constant dense<0.000000e+00> : vector<16xf32>
    %44 = vector.multi_reduction <add>, %41, %cst_19 [1] : vector<16x32xf32> to vector<16xf32>
    %45 = vector.shape_cast %44 : vector<16xf32> to vector<16x1xf32>
    %cst_20 = arith.constant 3.200000e+01 : f32
    %46 = vector.broadcast %cst_20 : f32 to vector<16x1xf32>
    %47 = arith.divf %45, %46 : vector<16x1xf32>
    %48 = vector.broadcast %47 : vector<16x1xf32> to vector<16x32xf32>
    %49 = arith.subf %41, %48 : vector<16x32xf32>
    %50 = arith.mulf %49, %49 : vector<16x32xf32>
    %cst_21 = arith.constant dense<0.000000e+00> : vector<16xf32>
    %51 = vector.multi_reduction <add>, %50, %cst_21 [1] : vector<16x32xf32> to vector<16xf32>
    %52 = vector.shape_cast %51 : vector<16xf32> to vector<16x1xf32>
    %cst_22 = arith.constant 3.200000e+01 : f32
    %53 = vector.broadcast %cst_22 : f32 to vector<16x1xf32>
    %54 = arith.divf %52, %53 : vector<16x1xf32>
    %55 = vector.broadcast %47 : vector<16x1xf32> to vector<16x32xf32>
    %56 = arith.subf %41, %55 : vector<16x32xf32>
    %cst_23 = arith.constant 9.99999974E-6 : f32
    %57 = vector.broadcast %cst_23 : f32 to vector<16x1xf32>
    %58 = arith.addf %54, %57 : vector<16x1xf32>
    %59 = math.rsqrt %58 : vector<16x1xf32>
    %60 = vector.broadcast %59 : vector<16x1xf32> to vector<16x32xf32>
    %61 = arith.mulf %56, %60 : vector<16x32xf32>
    %62 = vector.broadcast %42 : vector<1x32xf32> to vector<16x32xf32>
    %63 = arith.mulf %61, %62 : vector<16x32xf32>
    %64 = vector.broadcast %43 : vector<1x32xf32> to vector<16x32xf32>
    %65 = arith.addf %63, %64 : vector<16x32xf32>
    %c0_24 = arith.constant 0 : index
    %c0_25 = arith.constant 0 : index
    %c0_26 = arith.constant 0 : index
    %66 = vector.load %arg8[%c0_24, %c0_25, %c0_26] : memref<1x16x32xf32, #tpu.memory_space<vmem>>, vector<1x16x32xf32>
    %67 = vector.shape_cast %66 : vector<1x16x32xf32> to vector<16x32xf32>
    %68 = vector.shape_cast %65 : vector<16x32xf32> to vector<1x16x32xf32>
    tpu.vector_store %arg8[%c0_24, %c0_25, %c0_26], %68 {strides = array<i32>} : memref<1x16x32xf32, #tpu.memory_space<vmem>>, vector<1x16x32xf32>,
    return
  }
  func.func @transform_0(%arg0: i32) -> (i32, i32, i32) {
    %c0_i32 = arith.constant 0 : i32
    %c0_i32_0 = arith.constant 0 : i32
    %c0_i32_1 = arith.constant 0 : i32
    return %arg0, %c0_i32, %c0_i32_0 : i32, i32, i32
  }
  func.func @transform_1(%arg0: i32) -> (i32, i32) {
    %c0_i32 = arith.constant 0 : i32
    %c0_i32_0 = arith.constant 0 : i32
    %c0_i32_1 = arith.constant 0 : i32
    return %c0_i32, %c0_i32_0 : i32, i32
  }
  func.func @transform_2(%arg0: i32) -> (i32, i32) {
    %c0_i32 = arith.constant 0 : i32
    %c0_i32_0 = arith.constant 0 : i32
    %c0_i32_1 = arith.constant 0 : i32
    return %c0_i32, %c0_i32_0 : i32, i32
  }
  func.func @transform_3(%arg0: i32) -> (i32, i32) {
    %c0_i32 = arith.constant 0 : i32
    %c0_i32_0 = arith.constant 0 : i32
    %c0_i32_1 = arith.constant 0 : i32
    return %c0_i32, %c0_i32_0 : i32, i32
  }
  func.func @transform_4(%arg0: i32) -> (i32, i32) {
    %c0_i32 = arith.constant 0 : i32
    %c0_i32_0 = arith.constant 0 : i32
    %c0_i32_1 = arith.constant 0 : i32
    return %c0_i32, %c0_i32_0 : i32, i32
  }
  func.func @transform_5(%arg0: i32) -> (i32, i32) {
    %c0_i32 = arith.constant 0 : i32
    %c0_i32_0 = arith.constant 0 : i32
    %c0_i32_1 = arith.constant 0 : i32
    return %c0_i32, %c0_i32_0 : i32, i32
  }
  func.func @transform_6(%arg0: i32) -> (i32, i32) {
    %c0_i32 = arith.constant 0 : i32
    %c0_i32_0 = arith.constant 0 : i32
    %c0_i32_1 = arith.constant 0 : i32
    return %c0_i32, %c0_i32_0 : i32, i32
  }
  func.func @transform_7(%arg0: i32) -> (i32, i32, i32) {
    %c0_i32 = arith.constant 0 : i32
    %c0_i32_0 = arith.constant 0 : i32
    %c0_i32_1 = arith.constant 0 : i32
    return %arg0, %c0_i32, %c0_i32_0 : i32, i32, i32
  }
}

module attributes {stable_mosaic.version = 11 : i64} {
  func.func @_patch_embed_kernel(%arg0: i32, %arg1: memref<16x64xf32, #tpu.memory_space<vmem>>, %arg2: memref<64x32xbf16, #tpu.memory_space<vmem>>, %arg3: memref<1x32xf32, #tpu.memory_space<vmem>>, %arg4: memref<1x32xf32, #tpu.memory_space<vmem>>, %arg5: memref<1x32xf32, #tpu.memory_space<vmem>>, %arg6: memref<7x32x128xbf16, #tpu.memory_space<vmem>>, %arg7: memref<7x1x128xf32, #tpu.memory_space<vmem>>, %arg8: memref<7x128x32xbf16, #tpu.memory_space<vmem>>, %arg9: memref<7x1x32xf32, #tpu.memory_space<vmem>>, %arg10: memref<16x32xf32, #tpu.memory_space<vmem>>) attributes {dimension_semantics = [#tpu.dimension_semantics<parallel>], iteration_bounds = array<i64: 2>, scalar_prefetch = 0 : i64, scratch_operands = 0 : i64, tpu.core_type = #tpu.core_type<tc>, window_params = [{transform_indices = @transform_0, window_bounds = array<i64: 16, 64>}, {pipeline_mode = #tpu.pipeline_mode<synchronous>, transform_indices = @transform_1, window_bounds = array<i64: 64, 32>}, {pipeline_mode = #tpu.pipeline_mode<synchronous>, transform_indices = @transform_2, window_bounds = array<i64: 1, 32>}, {pipeline_mode = #tpu.pipeline_mode<synchronous>, transform_indices = @transform_3, window_bounds = array<i64: 1, 32>}, {pipeline_mode = #tpu.pipeline_mode<synchronous>, transform_indices = @transform_4, window_bounds = array<i64: 1, 32>}, {pipeline_mode = #tpu.pipeline_mode<synchronous>, transform_indices = @transform_5, window_bounds = array<i64: 7, 32, 128>}, {pipeline_mode = #tpu.pipeline_mode<synchronous>, transform_indices = @transform_6, window_bounds = array<i64: 7, 1, 128>}, {pipeline_mode = #tpu.pipeline_mode<synchronous>, transform_indices = @transform_7, window_bounds = array<i64: 7, 128, 32>}, {pipeline_mode = #tpu.pipeline_mode<synchronous>, transform_indices = @transform_8, window_bounds = array<i64: 7, 1, 32>}, {transform_indices = @transform_9, window_bounds = array<i64: 16, 32>}]} {
    %c0 = arith.constant 0 : index
    %c0_0 = arith.constant 0 : index
    %0 = vector.load %arg1[%c0, %c0_0] : memref<16x64xf32, #tpu.memory_space<vmem>>, vector<16x64xf32>
    %1 = arith.truncf %0 : vector<16x64xf32> to vector<16x64xbf16>
    %c0_1 = arith.constant 0 : index
    %c0_2 = arith.constant 0 : index
    %2 = vector.load %arg2[%c0_1, %c0_2] : memref<64x32xbf16, #tpu.memory_space<vmem>>, vector<64x32xbf16>
    %cst = arith.constant dense<0.000000e+00> : vector<16x32xf32>
    %3 = tpu.matmul %1, %2, %cst {dimension_numbers = #tpu.dot_dimension_numbers<[1], [0], [0], [1], [0, 0, 1, 1], [], []>} : vector<16x64xbf16>, vector<64x32xbf16>, vector<16x32xf32> -> vector<16x32xf32>
    %c0_3 = arith.constant 0 : index
    %c0_4 = arith.constant 0 : index
    %4 = vector.load %arg3[%c0_3, %c0_4] : memref<1x32xf32, #tpu.memory_space<vmem>>, vector<1x32xf32>
    %5 = vector.broadcast %4 : vector<1x32xf32> to vector<16x32xf32>
    %6 = arith.addf %3, %5 : vector<16x32xf32>
    %c0_5 = arith.constant 0 : index
    %c0_6 = arith.constant 0 : index
    %7 = vector.load %arg4[%c0_5, %c0_6] : memref<1x32xf32, #tpu.memory_space<vmem>>, vector<1x32xf32>
    %c0_7 = arith.constant 0 : index
    %c0_8 = arith.constant 0 : index
    %8 = vector.load %arg5[%c0_7, %c0_8] : memref<1x32xf32, #tpu.memory_space<vmem>>, vector<1x32xf32>
    %cst_9 = arith.constant dense<0.000000e+00> : vector<16xf32>
    %9 = vector.multi_reduction <add>, %6, %cst_9 [1] : vector<16x32xf32> to vector<16xf32>
    %10 = vector.shape_cast %9 : vector<16xf32> to vector<16x1xf32>
    %cst_10 = arith.constant 3.200000e+01 : f32
    %11 = vector.broadcast %cst_10 : f32 to vector<16x1xf32>
    %12 = arith.divf %10, %11 : vector<16x1xf32>
    %13 = vector.broadcast %12 : vector<16x1xf32> to vector<16x32xf32>
    %14 = arith.subf %6, %13 : vector<16x32xf32>
    %15 = arith.mulf %14, %14 : vector<16x32xf32>
    %cst_11 = arith.constant dense<0.000000e+00> : vector<16xf32>
    %16 = vector.multi_reduction <add>, %15, %cst_11 [1] : vector<16x32xf32> to vector<16xf32>
    %17 = vector.shape_cast %16 : vector<16xf32> to vector<16x1xf32>
    %cst_12 = arith.constant 3.200000e+01 : f32
    %18 = vector.broadcast %cst_12 : f32 to vector<16x1xf32>
    %19 = arith.divf %17, %18 : vector<16x1xf32>
    %20 = vector.broadcast %12 : vector<16x1xf32> to vector<16x32xf32>
    %21 = arith.subf %6, %20 : vector<16x32xf32>
    %cst_13 = arith.constant 9.99999974E-6 : f32
    %22 = vector.broadcast %cst_13 : f32 to vector<16x1xf32>
    %23 = arith.addf %19, %22 : vector<16x1xf32>
    %24 = math.rsqrt %23 : vector<16x1xf32>
    %25 = vector.broadcast %24 : vector<16x1xf32> to vector<16x32xf32>
    %26 = arith.mulf %21, %25 : vector<16x32xf32>
    %27 = vector.broadcast %7 : vector<1x32xf32> to vector<16x32xf32>
    %28 = arith.mulf %26, %27 : vector<16x32xf32>
    %29 = vector.broadcast %8 : vector<1x32xf32> to vector<16x32xf32>
    %30 = arith.addf %28, %29 : vector<16x32xf32>
    %31 = arith.truncf %30 : vector<16x32xf32> to vector<16x32xbf16>
    %c0_14 = arith.constant 0 : index
    %c0_15 = arith.constant 0 : index
    %c0_16 = arith.constant 0 : index
    %32 = vector.load %arg6[%c0_14, %c0_15, %c0_16] : memref<7x32x128xbf16, #tpu.memory_space<vmem>>, vector<1x32x128xbf16>
    %33 = vector.shape_cast %32 : vector<1x32x128xbf16> to vector<32x128xbf16>
    %cst_17 = arith.constant dense<0.000000e+00> : vector<16x128xf32>
    %34 = tpu.matmul %31, %33, %cst_17 {dimension_numbers = #tpu.dot_dimension_numbers<[1], [0], [0], [1], [0, 0, 1, 1], [], []>} : vector<16x32xbf16>, vector<32x128xbf16>, vector<16x128xf32> -> vector<16x128xf32>
    %c0_18 = arith.constant 0 : index
    %c0_19 = arith.constant 0 : index
    %c0_20 = arith.constant 0 : index
    %35 = vector.load %arg7[%c0_18, %c0_19, %c0_20] : memref<7x1x128xf32, #tpu.memory_space<vmem>>, vector<1x1x128xf32>
    %36 = vector.shape_cast %35 : vector<1x1x128xf32> to vector<1x128xf32>
    %37 = vector.broadcast %36 : vector<1x128xf32> to vector<16x128xf32>
    %38 = arith.addf %34, %37 : vector<16x128xf32>
    %cst_21 = arith.constant 0.000000e+00 : f32
    %39 = vector.broadcast %cst_21 : f32 to vector<16x128xf32>
    %40 = arith.maximumf %38, %39 : vector<16x128xf32>
    %41 = arith.truncf %40 : vector<16x128xf32> to vector<16x128xbf16>
    %c0_22 = arith.constant 0 : index
    %c0_23 = arith.constant 0 : index
    %c0_24 = arith.constant 0 : index
    %42 = vector.load %arg8[%c0_22, %c0_23, %c0_24] : memref<7x128x32xbf16, #tpu.memory_space<vmem>>, vector<1x128x32xbf16>
    %43 = vector.shape_cast %42 : vector<1x128x32xbf16> to vector<128x32xbf16>
    %cst_25 = arith.constant dense<0.000000e+00> : vector<16x32xf32>
    %44 = tpu.matmul %41, %43, %cst_25 {dimension_numbers = #tpu.dot_dimension_numbers<[1], [0], [0], [1], [0, 0, 1, 1], [], []>} : vector<16x128xbf16>, vector<128x32xbf16>, vector<16x32xf32> -> vector<16x32xf32>
    %c0_26 = arith.constant 0 : index
    %c0_27 = arith.constant 0 : index
    %c0_28 = arith.constant 0 : index
    %45 = vector.load %arg9[%c0_26, %c0_27, %c0_28] : memref<7x1x32xf32, #tpu.memory_space<vmem>>, vector<1x1x32xf32>
    %46 = vector.shape_cast %45 : vector<1x1x32xf32> to vector<1x32xf32>
    %47 = vector.broadcast %46 : vector<1x32xf32> to vector<16x32xf32>
    %48 = arith.addf %44, %47 : vector<16x32xf32>
    %49 = arith.truncf %48 : vector<16x32xf32> to vector<16x32xbf16>
    %c1 = arith.constant 1 : index
    %c0_29 = arith.constant 0 : index
    %c0_30 = arith.constant 0 : index
    %50 = vector.load %arg6[%c1, %c0_29, %c0_30] : memref<7x32x128xbf16, #tpu.memory_space<vmem>>, vector<1x32x128xbf16>
    %51 = vector.shape_cast %50 : vector<1x32x128xbf16> to vector<32x128xbf16>
    %cst_31 = arith.constant dense<0.000000e+00> : vector<16x128xf32>
    %52 = tpu.matmul %49, %51, %cst_31 {dimension_numbers = #tpu.dot_dimension_numbers<[1], [0], [0], [1], [0, 0, 1, 1], [], []>} : vector<16x32xbf16>, vector<32x128xbf16>, vector<16x128xf32> -> vector<16x128xf32>
    %c1_32 = arith.constant 1 : index
    %c0_33 = arith.constant 0 : index
    %c0_34 = arith.constant 0 : index
    %53 = vector.load %arg7[%c1_32, %c0_33, %c0_34] : memref<7x1x128xf32, #tpu.memory_space<vmem>>, vector<1x1x128xf32>
    %54 = vector.shape_cast %53 : vector<1x1x128xf32> to vector<1x128xf32>
    %55 = vector.broadcast %54 : vector<1x128xf32> to vector<16x128xf32>
    %56 = arith.addf %52, %55 : vector<16x128xf32>
    %cst_35 = arith.constant 0.000000e+00 : f32
    %57 = vector.broadcast %cst_35 : f32 to vector<16x128xf32>
    %58 = arith.maximumf %56, %57 : vector<16x128xf32>
    %59 = arith.truncf %58 : vector<16x128xf32> to vector<16x128xbf16>
    %c1_36 = arith.constant 1 : index
    %c0_37 = arith.constant 0 : index
    %c0_38 = arith.constant 0 : index
    %60 = vector.load %arg8[%c1_36, %c0_37, %c0_38] : memref<7x128x32xbf16, #tpu.memory_space<vmem>>, vector<1x128x32xbf16>
    %61 = vector.shape_cast %60 : vector<1x128x32xbf16> to vector<128x32xbf16>
    %cst_39 = arith.constant dense<0.000000e+00> : vector<16x32xf32>
    %62 = tpu.matmul %59, %61, %cst_39 {dimension_numbers = #tpu.dot_dimension_numbers<[1], [0], [0], [1], [0, 0, 1, 1], [], []>} : vector<16x128xbf16>, vector<128x32xbf16>, vector<16x32xf32> -> vector<16x32xf32>
    %c1_40 = arith.constant 1 : index
    %c0_41 = arith.constant 0 : index
    %c0_42 = arith.constant 0 : index
    %63 = vector.load %arg9[%c1_40, %c0_41, %c0_42] : memref<7x1x32xf32, #tpu.memory_space<vmem>>, vector<1x1x32xf32>
    %64 = vector.shape_cast %63 : vector<1x1x32xf32> to vector<1x32xf32>
    %65 = vector.broadcast %64 : vector<1x32xf32> to vector<16x32xf32>
    %66 = arith.addf %62, %65 : vector<16x32xf32>
    %67 = arith.truncf %66 : vector<16x32xf32> to vector<16x32xbf16>
    %c2 = arith.constant 2 : index
    %c0_43 = arith.constant 0 : index
    %c0_44 = arith.constant 0 : index
    %68 = vector.load %arg6[%c2, %c0_43, %c0_44] : memref<7x32x128xbf16, #tpu.memory_space<vmem>>, vector<1x32x128xbf16>
    %69 = vector.shape_cast %68 : vector<1x32x128xbf16> to vector<32x128xbf16>
    %cst_45 = arith.constant dense<0.000000e+00> : vector<16x128xf32>
    %70 = tpu.matmul %67, %69, %cst_45 {dimension_numbers = #tpu.dot_dimension_numbers<[1], [0], [0], [1], [0, 0, 1, 1], [], []>} : vector<16x32xbf16>, vector<32x128xbf16>, vector<16x128xf32> -> vector<16x128xf32>
    %c2_46 = arith.constant 2 : index
    %c0_47 = arith.constant 0 : index
    %c0_48 = arith.constant 0 : index
    %71 = vector.load %arg7[%c2_46, %c0_47, %c0_48] : memref<7x1x128xf32, #tpu.memory_space<vmem>>, vector<1x1x128xf32>
    %72 = vector.shape_cast %71 : vector<1x1x128xf32> to vector<1x128xf32>
    %73 = vector.broadcast %72 : vector<1x128xf32> to vector<16x128xf32>
    %74 = arith.addf %70, %73 : vector<16x128xf32>
    %cst_49 = arith.constant 0.000000e+00 : f32
    %75 = vector.broadcast %cst_49 : f32 to vector<16x128xf32>
    %76 = arith.maximumf %74, %75 : vector<16x128xf32>
    %77 = arith.truncf %76 : vector<16x128xf32> to vector<16x128xbf16>
    %c2_50 = arith.constant 2 : index
    %c0_51 = arith.constant 0 : index
    %c0_52 = arith.constant 0 : index
    %78 = vector.load %arg8[%c2_50, %c0_51, %c0_52] : memref<7x128x32xbf16, #tpu.memory_space<vmem>>, vector<1x128x32xbf16>
    %79 = vector.shape_cast %78 : vector<1x128x32xbf16> to vector<128x32xbf16>
    %cst_53 = arith.constant dense<0.000000e+00> : vector<16x32xf32>
    %80 = tpu.matmul %77, %79, %cst_53 {dimension_numbers = #tpu.dot_dimension_numbers<[1], [0], [0], [1], [0, 0, 1, 1], [], []>} : vector<16x128xbf16>, vector<128x32xbf16>, vector<16x32xf32> -> vector<16x32xf32>
    %c2_54 = arith.constant 2 : index
    %c0_55 = arith.constant 0 : index
    %c0_56 = arith.constant 0 : index
    %81 = vector.load %arg9[%c2_54, %c0_55, %c0_56] : memref<7x1x32xf32, #tpu.memory_space<vmem>>, vector<1x1x32xf32>
    %82 = vector.shape_cast %81 : vector<1x1x32xf32> to vector<1x32xf32>
    %83 = vector.broadcast %82 : vector<1x32xf32> to vector<16x32xf32>
    %84 = arith.addf %80, %83 : vector<16x32xf32>
    %85 = arith.truncf %84 : vector<16x32xf32> to vector<16x32xbf16>
    %c3 = arith.constant 3 : index
    %c0_57 = arith.constant 0 : index
    %c0_58 = arith.constant 0 : index
    %86 = vector.load %arg6[%c3, %c0_57, %c0_58] : memref<7x32x128xbf16, #tpu.memory_space<vmem>>, vector<1x32x128xbf16>
    %87 = vector.shape_cast %86 : vector<1x32x128xbf16> to vector<32x128xbf16>
    %cst_59 = arith.constant dense<0.000000e+00> : vector<16x128xf32>
    %88 = tpu.matmul %85, %87, %cst_59 {dimension_numbers = #tpu.dot_dimension_numbers<[1], [0], [0], [1], [0, 0, 1, 1], [], []>} : vector<16x32xbf16>, vector<32x128xbf16>, vector<16x128xf32> -> vector<16x128xf32>
    %c3_60 = arith.constant 3 : index
    %c0_61 = arith.constant 0 : index
    %c0_62 = arith.constant 0 : index
    %89 = vector.load %arg7[%c3_60, %c0_61, %c0_62] : memref<7x1x128xf32, #tpu.memory_space<vmem>>, vector<1x1x128xf32>
    %90 = vector.shape_cast %89 : vector<1x1x128xf32> to vector<1x128xf32>
    %91 = vector.broadcast %90 : vector<1x128xf32> to vector<16x128xf32>
    %92 = arith.addf %88, %91 : vector<16x128xf32>
    %cst_63 = arith.constant 0.000000e+00 : f32
    %93 = vector.broadcast %cst_63 : f32 to vector<16x128xf32>
    %94 = arith.maximumf %92, %93 : vector<16x128xf32>
    %95 = arith.truncf %94 : vector<16x128xf32> to vector<16x128xbf16>
    %c3_64 = arith.constant 3 : index
    %c0_65 = arith.constant 0 : index
    %c0_66 = arith.constant 0 : index
    %96 = vector.load %arg8[%c3_64, %c0_65, %c0_66] : memref<7x128x32xbf16, #tpu.memory_space<vmem>>, vector<1x128x32xbf16>
    %97 = vector.shape_cast %96 : vector<1x128x32xbf16> to vector<128x32xbf16>
    %cst_67 = arith.constant dense<0.000000e+00> : vector<16x32xf32>
    %98 = tpu.matmul %95, %97, %cst_67 {dimension_numbers = #tpu.dot_dimension_numbers<[1], [0], [0], [1], [0, 0, 1, 1], [], []>} : vector<16x128xbf16>, vector<128x32xbf16>, vector<16x32xf32> -> vector<16x32xf32>
    %c3_68 = arith.constant 3 : index
    %c0_69 = arith.constant 0 : index
    %c0_70 = arith.constant 0 : index
    %99 = vector.load %arg9[%c3_68, %c0_69, %c0_70] : memref<7x1x32xf32, #tpu.memory_space<vmem>>, vector<1x1x32xf32>
    %100 = vector.shape_cast %99 : vector<1x1x32xf32> to vector<1x32xf32>
    %101 = vector.broadcast %100 : vector<1x32xf32> to vector<16x32xf32>
    %102 = arith.addf %98, %101 : vector<16x32xf32>
    %103 = arith.truncf %102 : vector<16x32xf32> to vector<16x32xbf16>
    %c4 = arith.constant 4 : index
    %c0_71 = arith.constant 0 : index
    %c0_72 = arith.constant 0 : index
    %104 = vector.load %arg6[%c4, %c0_71, %c0_72] : memref<7x32x128xbf16, #tpu.memory_space<vmem>>, vector<1x32x128xbf16>
    %105 = vector.shape_cast %104 : vector<1x32x128xbf16> to vector<32x128xbf16>
    %cst_73 = arith.constant dense<0.000000e+00> : vector<16x128xf32>
    %106 = tpu.matmul %103, %105, %cst_73 {dimension_numbers = #tpu.dot_dimension_numbers<[1], [0], [0], [1], [0, 0, 1, 1], [], []>} : vector<16x32xbf16>, vector<32x128xbf16>, vector<16x128xf32> -> vector<16x128xf32>
    %c4_74 = arith.constant 4 : index
    %c0_75 = arith.constant 0 : index
    %c0_76 = arith.constant 0 : index
    %107 = vector.load %arg7[%c4_74, %c0_75, %c0_76] : memref<7x1x128xf32, #tpu.memory_space<vmem>>, vector<1x1x128xf32>
    %108 = vector.shape_cast %107 : vector<1x1x128xf32> to vector<1x128xf32>
    %109 = vector.broadcast %108 : vector<1x128xf32> to vector<16x128xf32>
    %110 = arith.addf %106, %109 : vector<16x128xf32>
    %cst_77 = arith.constant 0.000000e+00 : f32
    %111 = vector.broadcast %cst_77 : f32 to vector<16x128xf32>
    %112 = arith.maximumf %110, %111 : vector<16x128xf32>
    %113 = arith.truncf %112 : vector<16x128xf32> to vector<16x128xbf16>
    %c4_78 = arith.constant 4 : index
    %c0_79 = arith.constant 0 : index
    %c0_80 = arith.constant 0 : index
    %114 = vector.load %arg8[%c4_78, %c0_79, %c0_80] : memref<7x128x32xbf16, #tpu.memory_space<vmem>>, vector<1x128x32xbf16>
    %115 = vector.shape_cast %114 : vector<1x128x32xbf16> to vector<128x32xbf16>
    %cst_81 = arith.constant dense<0.000000e+00> : vector<16x32xf32>
    %116 = tpu.matmul %113, %115, %cst_81 {dimension_numbers = #tpu.dot_dimension_numbers<[1], [0], [0], [1], [0, 0, 1, 1], [], []>} : vector<16x128xbf16>, vector<128x32xbf16>, vector<16x32xf32> -> vector<16x32xf32>
    %c4_82 = arith.constant 4 : index
    %c0_83 = arith.constant 0 : index
    %c0_84 = arith.constant 0 : index
    %117 = vector.load %arg9[%c4_82, %c0_83, %c0_84] : memref<7x1x32xf32, #tpu.memory_space<vmem>>, vector<1x1x32xf32>
    %118 = vector.shape_cast %117 : vector<1x1x32xf32> to vector<1x32xf32>
    %119 = vector.broadcast %118 : vector<1x32xf32> to vector<16x32xf32>
    %120 = arith.addf %116, %119 : vector<16x32xf32>
    %121 = arith.truncf %120 : vector<16x32xf32> to vector<16x32xbf16>
    %c5 = arith.constant 5 : index
    %c0_85 = arith.constant 0 : index
    %c0_86 = arith.constant 0 : index
    %122 = vector.load %arg6[%c5, %c0_85, %c0_86] : memref<7x32x128xbf16, #tpu.memory_space<vmem>>, vector<1x32x128xbf16>
    %123 = vector.shape_cast %122 : vector<1x32x128xbf16> to vector<32x128xbf16>
    %cst_87 = arith.constant dense<0.000000e+00> : vector<16x128xf32>
    %124 = tpu.matmul %121, %123, %cst_87 {dimension_numbers = #tpu.dot_dimension_numbers<[1], [0], [0], [1], [0, 0, 1, 1], [], []>} : vector<16x32xbf16>, vector<32x128xbf16>, vector<16x128xf32> -> vector<16x128xf32>
    %c5_88 = arith.constant 5 : index
    %c0_89 = arith.constant 0 : index
    %c0_90 = arith.constant 0 : index
    %125 = vector.load %arg7[%c5_88, %c0_89, %c0_90] : memref<7x1x128xf32, #tpu.memory_space<vmem>>, vector<1x1x128xf32>
    %126 = vector.shape_cast %125 : vector<1x1x128xf32> to vector<1x128xf32>
    %127 = vector.broadcast %126 : vector<1x128xf32> to vector<16x128xf32>
    %128 = arith.addf %124, %127 : vector<16x128xf32>
    %cst_91 = arith.constant 0.000000e+00 : f32
    %129 = vector.broadcast %cst_91 : f32 to vector<16x128xf32>
    %130 = arith.maximumf %128, %129 : vector<16x128xf32>
    %131 = arith.truncf %130 : vector<16x128xf32> to vector<16x128xbf16>
    %c5_92 = arith.constant 5 : index
    %c0_93 = arith.constant 0 : index
    %c0_94 = arith.constant 0 : index
    %132 = vector.load %arg8[%c5_92, %c0_93, %c0_94] : memref<7x128x32xbf16, #tpu.memory_space<vmem>>, vector<1x128x32xbf16>
    %133 = vector.shape_cast %132 : vector<1x128x32xbf16> to vector<128x32xbf16>
    %cst_95 = arith.constant dense<0.000000e+00> : vector<16x32xf32>
    %134 = tpu.matmul %131, %133, %cst_95 {dimension_numbers = #tpu.dot_dimension_numbers<[1], [0], [0], [1], [0, 0, 1, 1], [], []>} : vector<16x128xbf16>, vector<128x32xbf16>, vector<16x32xf32> -> vector<16x32xf32>
    %c5_96 = arith.constant 5 : index
    %c0_97 = arith.constant 0 : index
    %c0_98 = arith.constant 0 : index
    %135 = vector.load %arg9[%c5_96, %c0_97, %c0_98] : memref<7x1x32xf32, #tpu.memory_space<vmem>>, vector<1x1x32xf32>
    %136 = vector.shape_cast %135 : vector<1x1x32xf32> to vector<1x32xf32>
    %137 = vector.broadcast %136 : vector<1x32xf32> to vector<16x32xf32>
    %138 = arith.addf %134, %137 : vector<16x32xf32>
    %139 = arith.truncf %138 : vector<16x32xf32> to vector<16x32xbf16>
    %c6 = arith.constant 6 : index
    %c0_99 = arith.constant 0 : index
    %c0_100 = arith.constant 0 : index
    %140 = vector.load %arg6[%c6, %c0_99, %c0_100] : memref<7x32x128xbf16, #tpu.memory_space<vmem>>, vector<1x32x128xbf16>
    %141 = vector.shape_cast %140 : vector<1x32x128xbf16> to vector<32x128xbf16>
    %cst_101 = arith.constant dense<0.000000e+00> : vector<16x128xf32>
    %142 = tpu.matmul %139, %141, %cst_101 {dimension_numbers = #tpu.dot_dimension_numbers<[1], [0], [0], [1], [0, 0, 1, 1], [], []>} : vector<16x32xbf16>, vector<32x128xbf16>, vector<16x128xf32> -> vector<16x128xf32>
    %c6_102 = arith.constant 6 : index
    %c0_103 = arith.constant 0 : index
    %c0_104 = arith.constant 0 : index
    %143 = vector.load %arg7[%c6_102, %c0_103, %c0_104] : memref<7x1x128xf32, #tpu.memory_space<vmem>>, vector<1x1x128xf32>
    %144 = vector.shape_cast %143 : vector<1x1x128xf32> to vector<1x128xf32>
    %145 = vector.broadcast %144 : vector<1x128xf32> to vector<16x128xf32>
    %146 = arith.addf %142, %145 : vector<16x128xf32>
    %cst_105 = arith.constant 0.000000e+00 : f32
    %147 = vector.broadcast %cst_105 : f32 to vector<16x128xf32>
    %148 = arith.maximumf %146, %147 : vector<16x128xf32>
    %149 = arith.truncf %148 : vector<16x128xf32> to vector<16x128xbf16>
    %c6_106 = arith.constant 6 : index
    %c0_107 = arith.constant 0 : index
    %c0_108 = arith.constant 0 : index
    %150 = vector.load %arg8[%c6_106, %c0_107, %c0_108] : memref<7x128x32xbf16, #tpu.memory_space<vmem>>, vector<1x128x32xbf16>
    %151 = vector.shape_cast %150 : vector<1x128x32xbf16> to vector<128x32xbf16>
    %cst_109 = arith.constant dense<0.000000e+00> : vector<16x32xf32>
    %152 = tpu.matmul %149, %151, %cst_109 {dimension_numbers = #tpu.dot_dimension_numbers<[1], [0], [0], [1], [0, 0, 1, 1], [], []>} : vector<16x128xbf16>, vector<128x32xbf16>, vector<16x32xf32> -> vector<16x32xf32>
    %c6_110 = arith.constant 6 : index
    %c0_111 = arith.constant 0 : index
    %c0_112 = arith.constant 0 : index
    %153 = vector.load %arg9[%c6_110, %c0_111, %c0_112] : memref<7x1x32xf32, #tpu.memory_space<vmem>>, vector<1x1x32xf32>
    %154 = vector.shape_cast %153 : vector<1x1x32xf32> to vector<1x32xf32>
    %155 = vector.broadcast %154 : vector<1x32xf32> to vector<16x32xf32>
    %156 = arith.addf %152, %155 : vector<16x32xf32>
    %c0_113 = arith.constant 0 : index
    %c0_114 = arith.constant 0 : index
    %157 = vector.load %arg10[%c0_113, %c0_114] : memref<16x32xf32, #tpu.memory_space<vmem>>, vector<16x32xf32>
    tpu.vector_store %arg10[%c0_113, %c0_114], %156 {strides = array<i32>} : memref<16x32xf32, #tpu.memory_space<vmem>>, vector<16x32xf32>,
    return
  }
  func.func @transform_0(%arg0: i32) -> (i32, i32) {
    %c0_i32 = arith.constant 0 : i32
    %c0_i32_0 = arith.constant 0 : i32
    return %arg0, %c0_i32 : i32, i32
  }
  func.func @transform_1(%arg0: i32) -> (i32, i32) {
    %c0_i32 = arith.constant 0 : i32
    %c0_i32_0 = arith.constant 0 : i32
    %c0_i32_1 = arith.constant 0 : i32
    return %c0_i32, %c0_i32_0 : i32, i32
  }
  func.func @transform_2(%arg0: i32) -> (i32, i32) {
    %c0_i32 = arith.constant 0 : i32
    %c0_i32_0 = arith.constant 0 : i32
    %c0_i32_1 = arith.constant 0 : i32
    return %c0_i32, %c0_i32_0 : i32, i32
  }
  func.func @transform_3(%arg0: i32) -> (i32, i32) {
    %c0_i32 = arith.constant 0 : i32
    %c0_i32_0 = arith.constant 0 : i32
    %c0_i32_1 = arith.constant 0 : i32
    return %c0_i32, %c0_i32_0 : i32, i32
  }
  func.func @transform_4(%arg0: i32) -> (i32, i32) {
    %c0_i32 = arith.constant 0 : i32
    %c0_i32_0 = arith.constant 0 : i32
    %c0_i32_1 = arith.constant 0 : i32
    return %c0_i32, %c0_i32_0 : i32, i32
  }
  func.func @transform_5(%arg0: i32) -> (i32, i32, i32) {
    %c0_i32 = arith.constant 0 : i32
    %c0_i32_0 = arith.constant 0 : i32
    %c0_i32_1 = arith.constant 0 : i32
    %c0_i32_2 = arith.constant 0 : i32
    return %c0_i32, %c0_i32_0, %c0_i32_1 : i32, i32, i32
  }
  func.func @transform_6(%arg0: i32) -> (i32, i32, i32) {
    %c0_i32 = arith.constant 0 : i32
    %c0_i32_0 = arith.constant 0 : i32
    %c0_i32_1 = arith.constant 0 : i32
    %c0_i32_2 = arith.constant 0 : i32
    return %c0_i32, %c0_i32_0, %c0_i32_1 : i32, i32, i32
  }
  func.func @transform_7(%arg0: i32) -> (i32, i32, i32) {
    %c0_i32 = arith.constant 0 : i32
    %c0_i32_0 = arith.constant 0 : i32
    %c0_i32_1 = arith.constant 0 : i32
    %c0_i32_2 = arith.constant 0 : i32
    return %c0_i32, %c0_i32_0, %c0_i32_1 : i32, i32, i32
  }
  func.func @transform_8(%arg0: i32) -> (i32, i32, i32) {
    %c0_i32 = arith.constant 0 : i32
    %c0_i32_0 = arith.constant 0 : i32
    %c0_i32_1 = arith.constant 0 : i32
    %c0_i32_2 = arith.constant 0 : i32
    return %c0_i32, %c0_i32_0, %c0_i32_1 : i32, i32, i32
  }
  func.func @transform_9(%arg0: i32) -> (i32, i32) {
    %c0_i32 = arith.constant 0 : i32
    %c0_i32_0 = arith.constant 0 : i32
    return %arg0, %c0_i32 : i32, i32
  }
}

module attributes {stable_mosaic.version = 11 : i64} {
  func.func @_res_mlp_chain_kernel(%arg0: i32, %arg1: memref<16x32xf32, #tpu.memory_space<vmem>>, %arg2: memref<8x32x128xbf16, #tpu.memory_space<vmem>>, %arg3: memref<8x1x128xf32, #tpu.memory_space<vmem>>, %arg4: memref<8x128x32xbf16, #tpu.memory_space<vmem>>, %arg5: memref<8x1x32xf32, #tpu.memory_space<vmem>>, %arg6: memref<1x32xf32, #tpu.memory_space<vmem>>, %arg7: memref<1x32xf32, #tpu.memory_space<vmem>>, %arg8: memref<16x32xf32, #tpu.memory_space<vmem>>) attributes {dimension_semantics = [#tpu.dimension_semantics<parallel>], iteration_bounds = array<i64: 2>, scalar_prefetch = 0 : i64, scratch_operands = 0 : i64, tpu.core_type = #tpu.core_type<tc>, window_params = [{transform_indices = @transform_0, window_bounds = array<i64: 16, 32>}, {pipeline_mode = #tpu.pipeline_mode<synchronous>, transform_indices = @transform_1, window_bounds = array<i64: 8, 32, 128>}, {pipeline_mode = #tpu.pipeline_mode<synchronous>, transform_indices = @transform_2, window_bounds = array<i64: 8, 1, 128>}, {pipeline_mode = #tpu.pipeline_mode<synchronous>, transform_indices = @transform_3, window_bounds = array<i64: 8, 128, 32>}, {pipeline_mode = #tpu.pipeline_mode<synchronous>, transform_indices = @transform_4, window_bounds = array<i64: 8, 1, 32>}, {pipeline_mode = #tpu.pipeline_mode<synchronous>, transform_indices = @transform_5, window_bounds = array<i64: 1, 32>}, {pipeline_mode = #tpu.pipeline_mode<synchronous>, transform_indices = @transform_6, window_bounds = array<i64: 1, 32>}, {transform_indices = @transform_7, window_bounds = array<i64: 16, 32>}]} {
    %c0 = arith.constant 0 : index
    %c0_0 = arith.constant 0 : index
    %0 = vector.load %arg1[%c0, %c0_0] : memref<16x32xf32, #tpu.memory_space<vmem>>, vector<16x32xf32>
    %c0_1 = arith.constant 0 : index
    %c0_2 = arith.constant 0 : index
    %1 = vector.load %arg6[%c0_1, %c0_2] : memref<1x32xf32, #tpu.memory_space<vmem>>, vector<1x32xf32>
    %c0_3 = arith.constant 0 : index
    %c0_4 = arith.constant 0 : index
    %2 = vector.load %arg7[%c0_3, %c0_4] : memref<1x32xf32, #tpu.memory_space<vmem>>, vector<1x32xf32>
    %3 = arith.truncf %0 : vector<16x32xf32> to vector<16x32xbf16>
    %c0_5 = arith.constant 0 : index
    %c0_6 = arith.constant 0 : index
    %c0_7 = arith.constant 0 : index
    %4 = vector.load %arg2[%c0_5, %c0_6, %c0_7] : memref<8x32x128xbf16, #tpu.memory_space<vmem>>, vector<1x32x128xbf16>
    %5 = vector.shape_cast %4 : vector<1x32x128xbf16> to vector<32x128xbf16>
    %cst = arith.constant dense<0.000000e+00> : vector<16x128xf32>
    %6 = tpu.matmul %3, %5, %cst {dimension_numbers = #tpu.dot_dimension_numbers<[1], [0], [0], [1], [0, 0, 1, 1], [], []>} : vector<16x32xbf16>, vector<32x128xbf16>, vector<16x128xf32> -> vector<16x128xf32>
    %c0_8 = arith.constant 0 : index
    %c0_9 = arith.constant 0 : index
    %c0_10 = arith.constant 0 : index
    %7 = vector.load %arg3[%c0_8, %c0_9, %c0_10] : memref<8x1x128xf32, #tpu.memory_space<vmem>>, vector<1x1x128xf32>
    %8 = vector.shape_cast %7 : vector<1x1x128xf32> to vector<1x128xf32>
    %9 = vector.broadcast %8 : vector<1x128xf32> to vector<16x128xf32>
    %10 = arith.addf %6, %9 : vector<16x128xf32>
    %cst_11 = arith.constant 0.000000e+00 : f32
    %11 = vector.broadcast %cst_11 : f32 to vector<16x128xf32>
    %12 = arith.maximumf %10, %11 : vector<16x128xf32>
    %13 = arith.truncf %12 : vector<16x128xf32> to vector<16x128xbf16>
    %c0_12 = arith.constant 0 : index
    %c0_13 = arith.constant 0 : index
    %c0_14 = arith.constant 0 : index
    %14 = vector.load %arg4[%c0_12, %c0_13, %c0_14] : memref<8x128x32xbf16, #tpu.memory_space<vmem>>, vector<1x128x32xbf16>
    %15 = vector.shape_cast %14 : vector<1x128x32xbf16> to vector<128x32xbf16>
    %cst_15 = arith.constant dense<0.000000e+00> : vector<16x32xf32>
    %16 = tpu.matmul %13, %15, %cst_15 {dimension_numbers = #tpu.dot_dimension_numbers<[1], [0], [0], [1], [0, 0, 1, 1], [], []>} : vector<16x128xbf16>, vector<128x32xbf16>, vector<16x32xf32> -> vector<16x32xf32>
    %c0_16 = arith.constant 0 : index
    %c0_17 = arith.constant 0 : index
    %c0_18 = arith.constant 0 : index
    %17 = vector.load %arg5[%c0_16, %c0_17, %c0_18] : memref<8x1x32xf32, #tpu.memory_space<vmem>>, vector<1x1x32xf32>
    %18 = vector.shape_cast %17 : vector<1x1x32xf32> to vector<1x32xf32>
    %19 = vector.broadcast %18 : vector<1x32xf32> to vector<16x32xf32>
    %20 = arith.addf %16, %19 : vector<16x32xf32>
    %21 = arith.addf %0, %20 : vector<16x32xf32>
    %cst_19 = arith.constant dense<0.000000e+00> : vector<16xf32>
    %22 = vector.multi_reduction <add>, %21, %cst_19 [1] : vector<16x32xf32> to vector<16xf32>
    %23 = vector.shape_cast %22 : vector<16xf32> to vector<16x1xf32>
    %cst_20 = arith.constant 3.200000e+01 : f32
    %24 = vector.broadcast %cst_20 : f32 to vector<16x1xf32>
    %25 = arith.divf %23, %24 : vector<16x1xf32>
    %26 = vector.broadcast %25 : vector<16x1xf32> to vector<16x32xf32>
    %27 = arith.subf %21, %26 : vector<16x32xf32>
    %28 = arith.mulf %27, %27 : vector<16x32xf32>
    %cst_21 = arith.constant dense<0.000000e+00> : vector<16xf32>
    %29 = vector.multi_reduction <add>, %28, %cst_21 [1] : vector<16x32xf32> to vector<16xf32>
    %30 = vector.shape_cast %29 : vector<16xf32> to vector<16x1xf32>
    %cst_22 = arith.constant 3.200000e+01 : f32
    %31 = vector.broadcast %cst_22 : f32 to vector<16x1xf32>
    %32 = arith.divf %30, %31 : vector<16x1xf32>
    %33 = vector.broadcast %25 : vector<16x1xf32> to vector<16x32xf32>
    %34 = arith.subf %21, %33 : vector<16x32xf32>
    %cst_23 = arith.constant 9.99999974E-6 : f32
    %35 = vector.broadcast %cst_23 : f32 to vector<16x1xf32>
    %36 = arith.addf %32, %35 : vector<16x1xf32>
    %37 = math.rsqrt %36 : vector<16x1xf32>
    %38 = vector.broadcast %37 : vector<16x1xf32> to vector<16x32xf32>
    %39 = arith.mulf %34, %38 : vector<16x32xf32>
    %40 = vector.broadcast %1 : vector<1x32xf32> to vector<16x32xf32>
    %41 = arith.mulf %39, %40 : vector<16x32xf32>
    %42 = vector.broadcast %2 : vector<1x32xf32> to vector<16x32xf32>
    %43 = arith.addf %41, %42 : vector<16x32xf32>
    %44 = arith.truncf %43 : vector<16x32xf32> to vector<16x32xbf16>
    %c1 = arith.constant 1 : index
    %c0_24 = arith.constant 0 : index
    %c0_25 = arith.constant 0 : index
    %45 = vector.load %arg2[%c1, %c0_24, %c0_25] : memref<8x32x128xbf16, #tpu.memory_space<vmem>>, vector<1x32x128xbf16>
    %46 = vector.shape_cast %45 : vector<1x32x128xbf16> to vector<32x128xbf16>
    %cst_26 = arith.constant dense<0.000000e+00> : vector<16x128xf32>
    %47 = tpu.matmul %44, %46, %cst_26 {dimension_numbers = #tpu.dot_dimension_numbers<[1], [0], [0], [1], [0, 0, 1, 1], [], []>} : vector<16x32xbf16>, vector<32x128xbf16>, vector<16x128xf32> -> vector<16x128xf32>
    %c1_27 = arith.constant 1 : index
    %c0_28 = arith.constant 0 : index
    %c0_29 = arith.constant 0 : index
    %48 = vector.load %arg3[%c1_27, %c0_28, %c0_29] : memref<8x1x128xf32, #tpu.memory_space<vmem>>, vector<1x1x128xf32>
    %49 = vector.shape_cast %48 : vector<1x1x128xf32> to vector<1x128xf32>
    %50 = vector.broadcast %49 : vector<1x128xf32> to vector<16x128xf32>
    %51 = arith.addf %47, %50 : vector<16x128xf32>
    %cst_30 = arith.constant 0.000000e+00 : f32
    %52 = vector.broadcast %cst_30 : f32 to vector<16x128xf32>
    %53 = arith.maximumf %51, %52 : vector<16x128xf32>
    %54 = arith.truncf %53 : vector<16x128xf32> to vector<16x128xbf16>
    %c1_31 = arith.constant 1 : index
    %c0_32 = arith.constant 0 : index
    %c0_33 = arith.constant 0 : index
    %55 = vector.load %arg4[%c1_31, %c0_32, %c0_33] : memref<8x128x32xbf16, #tpu.memory_space<vmem>>, vector<1x128x32xbf16>
    %56 = vector.shape_cast %55 : vector<1x128x32xbf16> to vector<128x32xbf16>
    %cst_34 = arith.constant dense<0.000000e+00> : vector<16x32xf32>
    %57 = tpu.matmul %54, %56, %cst_34 {dimension_numbers = #tpu.dot_dimension_numbers<[1], [0], [0], [1], [0, 0, 1, 1], [], []>} : vector<16x128xbf16>, vector<128x32xbf16>, vector<16x32xf32> -> vector<16x32xf32>
    %c1_35 = arith.constant 1 : index
    %c0_36 = arith.constant 0 : index
    %c0_37 = arith.constant 0 : index
    %58 = vector.load %arg5[%c1_35, %c0_36, %c0_37] : memref<8x1x32xf32, #tpu.memory_space<vmem>>, vector<1x1x32xf32>
    %59 = vector.shape_cast %58 : vector<1x1x32xf32> to vector<1x32xf32>
    %60 = vector.broadcast %59 : vector<1x32xf32> to vector<16x32xf32>
    %61 = arith.addf %57, %60 : vector<16x32xf32>
    %62 = arith.addf %43, %61 : vector<16x32xf32>
    %cst_38 = arith.constant dense<0.000000e+00> : vector<16xf32>
    %63 = vector.multi_reduction <add>, %62, %cst_38 [1] : vector<16x32xf32> to vector<16xf32>
    %64 = vector.shape_cast %63 : vector<16xf32> to vector<16x1xf32>
    %cst_39 = arith.constant 3.200000e+01 : f32
    %65 = vector.broadcast %cst_39 : f32 to vector<16x1xf32>
    %66 = arith.divf %64, %65 : vector<16x1xf32>
    %67 = vector.broadcast %66 : vector<16x1xf32> to vector<16x32xf32>
    %68 = arith.subf %62, %67 : vector<16x32xf32>
    %69 = arith.mulf %68, %68 : vector<16x32xf32>
    %cst_40 = arith.constant dense<0.000000e+00> : vector<16xf32>
    %70 = vector.multi_reduction <add>, %69, %cst_40 [1] : vector<16x32xf32> to vector<16xf32>
    %71 = vector.shape_cast %70 : vector<16xf32> to vector<16x1xf32>
    %cst_41 = arith.constant 3.200000e+01 : f32
    %72 = vector.broadcast %cst_41 : f32 to vector<16x1xf32>
    %73 = arith.divf %71, %72 : vector<16x1xf32>
    %74 = vector.broadcast %66 : vector<16x1xf32> to vector<16x32xf32>
    %75 = arith.subf %62, %74 : vector<16x32xf32>
    %cst_42 = arith.constant 9.99999974E-6 : f32
    %76 = vector.broadcast %cst_42 : f32 to vector<16x1xf32>
    %77 = arith.addf %73, %76 : vector<16x1xf32>
    %78 = math.rsqrt %77 : vector<16x1xf32>
    %79 = vector.broadcast %78 : vector<16x1xf32> to vector<16x32xf32>
    %80 = arith.mulf %75, %79 : vector<16x32xf32>
    %81 = vector.broadcast %1 : vector<1x32xf32> to vector<16x32xf32>
    %82 = arith.mulf %80, %81 : vector<16x32xf32>
    %83 = vector.broadcast %2 : vector<1x32xf32> to vector<16x32xf32>
    %84 = arith.addf %82, %83 : vector<16x32xf32>
    %85 = arith.truncf %84 : vector<16x32xf32> to vector<16x32xbf16>
    %c2 = arith.constant 2 : index
    %c0_43 = arith.constant 0 : index
    %c0_44 = arith.constant 0 : index
    %86 = vector.load %arg2[%c2, %c0_43, %c0_44] : memref<8x32x128xbf16, #tpu.memory_space<vmem>>, vector<1x32x128xbf16>
    %87 = vector.shape_cast %86 : vector<1x32x128xbf16> to vector<32x128xbf16>
    %cst_45 = arith.constant dense<0.000000e+00> : vector<16x128xf32>
    %88 = tpu.matmul %85, %87, %cst_45 {dimension_numbers = #tpu.dot_dimension_numbers<[1], [0], [0], [1], [0, 0, 1, 1], [], []>} : vector<16x32xbf16>, vector<32x128xbf16>, vector<16x128xf32> -> vector<16x128xf32>
    %c2_46 = arith.constant 2 : index
    %c0_47 = arith.constant 0 : index
    %c0_48 = arith.constant 0 : index
    %89 = vector.load %arg3[%c2_46, %c0_47, %c0_48] : memref<8x1x128xf32, #tpu.memory_space<vmem>>, vector<1x1x128xf32>
    %90 = vector.shape_cast %89 : vector<1x1x128xf32> to vector<1x128xf32>
    %91 = vector.broadcast %90 : vector<1x128xf32> to vector<16x128xf32>
    %92 = arith.addf %88, %91 : vector<16x128xf32>
    %cst_49 = arith.constant 0.000000e+00 : f32
    %93 = vector.broadcast %cst_49 : f32 to vector<16x128xf32>
    %94 = arith.maximumf %92, %93 : vector<16x128xf32>
    %95 = arith.truncf %94 : vector<16x128xf32> to vector<16x128xbf16>
    %c2_50 = arith.constant 2 : index
    %c0_51 = arith.constant 0 : index
    %c0_52 = arith.constant 0 : index
    %96 = vector.load %arg4[%c2_50, %c0_51, %c0_52] : memref<8x128x32xbf16, #tpu.memory_space<vmem>>, vector<1x128x32xbf16>
    %97 = vector.shape_cast %96 : vector<1x128x32xbf16> to vector<128x32xbf16>
    %cst_53 = arith.constant dense<0.000000e+00> : vector<16x32xf32>
    %98 = tpu.matmul %95, %97, %cst_53 {dimension_numbers = #tpu.dot_dimension_numbers<[1], [0], [0], [1], [0, 0, 1, 1], [], []>} : vector<16x128xbf16>, vector<128x32xbf16>, vector<16x32xf32> -> vector<16x32xf32>
    %c2_54 = arith.constant 2 : index
    %c0_55 = arith.constant 0 : index
    %c0_56 = arith.constant 0 : index
    %99 = vector.load %arg5[%c2_54, %c0_55, %c0_56] : memref<8x1x32xf32, #tpu.memory_space<vmem>>, vector<1x1x32xf32>
    %100 = vector.shape_cast %99 : vector<1x1x32xf32> to vector<1x32xf32>
    %101 = vector.broadcast %100 : vector<1x32xf32> to vector<16x32xf32>
    %102 = arith.addf %98, %101 : vector<16x32xf32>
    %103 = arith.addf %84, %102 : vector<16x32xf32>
    %cst_57 = arith.constant dense<0.000000e+00> : vector<16xf32>
    %104 = vector.multi_reduction <add>, %103, %cst_57 [1] : vector<16x32xf32> to vector<16xf32>
    %105 = vector.shape_cast %104 : vector<16xf32> to vector<16x1xf32>
    %cst_58 = arith.constant 3.200000e+01 : f32
    %106 = vector.broadcast %cst_58 : f32 to vector<16x1xf32>
    %107 = arith.divf %105, %106 : vector<16x1xf32>
    %108 = vector.broadcast %107 : vector<16x1xf32> to vector<16x32xf32>
    %109 = arith.subf %103, %108 : vector<16x32xf32>
    %110 = arith.mulf %109, %109 : vector<16x32xf32>
    %cst_59 = arith.constant dense<0.000000e+00> : vector<16xf32>
    %111 = vector.multi_reduction <add>, %110, %cst_59 [1] : vector<16x32xf32> to vector<16xf32>
    %112 = vector.shape_cast %111 : vector<16xf32> to vector<16x1xf32>
    %cst_60 = arith.constant 3.200000e+01 : f32
    %113 = vector.broadcast %cst_60 : f32 to vector<16x1xf32>
    %114 = arith.divf %112, %113 : vector<16x1xf32>
    %115 = vector.broadcast %107 : vector<16x1xf32> to vector<16x32xf32>
    %116 = arith.subf %103, %115 : vector<16x32xf32>
    %cst_61 = arith.constant 9.99999974E-6 : f32
    %117 = vector.broadcast %cst_61 : f32 to vector<16x1xf32>
    %118 = arith.addf %114, %117 : vector<16x1xf32>
    %119 = math.rsqrt %118 : vector<16x1xf32>
    %120 = vector.broadcast %119 : vector<16x1xf32> to vector<16x32xf32>
    %121 = arith.mulf %116, %120 : vector<16x32xf32>
    %122 = vector.broadcast %1 : vector<1x32xf32> to vector<16x32xf32>
    %123 = arith.mulf %121, %122 : vector<16x32xf32>
    %124 = vector.broadcast %2 : vector<1x32xf32> to vector<16x32xf32>
    %125 = arith.addf %123, %124 : vector<16x32xf32>
    %126 = arith.truncf %125 : vector<16x32xf32> to vector<16x32xbf16>
    %c3 = arith.constant 3 : index
    %c0_62 = arith.constant 0 : index
    %c0_63 = arith.constant 0 : index
    %127 = vector.load %arg2[%c3, %c0_62, %c0_63] : memref<8x32x128xbf16, #tpu.memory_space<vmem>>, vector<1x32x128xbf16>
    %128 = vector.shape_cast %127 : vector<1x32x128xbf16> to vector<32x128xbf16>
    %cst_64 = arith.constant dense<0.000000e+00> : vector<16x128xf32>
    %129 = tpu.matmul %126, %128, %cst_64 {dimension_numbers = #tpu.dot_dimension_numbers<[1], [0], [0], [1], [0, 0, 1, 1], [], []>} : vector<16x32xbf16>, vector<32x128xbf16>, vector<16x128xf32> -> vector<16x128xf32>
    %c3_65 = arith.constant 3 : index
    %c0_66 = arith.constant 0 : index
    %c0_67 = arith.constant 0 : index
    %130 = vector.load %arg3[%c3_65, %c0_66, %c0_67] : memref<8x1x128xf32, #tpu.memory_space<vmem>>, vector<1x1x128xf32>
    %131 = vector.shape_cast %130 : vector<1x1x128xf32> to vector<1x128xf32>
    %132 = vector.broadcast %131 : vector<1x128xf32> to vector<16x128xf32>
    %133 = arith.addf %129, %132 : vector<16x128xf32>
    %cst_68 = arith.constant 0.000000e+00 : f32
    %134 = vector.broadcast %cst_68 : f32 to vector<16x128xf32>
    %135 = arith.maximumf %133, %134 : vector<16x128xf32>
    %136 = arith.truncf %135 : vector<16x128xf32> to vector<16x128xbf16>
    %c3_69 = arith.constant 3 : index
    %c0_70 = arith.constant 0 : index
    %c0_71 = arith.constant 0 : index
    %137 = vector.load %arg4[%c3_69, %c0_70, %c0_71] : memref<8x128x32xbf16, #tpu.memory_space<vmem>>, vector<1x128x32xbf16>
    %138 = vector.shape_cast %137 : vector<1x128x32xbf16> to vector<128x32xbf16>
    %cst_72 = arith.constant dense<0.000000e+00> : vector<16x32xf32>
    %139 = tpu.matmul %136, %138, %cst_72 {dimension_numbers = #tpu.dot_dimension_numbers<[1], [0], [0], [1], [0, 0, 1, 1], [], []>} : vector<16x128xbf16>, vector<128x32xbf16>, vector<16x32xf32> -> vector<16x32xf32>
    %c3_73 = arith.constant 3 : index
    %c0_74 = arith.constant 0 : index
    %c0_75 = arith.constant 0 : index
    %140 = vector.load %arg5[%c3_73, %c0_74, %c0_75] : memref<8x1x32xf32, #tpu.memory_space<vmem>>, vector<1x1x32xf32>
    %141 = vector.shape_cast %140 : vector<1x1x32xf32> to vector<1x32xf32>
    %142 = vector.broadcast %141 : vector<1x32xf32> to vector<16x32xf32>
    %143 = arith.addf %139, %142 : vector<16x32xf32>
    %144 = arith.addf %125, %143 : vector<16x32xf32>
    %cst_76 = arith.constant dense<0.000000e+00> : vector<16xf32>
    %145 = vector.multi_reduction <add>, %144, %cst_76 [1] : vector<16x32xf32> to vector<16xf32>
    %146 = vector.shape_cast %145 : vector<16xf32> to vector<16x1xf32>
    %cst_77 = arith.constant 3.200000e+01 : f32
    %147 = vector.broadcast %cst_77 : f32 to vector<16x1xf32>
    %148 = arith.divf %146, %147 : vector<16x1xf32>
    %149 = vector.broadcast %148 : vector<16x1xf32> to vector<16x32xf32>
    %150 = arith.subf %144, %149 : vector<16x32xf32>
    %151 = arith.mulf %150, %150 : vector<16x32xf32>
    %cst_78 = arith.constant dense<0.000000e+00> : vector<16xf32>
    %152 = vector.multi_reduction <add>, %151, %cst_78 [1] : vector<16x32xf32> to vector<16xf32>
    %153 = vector.shape_cast %152 : vector<16xf32> to vector<16x1xf32>
    %cst_79 = arith.constant 3.200000e+01 : f32
    %154 = vector.broadcast %cst_79 : f32 to vector<16x1xf32>
    %155 = arith.divf %153, %154 : vector<16x1xf32>
    %156 = vector.broadcast %148 : vector<16x1xf32> to vector<16x32xf32>
    %157 = arith.subf %144, %156 : vector<16x32xf32>
    %cst_80 = arith.constant 9.99999974E-6 : f32
    %158 = vector.broadcast %cst_80 : f32 to vector<16x1xf32>
    %159 = arith.addf %155, %158 : vector<16x1xf32>
    %160 = math.rsqrt %159 : vector<16x1xf32>
    %161 = vector.broadcast %160 : vector<16x1xf32> to vector<16x32xf32>
    %162 = arith.mulf %157, %161 : vector<16x32xf32>
    %163 = vector.broadcast %1 : vector<1x32xf32> to vector<16x32xf32>
    %164 = arith.mulf %162, %163 : vector<16x32xf32>
    %165 = vector.broadcast %2 : vector<1x32xf32> to vector<16x32xf32>
    %166 = arith.addf %164, %165 : vector<16x32xf32>
    %167 = arith.truncf %166 : vector<16x32xf32> to vector<16x32xbf16>
    %c4 = arith.constant 4 : index
    %c0_81 = arith.constant 0 : index
    %c0_82 = arith.constant 0 : index
    %168 = vector.load %arg2[%c4, %c0_81, %c0_82] : memref<8x32x128xbf16, #tpu.memory_space<vmem>>, vector<1x32x128xbf16>
    %169 = vector.shape_cast %168 : vector<1x32x128xbf16> to vector<32x128xbf16>
    %cst_83 = arith.constant dense<0.000000e+00> : vector<16x128xf32>
    %170 = tpu.matmul %167, %169, %cst_83 {dimension_numbers = #tpu.dot_dimension_numbers<[1], [0], [0], [1], [0, 0, 1, 1], [], []>} : vector<16x32xbf16>, vector<32x128xbf16>, vector<16x128xf32> -> vector<16x128xf32>
    %c4_84 = arith.constant 4 : index
    %c0_85 = arith.constant 0 : index
    %c0_86 = arith.constant 0 : index
    %171 = vector.load %arg3[%c4_84, %c0_85, %c0_86] : memref<8x1x128xf32, #tpu.memory_space<vmem>>, vector<1x1x128xf32>
    %172 = vector.shape_cast %171 : vector<1x1x128xf32> to vector<1x128xf32>
    %173 = vector.broadcast %172 : vector<1x128xf32> to vector<16x128xf32>
    %174 = arith.addf %170, %173 : vector<16x128xf32>
    %cst_87 = arith.constant 0.000000e+00 : f32
    %175 = vector.broadcast %cst_87 : f32 to vector<16x128xf32>
    %176 = arith.maximumf %174, %175 : vector<16x128xf32>
    %177 = arith.truncf %176 : vector<16x128xf32> to vector<16x128xbf16>
    %c4_88 = arith.constant 4 : index
    %c0_89 = arith.constant 0 : index
    %c0_90 = arith.constant 0 : index
    %178 = vector.load %arg4[%c4_88, %c0_89, %c0_90] : memref<8x128x32xbf16, #tpu.memory_space<vmem>>, vector<1x128x32xbf16>
    %179 = vector.shape_cast %178 : vector<1x128x32xbf16> to vector<128x32xbf16>
    %cst_91 = arith.constant dense<0.000000e+00> : vector<16x32xf32>
    %180 = tpu.matmul %177, %179, %cst_91 {dimension_numbers = #tpu.dot_dimension_numbers<[1], [0], [0], [1], [0, 0, 1, 1], [], []>} : vector<16x128xbf16>, vector<128x32xbf16>, vector<16x32xf32> -> vector<16x32xf32>
    %c4_92 = arith.constant 4 : index
    %c0_93 = arith.constant 0 : index
    %c0_94 = arith.constant 0 : index
    %181 = vector.load %arg5[%c4_92, %c0_93, %c0_94] : memref<8x1x32xf32, #tpu.memory_space<vmem>>, vector<1x1x32xf32>
    %182 = vector.shape_cast %181 : vector<1x1x32xf32> to vector<1x32xf32>
    %183 = vector.broadcast %182 : vector<1x32xf32> to vector<16x32xf32>
    %184 = arith.addf %180, %183 : vector<16x32xf32>
    %185 = arith.addf %166, %184 : vector<16x32xf32>
    %cst_95 = arith.constant dense<0.000000e+00> : vector<16xf32>
    %186 = vector.multi_reduction <add>, %185, %cst_95 [1] : vector<16x32xf32> to vector<16xf32>
    %187 = vector.shape_cast %186 : vector<16xf32> to vector<16x1xf32>
    %cst_96 = arith.constant 3.200000e+01 : f32
    %188 = vector.broadcast %cst_96 : f32 to vector<16x1xf32>
    %189 = arith.divf %187, %188 : vector<16x1xf32>
    %190 = vector.broadcast %189 : vector<16x1xf32> to vector<16x32xf32>
    %191 = arith.subf %185, %190 : vector<16x32xf32>
    %192 = arith.mulf %191, %191 : vector<16x32xf32>
    %cst_97 = arith.constant dense<0.000000e+00> : vector<16xf32>
    %193 = vector.multi_reduction <add>, %192, %cst_97 [1] : vector<16x32xf32> to vector<16xf32>
    %194 = vector.shape_cast %193 : vector<16xf32> to vector<16x1xf32>
    %cst_98 = arith.constant 3.200000e+01 : f32
    %195 = vector.broadcast %cst_98 : f32 to vector<16x1xf32>
    %196 = arith.divf %194, %195 : vector<16x1xf32>
    %197 = vector.broadcast %189 : vector<16x1xf32> to vector<16x32xf32>
    %198 = arith.subf %185, %197 : vector<16x32xf32>
    %cst_99 = arith.constant 9.99999974E-6 : f32
    %199 = vector.broadcast %cst_99 : f32 to vector<16x1xf32>
    %200 = arith.addf %196, %199 : vector<16x1xf32>
    %201 = math.rsqrt %200 : vector<16x1xf32>
    %202 = vector.broadcast %201 : vector<16x1xf32> to vector<16x32xf32>
    %203 = arith.mulf %198, %202 : vector<16x32xf32>
    %204 = vector.broadcast %1 : vector<1x32xf32> to vector<16x32xf32>
    %205 = arith.mulf %203, %204 : vector<16x32xf32>
    %206 = vector.broadcast %2 : vector<1x32xf32> to vector<16x32xf32>
    %207 = arith.addf %205, %206 : vector<16x32xf32>
    %208 = arith.truncf %207 : vector<16x32xf32> to vector<16x32xbf16>
    %c5 = arith.constant 5 : index
    %c0_100 = arith.constant 0 : index
    %c0_101 = arith.constant 0 : index
    %209 = vector.load %arg2[%c5, %c0_100, %c0_101] : memref<8x32x128xbf16, #tpu.memory_space<vmem>>, vector<1x32x128xbf16>
    %210 = vector.shape_cast %209 : vector<1x32x128xbf16> to vector<32x128xbf16>
    %cst_102 = arith.constant dense<0.000000e+00> : vector<16x128xf32>
    %211 = tpu.matmul %208, %210, %cst_102 {dimension_numbers = #tpu.dot_dimension_numbers<[1], [0], [0], [1], [0, 0, 1, 1], [], []>} : vector<16x32xbf16>, vector<32x128xbf16>, vector<16x128xf32> -> vector<16x128xf32>
    %c5_103 = arith.constant 5 : index
    %c0_104 = arith.constant 0 : index
    %c0_105 = arith.constant 0 : index
    %212 = vector.load %arg3[%c5_103, %c0_104, %c0_105] : memref<8x1x128xf32, #tpu.memory_space<vmem>>, vector<1x1x128xf32>
    %213 = vector.shape_cast %212 : vector<1x1x128xf32> to vector<1x128xf32>
    %214 = vector.broadcast %213 : vector<1x128xf32> to vector<16x128xf32>
    %215 = arith.addf %211, %214 : vector<16x128xf32>
    %cst_106 = arith.constant 0.000000e+00 : f32
    %216 = vector.broadcast %cst_106 : f32 to vector<16x128xf32>
    %217 = arith.maximumf %215, %216 : vector<16x128xf32>
    %218 = arith.truncf %217 : vector<16x128xf32> to vector<16x128xbf16>
    %c5_107 = arith.constant 5 : index
    %c0_108 = arith.constant 0 : index
    %c0_109 = arith.constant 0 : index
    %219 = vector.load %arg4[%c5_107, %c0_108, %c0_109] : memref<8x128x32xbf16, #tpu.memory_space<vmem>>, vector<1x128x32xbf16>
    %220 = vector.shape_cast %219 : vector<1x128x32xbf16> to vector<128x32xbf16>
    %cst_110 = arith.constant dense<0.000000e+00> : vector<16x32xf32>
    %221 = tpu.matmul %218, %220, %cst_110 {dimension_numbers = #tpu.dot_dimension_numbers<[1], [0], [0], [1], [0, 0, 1, 1], [], []>} : vector<16x128xbf16>, vector<128x32xbf16>, vector<16x32xf32> -> vector<16x32xf32>
    %c5_111 = arith.constant 5 : index
    %c0_112 = arith.constant 0 : index
    %c0_113 = arith.constant 0 : index
    %222 = vector.load %arg5[%c5_111, %c0_112, %c0_113] : memref<8x1x32xf32, #tpu.memory_space<vmem>>, vector<1x1x32xf32>
    %223 = vector.shape_cast %222 : vector<1x1x32xf32> to vector<1x32xf32>
    %224 = vector.broadcast %223 : vector<1x32xf32> to vector<16x32xf32>
    %225 = arith.addf %221, %224 : vector<16x32xf32>
    %226 = arith.addf %207, %225 : vector<16x32xf32>
    %cst_114 = arith.constant dense<0.000000e+00> : vector<16xf32>
    %227 = vector.multi_reduction <add>, %226, %cst_114 [1] : vector<16x32xf32> to vector<16xf32>
    %228 = vector.shape_cast %227 : vector<16xf32> to vector<16x1xf32>
    %cst_115 = arith.constant 3.200000e+01 : f32
    %229 = vector.broadcast %cst_115 : f32 to vector<16x1xf32>
    %230 = arith.divf %228, %229 : vector<16x1xf32>
    %231 = vector.broadcast %230 : vector<16x1xf32> to vector<16x32xf32>
    %232 = arith.subf %226, %231 : vector<16x32xf32>
    %233 = arith.mulf %232, %232 : vector<16x32xf32>
    %cst_116 = arith.constant dense<0.000000e+00> : vector<16xf32>
    %234 = vector.multi_reduction <add>, %233, %cst_116 [1] : vector<16x32xf32> to vector<16xf32>
    %235 = vector.shape_cast %234 : vector<16xf32> to vector<16x1xf32>
    %cst_117 = arith.constant 3.200000e+01 : f32
    %236 = vector.broadcast %cst_117 : f32 to vector<16x1xf32>
    %237 = arith.divf %235, %236 : vector<16x1xf32>
    %238 = vector.broadcast %230 : vector<16x1xf32> to vector<16x32xf32>
    %239 = arith.subf %226, %238 : vector<16x32xf32>
    %cst_118 = arith.constant 9.99999974E-6 : f32
    %240 = vector.broadcast %cst_118 : f32 to vector<16x1xf32>
    %241 = arith.addf %237, %240 : vector<16x1xf32>
    %242 = math.rsqrt %241 : vector<16x1xf32>
    %243 = vector.broadcast %242 : vector<16x1xf32> to vector<16x32xf32>
    %244 = arith.mulf %239, %243 : vector<16x32xf32>
    %245 = vector.broadcast %1 : vector<1x32xf32> to vector<16x32xf32>
    %246 = arith.mulf %244, %245 : vector<16x32xf32>
    %247 = vector.broadcast %2 : vector<1x32xf32> to vector<16x32xf32>
    %248 = arith.addf %246, %247 : vector<16x32xf32>
    %249 = arith.truncf %248 : vector<16x32xf32> to vector<16x32xbf16>
    %c6 = arith.constant 6 : index
    %c0_119 = arith.constant 0 : index
    %c0_120 = arith.constant 0 : index
    %250 = vector.load %arg2[%c6, %c0_119, %c0_120] : memref<8x32x128xbf16, #tpu.memory_space<vmem>>, vector<1x32x128xbf16>
    %251 = vector.shape_cast %250 : vector<1x32x128xbf16> to vector<32x128xbf16>
    %cst_121 = arith.constant dense<0.000000e+00> : vector<16x128xf32>
    %252 = tpu.matmul %249, %251, %cst_121 {dimension_numbers = #tpu.dot_dimension_numbers<[1], [0], [0], [1], [0, 0, 1, 1], [], []>} : vector<16x32xbf16>, vector<32x128xbf16>, vector<16x128xf32> -> vector<16x128xf32>
    %c6_122 = arith.constant 6 : index
    %c0_123 = arith.constant 0 : index
    %c0_124 = arith.constant 0 : index
    %253 = vector.load %arg3[%c6_122, %c0_123, %c0_124] : memref<8x1x128xf32, #tpu.memory_space<vmem>>, vector<1x1x128xf32>
    %254 = vector.shape_cast %253 : vector<1x1x128xf32> to vector<1x128xf32>
    %255 = vector.broadcast %254 : vector<1x128xf32> to vector<16x128xf32>
    %256 = arith.addf %252, %255 : vector<16x128xf32>
    %cst_125 = arith.constant 0.000000e+00 : f32
    %257 = vector.broadcast %cst_125 : f32 to vector<16x128xf32>
    %258 = arith.maximumf %256, %257 : vector<16x128xf32>
    %259 = arith.truncf %258 : vector<16x128xf32> to vector<16x128xbf16>
    %c6_126 = arith.constant 6 : index
    %c0_127 = arith.constant 0 : index
    %c0_128 = arith.constant 0 : index
    %260 = vector.load %arg4[%c6_126, %c0_127, %c0_128] : memref<8x128x32xbf16, #tpu.memory_space<vmem>>, vector<1x128x32xbf16>
    %261 = vector.shape_cast %260 : vector<1x128x32xbf16> to vector<128x32xbf16>
    %cst_129 = arith.constant dense<0.000000e+00> : vector<16x32xf32>
    %262 = tpu.matmul %259, %261, %cst_129 {dimension_numbers = #tpu.dot_dimension_numbers<[1], [0], [0], [1], [0, 0, 1, 1], [], []>} : vector<16x128xbf16>, vector<128x32xbf16>, vector<16x32xf32> -> vector<16x32xf32>
    %c6_130 = arith.constant 6 : index
    %c0_131 = arith.constant 0 : index
    %c0_132 = arith.constant 0 : index
    %263 = vector.load %arg5[%c6_130, %c0_131, %c0_132] : memref<8x1x32xf32, #tpu.memory_space<vmem>>, vector<1x1x32xf32>
    %264 = vector.shape_cast %263 : vector<1x1x32xf32> to vector<1x32xf32>
    %265 = vector.broadcast %264 : vector<1x32xf32> to vector<16x32xf32>
    %266 = arith.addf %262, %265 : vector<16x32xf32>
    %267 = arith.addf %248, %266 : vector<16x32xf32>
    %cst_133 = arith.constant dense<0.000000e+00> : vector<16xf32>
    %268 = vector.multi_reduction <add>, %267, %cst_133 [1] : vector<16x32xf32> to vector<16xf32>
    %269 = vector.shape_cast %268 : vector<16xf32> to vector<16x1xf32>
    %cst_134 = arith.constant 3.200000e+01 : f32
    %270 = vector.broadcast %cst_134 : f32 to vector<16x1xf32>
    %271 = arith.divf %269, %270 : vector<16x1xf32>
    %272 = vector.broadcast %271 : vector<16x1xf32> to vector<16x32xf32>
    %273 = arith.subf %267, %272 : vector<16x32xf32>
    %274 = arith.mulf %273, %273 : vector<16x32xf32>
    %cst_135 = arith.constant dense<0.000000e+00> : vector<16xf32>
    %275 = vector.multi_reduction <add>, %274, %cst_135 [1] : vector<16x32xf32> to vector<16xf32>
    %276 = vector.shape_cast %275 : vector<16xf32> to vector<16x1xf32>
    %cst_136 = arith.constant 3.200000e+01 : f32
    %277 = vector.broadcast %cst_136 : f32 to vector<16x1xf32>
    %278 = arith.divf %276, %277 : vector<16x1xf32>
    %279 = vector.broadcast %271 : vector<16x1xf32> to vector<16x32xf32>
    %280 = arith.subf %267, %279 : vector<16x32xf32>
    %cst_137 = arith.constant 9.99999974E-6 : f32
    %281 = vector.broadcast %cst_137 : f32 to vector<16x1xf32>
    %282 = arith.addf %278, %281 : vector<16x1xf32>
    %283 = math.rsqrt %282 : vector<16x1xf32>
    %284 = vector.broadcast %283 : vector<16x1xf32> to vector<16x32xf32>
    %285 = arith.mulf %280, %284 : vector<16x32xf32>
    %286 = vector.broadcast %1 : vector<1x32xf32> to vector<16x32xf32>
    %287 = arith.mulf %285, %286 : vector<16x32xf32>
    %288 = vector.broadcast %2 : vector<1x32xf32> to vector<16x32xf32>
    %289 = arith.addf %287, %288 : vector<16x32xf32>
    %290 = arith.truncf %289 : vector<16x32xf32> to vector<16x32xbf16>
    %c7 = arith.constant 7 : index
    %c0_138 = arith.constant 0 : index
    %c0_139 = arith.constant 0 : index
    %291 = vector.load %arg2[%c7, %c0_138, %c0_139] : memref<8x32x128xbf16, #tpu.memory_space<vmem>>, vector<1x32x128xbf16>
    %292 = vector.shape_cast %291 : vector<1x32x128xbf16> to vector<32x128xbf16>
    %cst_140 = arith.constant dense<0.000000e+00> : vector<16x128xf32>
    %293 = tpu.matmul %290, %292, %cst_140 {dimension_numbers = #tpu.dot_dimension_numbers<[1], [0], [0], [1], [0, 0, 1, 1], [], []>} : vector<16x32xbf16>, vector<32x128xbf16>, vector<16x128xf32> -> vector<16x128xf32>
    %c7_141 = arith.constant 7 : index
    %c0_142 = arith.constant 0 : index
    %c0_143 = arith.constant 0 : index
    %294 = vector.load %arg3[%c7_141, %c0_142, %c0_143] : memref<8x1x128xf32, #tpu.memory_space<vmem>>, vector<1x1x128xf32>
    %295 = vector.shape_cast %294 : vector<1x1x128xf32> to vector<1x128xf32>
    %296 = vector.broadcast %295 : vector<1x128xf32> to vector<16x128xf32>
    %297 = arith.addf %293, %296 : vector<16x128xf32>
    %cst_144 = arith.constant 0.000000e+00 : f32
    %298 = vector.broadcast %cst_144 : f32 to vector<16x128xf32>
    %299 = arith.maximumf %297, %298 : vector<16x128xf32>
    %300 = arith.truncf %299 : vector<16x128xf32> to vector<16x128xbf16>
    %c7_145 = arith.constant 7 : index
    %c0_146 = arith.constant 0 : index
    %c0_147 = arith.constant 0 : index
    %301 = vector.load %arg4[%c7_145, %c0_146, %c0_147] : memref<8x128x32xbf16, #tpu.memory_space<vmem>>, vector<1x128x32xbf16>
    %302 = vector.shape_cast %301 : vector<1x128x32xbf16> to vector<128x32xbf16>
    %cst_148 = arith.constant dense<0.000000e+00> : vector<16x32xf32>
    %303 = tpu.matmul %300, %302, %cst_148 {dimension_numbers = #tpu.dot_dimension_numbers<[1], [0], [0], [1], [0, 0, 1, 1], [], []>} : vector<16x128xbf16>, vector<128x32xbf16>, vector<16x32xf32> -> vector<16x32xf32>
    %c7_149 = arith.constant 7 : index
    %c0_150 = arith.constant 0 : index
    %c0_151 = arith.constant 0 : index
    %304 = vector.load %arg5[%c7_149, %c0_150, %c0_151] : memref<8x1x32xf32, #tpu.memory_space<vmem>>, vector<1x1x32xf32>
    %305 = vector.shape_cast %304 : vector<1x1x32xf32> to vector<1x32xf32>
    %306 = vector.broadcast %305 : vector<1x32xf32> to vector<16x32xf32>
    %307 = arith.addf %303, %306 : vector<16x32xf32>
    %308 = arith.addf %289, %307 : vector<16x32xf32>
    %cst_152 = arith.constant dense<0.000000e+00> : vector<16xf32>
    %309 = vector.multi_reduction <add>, %308, %cst_152 [1] : vector<16x32xf32> to vector<16xf32>
    %310 = vector.shape_cast %309 : vector<16xf32> to vector<16x1xf32>
    %cst_153 = arith.constant 3.200000e+01 : f32
    %311 = vector.broadcast %cst_153 : f32 to vector<16x1xf32>
    %312 = arith.divf %310, %311 : vector<16x1xf32>
    %313 = vector.broadcast %312 : vector<16x1xf32> to vector<16x32xf32>
    %314 = arith.subf %308, %313 : vector<16x32xf32>
    %315 = arith.mulf %314, %314 : vector<16x32xf32>
    %cst_154 = arith.constant dense<0.000000e+00> : vector<16xf32>
    %316 = vector.multi_reduction <add>, %315, %cst_154 [1] : vector<16x32xf32> to vector<16xf32>
    %317 = vector.shape_cast %316 : vector<16xf32> to vector<16x1xf32>
    %cst_155 = arith.constant 3.200000e+01 : f32
    %318 = vector.broadcast %cst_155 : f32 to vector<16x1xf32>
    %319 = arith.divf %317, %318 : vector<16x1xf32>
    %320 = vector.broadcast %312 : vector<16x1xf32> to vector<16x32xf32>
    %321 = arith.subf %308, %320 : vector<16x32xf32>
    %cst_156 = arith.constant 9.99999974E-6 : f32
    %322 = vector.broadcast %cst_156 : f32 to vector<16x1xf32>
    %323 = arith.addf %319, %322 : vector<16x1xf32>
    %324 = math.rsqrt %323 : vector<16x1xf32>
    %325 = vector.broadcast %324 : vector<16x1xf32> to vector<16x32xf32>
    %326 = arith.mulf %321, %325 : vector<16x32xf32>
    %327 = vector.broadcast %1 : vector<1x32xf32> to vector<16x32xf32>
    %328 = arith.mulf %326, %327 : vector<16x32xf32>
    %329 = vector.broadcast %2 : vector<1x32xf32> to vector<16x32xf32>
    %330 = arith.addf %328, %329 : vector<16x32xf32>
    %c0_157 = arith.constant 0 : index
    %c0_158 = arith.constant 0 : index
    %331 = vector.load %arg8[%c0_157, %c0_158] : memref<16x32xf32, #tpu.memory_space<vmem>>, vector<16x32xf32>
    tpu.vector_store %arg8[%c0_157, %c0_158], %330 {strides = array<i32>} : memref<16x32xf32, #tpu.memory_space<vmem>>, vector<16x32xf32>,
    return
  }
  func.func @transform_0(%arg0: i32) -> (i32, i32) {
    %c0_i32 = arith.constant 0 : i32
    %c0_i32_0 = arith.constant 0 : i32
    return %arg0, %c0_i32 : i32, i32
  }
  func.func @transform_1(%arg0: i32) -> (i32, i32, i32) {
    %c0_i32 = arith.constant 0 : i32
    %c0_i32_0 = arith.constant 0 : i32
    %c0_i32_1 = arith.constant 0 : i32
    %c0_i32_2 = arith.constant 0 : i32
    return %c0_i32, %c0_i32_0, %c0_i32_1 : i32, i32, i32
  }
  func.func @transform_2(%arg0: i32) -> (i32, i32, i32) {
    %c0_i32 = arith.constant 0 : i32
    %c0_i32_0 = arith.constant 0 : i32
    %c0_i32_1 = arith.constant 0 : i32
    %c0_i32_2 = arith.constant 0 : i32
    return %c0_i32, %c0_i32_0, %c0_i32_1 : i32, i32, i32
  }
  func.func @transform_3(%arg0: i32) -> (i32, i32, i32) {
    %c0_i32 = arith.constant 0 : i32
    %c0_i32_0 = arith.constant 0 : i32
    %c0_i32_1 = arith.constant 0 : i32
    %c0_i32_2 = arith.constant 0 : i32
    return %c0_i32, %c0_i32_0, %c0_i32_1 : i32, i32, i32
  }
  func.func @transform_4(%arg0: i32) -> (i32, i32, i32) {
    %c0_i32 = arith.constant 0 : i32
    %c0_i32_0 = arith.constant 0 : i32
    %c0_i32_1 = arith.constant 0 : i32
    %c0_i32_2 = arith.constant 0 : i32
    return %c0_i32, %c0_i32_0, %c0_i32_1 : i32, i32, i32
  }
  func.func @transform_5(%arg0: i32) -> (i32, i32) {
    %c0_i32 = arith.constant 0 : i32
    %c0_i32_0 = arith.constant 0 : i32
    %c0_i32_1 = arith.constant 0 : i32
    return %c0_i32, %c0_i32_0 : i32, i32
  }
  func.func @transform_6(%arg0: i32) -> (i32, i32) {
    %c0_i32 = arith.constant 0 : i32
    %c0_i32_0 = arith.constant 0 : i32
    %c0_i32_1 = arith.constant 0 : i32
    return %c0_i32, %c0_i32_0 : i32, i32
  }
  func.func @transform_7(%arg0: i32) -> (i32, i32) {
    %c0_i32 = arith.constant 0 : i32
    %c0_i32_0 = arith.constant 0 : i32
    return %arg0, %c0_i32 : i32, i32
  }
}

module attributes {stable_mosaic.version = 11 : i64} {
  func.func @_head_interp_kernel(%arg0: i32, %arg1: memref<1x16x32xf32, #tpu.memory_space<vmem>>, %arg2: memref<32x8xbf16, #tpu.memory_space<vmem>>, %arg3: memref<1x8xf32, #tpu.memory_space<vmem>>, %arg4: memref<16x256xf32, #tpu.memory_space<vmem>>, %arg5: memref<1x8x256xf32, #tpu.memory_space<vmem>>) attributes {dimension_semantics = [#tpu.dimension_semantics<parallel>], iteration_bounds = array<i64: 2>, scalar_prefetch = 0 : i64, scratch_operands = 0 : i64, tpu.core_type = #tpu.core_type<tc>, window_params = [{transform_indices = @transform_0, window_bounds = array<i64: 1, 16, 32>}, {pipeline_mode = #tpu.pipeline_mode<synchronous>, transform_indices = @transform_1, window_bounds = array<i64: 32, 8>}, {pipeline_mode = #tpu.pipeline_mode<synchronous>, transform_indices = @transform_2, window_bounds = array<i64: 1, 8>}, {pipeline_mode = #tpu.pipeline_mode<synchronous>, transform_indices = @transform_3, window_bounds = array<i64: 16, 256>}, {transform_indices = @transform_4, window_bounds = array<i64: 1, 8, 256>}]} {
    %c0 = arith.constant 0 : index
    %c0_0 = arith.constant 0 : index
    %c0_1 = arith.constant 0 : index
    %0 = vector.load %arg1[%c0, %c0_0, %c0_1] : memref<1x16x32xf32, #tpu.memory_space<vmem>>, vector<1x16x32xf32>
    %1 = vector.shape_cast %0 : vector<1x16x32xf32> to vector<16x32xf32>
    %2 = arith.truncf %1 : vector<16x32xf32> to vector<16x32xbf16>
    %c0_2 = arith.constant 0 : index
    %c0_3 = arith.constant 0 : index
    %3 = vector.load %arg2[%c0_2, %c0_3] : memref<32x8xbf16, #tpu.memory_space<vmem>>, vector<32x8xbf16>
    %cst = arith.constant dense<0.000000e+00> : vector<16x8xf32>
    %4 = tpu.matmul %2, %3, %cst {dimension_numbers = #tpu.dot_dimension_numbers<[1], [0], [0], [1], [0, 0, 1, 1], [], []>} : vector<16x32xbf16>, vector<32x8xbf16>, vector<16x8xf32> -> vector<16x8xf32>
    %c0_4 = arith.constant 0 : index
    %c0_5 = arith.constant 0 : index
    %5 = vector.load %arg3[%c0_4, %c0_5] : memref<1x8xf32, #tpu.memory_space<vmem>>, vector<1x8xf32>
    %6 = vector.broadcast %5 : vector<1x8xf32> to vector<16x8xf32>
    %7 = arith.addf %4, %6 : vector<16x8xf32>
    %c0_6 = arith.constant 0 : index
    %c0_7 = arith.constant 0 : index
    %8 = vector.load %arg4[%c0_6, %c0_7] : memref<16x256xf32, #tpu.memory_space<vmem>>, vector<16x256xf32>
    %cst_8 = arith.constant dense<0.000000e+00> : vector<8x256xf32>
    %9 = tpu.matmul %7, %8, %cst_8 {dimension_numbers = #tpu.dot_dimension_numbers<[0], [0], [1], [1], [0, 1, 1, 1], [], []>} : vector<16x8xf32>, vector<16x256xf32>, vector<8x256xf32> -> vector<8x256xf32>
    %c0_9 = arith.constant 0 : index
    %c0_10 = arith.constant 0 : index
    %c0_11 = arith.constant 0 : index
    %10 = vector.load %arg5[%c0_9, %c0_10, %c0_11] : memref<1x8x256xf32, #tpu.memory_space<vmem>>, vector<1x8x256xf32>
    %11 = vector.shape_cast %10 : vector<1x8x256xf32> to vector<8x256xf32>
    %12 = vector.shape_cast %9 : vector<8x256xf32> to vector<1x8x256xf32>
    tpu.vector_store %arg5[%c0_9, %c0_10, %c0_11], %12 {strides = array<i32>} : memref<1x8x256xf32, #tpu.memory_space<vmem>>, vector<1x8x256xf32>,
    return
  }
  func.func @transform_0(%arg0: i32) -> (i32, i32, i32) {
    %c0_i32 = arith.constant 0 : i32
    %c0_i32_0 = arith.constant 0 : i32
    %c0_i32_1 = arith.constant 0 : i32
    return %arg0, %c0_i32, %c0_i32_0 : i32, i32, i32
  }
  func.func @transform_1(%arg0: i32) -> (i32, i32) {
    %c0_i32 = arith.constant 0 : i32
    %c0_i32_0 = arith.constant 0 : i32
    %c0_i32_1 = arith.constant 0 : i32
    return %c0_i32, %c0_i32_0 : i32, i32
  }
  func.func @transform_2(%arg0: i32) -> (i32, i32) {
    %c0_i32 = arith.constant 0 : i32
    %c0_i32_0 = arith.constant 0 : i32
    %c0_i32_1 = arith.constant 0 : i32
    return %c0_i32, %c0_i32_0 : i32, i32
  }
  func.func @transform_3(%arg0: i32) -> (i32, i32) {
    %c0_i32 = arith.constant 0 : i32
    %c0_i32_0 = arith.constant 0 : i32
    %c0_i32_1 = arith.constant 0 : i32
    return %c0_i32, %c0_i32_0 : i32, i32
  }
  func.func @transform_4(%arg0: i32) -> (i32, i32, i32) {
    %c0_i32 = arith.constant 0 : i32
    %c0_i32_0 = arith.constant 0 : i32
    %c0_i32_1 = arith.constant 0 : i32
    return %arg0, %c0_i32, %c0_i32_0 : i32, i32, i32
  }
}

</mosaic_0001>

<bundles_post_ra>
// kernel: swin_forward.5
= control target key start
LH: loop header
LB: loop body
LE: loop exit
PB: predicated region body
PF: predicated region fallthrough
CT: control target
= control target key end

     0   :  { %s2450_s24 = smov 0   ;;  %s2849_s0 = inlined_call_operand.vmem [shape: f32[2,16,32], index: 0, kind: input, shape index: {}]   ;;  %s2850_s1 = inlined_call_operand.vmem [shape: bf16[32,128], index: 1, kind: input, shape index: {}]   ;;  %s2851_s2 = inlined_call_operand.vmem [shape: f32[1,128], index: 2, kind: input, shape index: {}]   ;;  %s2852_s3 = inlined_call_operand.vmem [shape: bf16[32,32], index: 3, kind: input, shape index: {}]   ;;  %s2853_s4 = inlined_call_operand.vmem [shape: f32[1,32], index: 4, kind: input, shape index: {}]   ;;  %s2854_s5 = inlined_call_operand.vmem [shape: f32[1,32], index: 5, kind: input, shape index: {}]   ;;  %s2855_s6 = inlined_call_operand.vmem [shape: f32[1,32], index: 6, kind: input, shape index: {}]   ;;  %s2856_s7 = inlined_call_operand.vmem [shape: f32[2,16,32], index: 7, kind: output, shape index: {}]  }
   0x1 LB: > { %s2180_s25 = sadd.s32 4294967295, %s2396_s24   ;;  %p2184_p0 = scmp.ge.s32.totalorder %s2396_s24, 1  ;;  %s2396_s24 = sphi %s2450_s24, %s17_s24  }
   0x2   : > { %p237_p1 = scmp.lt.s32.totalorder %s2396_s24, 3 }
   0x4   : > { %p238_p2 = pnand %p2184_p0, %p237_p1 }
   0x5   : > { %p269_p3 = scmp.lt.s32.totalorder (!%p238_p2), %s2180_s25, 1  ;;  %s2400_s13 = smov (!%p238_p2), 112  }
   0x6   : > { %241 = sbr.rel (%p238_p2) target bundleno = 1902 (0x76e), region = 48  ;;  %s2401_s14 = smov (!%p238_p2), 120  }
   0x7   : > { %s2402_s15 = smov (!%p238_p2), 104   ;;  %s2403_s16 = smov (!%p238_p2), 96  }
   0x8   : > { %s2406_s17 = smov (!%p238_p2), 64   ;;  %s2407_s22 = smov (!%p238_p2), 16  }
   0x9   : > { %s2408_s23 = smov (!%p238_p2), 8   ;;  %s2409_s26 = smov (!%p238_p2), 24  }
   0xb   : > { %v2348_v0 = vld [vmem:[%s2850_s1 + $0x8] sm:$0xff]   ;;  %v2398_v1 = vmov 0.0   ;;  %v2349_v2 = vld [vmem:[%s2850_s1] sm:$0xff]   ;;  %vm2399_vm0 = vmmov 0   ;;  %s2858_s25 = smov (!%p269_p3, %s2180_s25), 1  ;;  %vm306_vm1 = vcmask 261120   ;;  %v376_v21 = vlaneseq }
   0xc   : > { %2249 = vmatprep.subr.bf16.mxu0 %v2398_v1  ;;  %2257 = vmatprep.subr.bf16.mxu1 %v2398_v1  ;;  %s2225_s30 = sshll.u32 %s2858_s25, 4  ;;  %v2189_v6 = vld [vmem:[%s2851_s2] ss:$0 sm:$0xff]  ;;  %v2404_v19 = vmov 1983009808   ;;  %vm1243_vm2 = vcmask 64512  }
   0xd   : > { %2250 = vmatpush3.bf16.msra.mxu0 %v2348_v0  ;;  %2253 = vmatprep.mubr.msk.bf16.mxu0 %vm2399_vm0, %v2398_v1  ;;  %s2479_s10 = scalar_lea.vmem %s2849_s0, %s2225_s30  ;;  %v374_v20 = vunpack.c.l.s4 %v2404_v19  ;;  %v377_v23 = vshrl.u32 %v376_v21, 7  ;;  %v2405_v24 = vmov 1934713408   ;;  %vm1432_vm3 = vcmask 130048  }
   0xe   : > { %2251 = vmatprep.subr.bf16.mxu0 %v2398_v1  ;;  %2259 = vmatprep.mubr.msk.bf16.mxu1 %vm2399_vm0, %v2398_v1  ;;  %v280_v3 = vld [vmem:[%s2479_s10] sm:$0xff]  ;;  %v281_v4 = vld [vmem:[%s2479_s10 + $0x8] sm:$0xff]  ;;  %v406_v25 = vunpack.c.l.s4 %v2405_v24  ;;  %vm2005_vm4 = vcmask 195584  }
   0xf   : > { %v282_v5 = vpack.c.bf16 %v281_v4, %v280_v3  ;;  %v375_v22 = vunpack.c.0.s8 %v374_v20 }
  0x10   : > { %v407_v35 = vunpack.c.0.s8 %v406_v25 }
  0x11   : > { %2252 = vmatpush3.bf16.msra.mxu0 %v2349_v2  ;;  %v2526_v29 = vsub.s32 %v375_v22, %v377_v23 }
  0x12   : > { %2263 = vmatprep.subr.bf16.mxu0 %v2398_v1  ;;  %v2546_v45 = vsub.s32 %v407_v35, %v377_v23 }
  0x14   : > { %2254 = vmatmul.mubr.msk.bf16.vlgmr.msra.gmra.mxu0 %vm306_vm1, %v282_v5 }
  0x15   : > { %2265 = vmatprep.mubr.msk.bf16.mxu0 %vm2399_vm0, %v2398_v1 }
  0xd4   : > { %v344_v7 = vpop.f32.mrf.mxu0 }
  0xd5   : > { %v2490_v8 = vadd.f32 %v2189_v6, %v344_v7 }
  0xd6   : > { %v2255_v9 = vpop.f32.mrf.mxu0 }
  0xd7   : > { %359 = vrot.lane.b32.xlu1 %v2490_v8, %s2400_s13  ;;  %353 = vrot.lane.b32.xlu0 %v2490_v8, %s2401_s14 }
  0xd8   : > { %v347_v10 = vpop.f32.mrf.mxu0 }
  0xd9   : > { %v2494_v11 = vadd.f32 %v2189_v6, %v347_v10 }
  0xda   : > { %v2256_v12 = vpop.f32.mrf.mxu0 }
  0xdb   : > { %361 = vrot.lane.b32.xlu1 %v2494_v11, %s2400_s13  ;;  %355 = vrot.lane.b32.xlu0 %v2494_v11, %s2401_s14  ;;  %s278_s13 = scalar_lea.vmem %s2856_s7, %s2225_s30 }
  0xdf   : > { %367 = vrot.lane.b32.xlu1 %v2494_v11, %s2402_s15  ;;  %365 = vrot.lane.b32.xlu0 %v2490_v8, %s2402_s15 }
  0xe3   : > { %645 = vrot.lane.b32.xlu1 %v2494_v11, %s2403_s16  ;;  %643 = vrot.lane.b32.xlu0 %v2490_v8, %s2403_s16 }
 0x149   : > { %v2502_v13 = vpop.permute.xlu1 %359  ;;  %v2504_v14 = vpop.permute.xlu0 %353 }
 0x14a   : > { %647 = vrot.lane.b32.xlu0 %v2504_v14, %s2403_s16  ;;  %v371_v31 = vcombine.low %v2490_v8, %v2502_v13  ;;  %v372_v34 = vcombine.high %v2490_v8, %v2502_v13 }
 0x14c   : > { %v379_v41 = vrot.slane %v371_v31, %v2526_v29  ;;  %v386_v44 = vrot.slane %v372_v34, %v2526_v29 }
 0x14d   : > { %v2507_v15 = vpop.permute.xlu0 %355  ;;  %v2511_v16 = vpop.permute.xlu1 %361 }
 0x14e   : > { %651 = vrot.lane.b32.xlu0 %v2502_v13, %s2403_s16  ;;  %649 = vrot.lane.b32.xlu1 %v2507_v15, %s2403_s16  ;;  %v439_v30 = vcombine.low %v2494_v11, %v2511_v16  ;;  %v440_v32 = vcombine.high %v2494_v11, %v2511_v16 }
 0x150   : > { %v447_v39 = vrot.slane %v439_v30, %v2526_v29  ;;  %v454_v42 = vrot.slane %v440_v32, %v2526_v29 }
 0x151   : > { %v2513_v17 = vpop.permute.xlu0 %365  ;;  %v2517_v18 = vpop.permute.xlu1 %367 }
 0x152   : > { %653 = vrot.lane.b32.xlu1 %v2511_v16, %s2403_s16  ;;  %655 = vrot.lane.b32.xlu0 %v2513_v17, %s2403_s16  ;;  %v455_v26 = vcombine.low %v2507_v15, %v2517_v18  ;;  %v456_v27 = vcombine.high %v2507_v15, %v2517_v18  ;;  %v387_v28 = vcombine.low %v2504_v14, %v2513_v17 }
 0x153   : > { %v388_v33 = vcombine.high %v2504_v14, %v2513_v17 }
 0x154   : > { %v463_v36 = vrot.slane %v455_v26, %v2526_v29  ;;  %v470_v37 = vrot.slane %v456_v27, %v2526_v29  ;;  %v395_v38 = vrot.slane %v387_v28, %v2526_v29 }
 0x155   : > { %v644_v40 = vpop.permute.xlu0 %643  ;;  %v402_v43 = vrot.slane %v388_v33, %v2526_v29  ;;  %v646_v52 = vpop.permute.xlu1 %645 }
 0x156   : > { %657 = vrot.lane.b32.xlu1 %v2517_v18, %s2403_s16  ;;  %v471_v46 = vcombine.low %v447_v39, %v463_v36  ;;  %v472_v47 = vcombine.high %v447_v39, %v463_v36  ;;  %v487_v48 = vcombine.low %v454_v42, %v470_v37  ;;  %v488_v49 = vcombine.high %v454_v42, %v470_v37 }
 0x157   : > { %v403_v50 = vcombine.low %v379_v41, %v395_v38  ;;  %v404_v51 = vcombine.high %v379_v41, %v395_v38  ;;  %v419_v54 = vcombine.low %v386_v44, %v402_v43  ;;  %v420_v55 = vcombine.high %v386_v44, %v402_v43 }
 0x158   : > { %v479_v56 = vrot.slane %v471_v46, %v2546_v45  ;;  %v486_v57 = vrot.slane %v472_v47, %v2546_v45  ;;  %v2551_v58 = vrot.slane %v487_v48, %v2546_v45  ;;  %v2554_v59 = vrot.slane %v488_v49, %v2546_v45 }
 0x159   : > { %v411_v60 = vrot.slane %v403_v50, %v2546_v45  ;;  %v418_v61 = vrot.slane %v404_v51, %v2546_v45  ;;  %v2559_v0 = vrot.slane %v419_v54, %v2546_v45  ;;  %v2562_v2 = vrot.slane %v420_v55, %v2546_v45 }
 0x15a   : > { %v575_v3 = vcombine.low %v479_v56, %v486_v57  ;;  %v2195_v4 = vcombine.high %v479_v56, %v486_v57  ;;  %v591_v5 = vcombine.low %v2551_v58, %v2554_v59  ;;  %v2196_v12 = vcombine.high %v2551_v58, %v2554_v59 }
 0x15b   : > { %v507_v6 = vcombine.low %v411_v60, %v418_v61  ;;  %v2193_v19 = vcombine.high %v411_v60, %v418_v61  ;;  %v523_v20 = vcombine.low %v2559_v0, %v2562_v2  ;;  %v2194_v21 = vcombine.high %v2559_v0, %v2562_v2 }
 0x15c   : > { %v2573_v25 = vrot.slane %v575_v3, %v2526_v29  ;;  %v2576_v26 = vrot.slane %v2195_v4, %v2526_v29  ;;  %v2582_v31 = vrot.slane %v591_v5, %v2526_v29 }
 0x15d   : > { %v2579_v30 = vrot.slane %v507_v6, %v2526_v29  ;;  %v2589_v39 = vrot.slane %v2193_v19, %v2526_v29 }
 0x1bc   : > { %v648_v53 = vpop.permute.xlu0 %647 }
 0x1c0   : > { %v650_v62 = vpop.permute.xlu1 %649  ;;  %v652_v63 = vpop.permute.xlu0 %651 }
 0x1c1   : > { %v667_v7 = vcombine.low %v644_v40, %v652_v63  ;;  %v668_v9 = vcombine.high %v644_v40, %v652_v63  ;;  %v2592_v40 = vrot.slane %v523_v20, %v2526_v29 }
 0x1c3   : > { %v675_v32 = vrot.slane %v667_v7, %v2526_v29  ;;  %v682_v33 = vrot.slane %v668_v9, %v2526_v29 }
 0x1c4   : > { %v654_v10 = vpop.permute.xlu1 %653  ;;  %v656_v22 = vpop.permute.xlu0 %655 }
 0x1c5   : > { %v683_v23 = vcombine.low %v648_v53, %v656_v22  ;;  %v684_v24 = vcombine.high %v648_v53, %v656_v22  ;;  %v735_v27 = vcombine.low %v646_v52, %v654_v10  ;;  %v736_v28 = vcombine.high %v646_v52, %v654_v10 }
 0x1c7   : > { %v691_v34 = vrot.slane %v683_v23, %v2526_v29  ;;  %v698_v35 = vrot.slane %v684_v24, %v2526_v29  ;;  %v743_v46 = vrot.slane %v735_v27, %v2526_v29  ;;  %v750_v47 = vrot.slane %v736_v28, %v2526_v29 }
 0x1c8   : > { %v658_v36 = vpop.permute.xlu1 %657  ;;  %v538_v23 = vrot.slane %v2194_v21, %v2526_v29  ;;  %v606_v24 = vrot.slane %v2196_v12, %v2526_v29  ;;  %v539_v21 = vcombine.low %v2579_v30, %v2589_v39 }
 0x1c9   : > { %v751_v37 = vcombine.low %v650_v62, %v658_v36  ;;  %v752_v38 = vcombine.high %v650_v62, %v658_v36  ;;  %v699_v41 = vcombine.low %v675_v32, %v691_v34  ;;  %v700_v42 = vcombine.high %v675_v32, %v691_v34 }
 0x1ca   : > { %v715_v43 = vcombine.low %v682_v33, %v698_v35  ;;  %v716_v44 = vcombine.high %v682_v33, %v698_v35  ;;  %v555_v12 = vcombine.low %v2592_v40, %v538_v23 }
 0x1cb   : > { %v759_v48 = vrot.slane %v751_v37, %v2526_v29  ;;  %v766_v49 = vrot.slane %v752_v38, %v2526_v29  ;;  %v707_v50 = vrot.slane %v699_v41, %v2546_v45  ;;  %v714_v51 = vrot.slane %v700_v42, %v2546_v45 }
 0x1cc   : > { %v723_v52 = vrot.slane %v715_v43, %v2546_v45  ;;  %v730_v53 = vrot.slane %v716_v44, %v2546_v45  ;;  %v607_v42 = vcombine.low %v2573_v25, %v2576_v26  ;;  %v623_v43 = vcombine.low %v2582_v31, %v606_v24 }
 0x1cd   : > { %v767_v54 = vcombine.low %v743_v46, %v759_v48  ;;  %v768_v55 = vcombine.high %v743_v46, %v759_v48  ;;  %v783_v56 = vcombine.low %v750_v47, %v766_v49  ;;  %v784_v57 = vcombine.high %v750_v47, %v766_v49 }
 0x1ce   : > { %v803_v58 = vcombine.low %v707_v50, %v714_v51  ;;  %v2197_v59 = vcombine.high %v707_v50, %v714_v51  ;;  %v819_v60 = vcombine.low %v723_v52, %v730_v53  ;;  %v2198_v61 = vcombine.high %v723_v52, %v730_v53 }
 0x1cf   : > { %v775_v62 = vrot.slane %v767_v54, %v2546_v45  ;;  %v782_v63 = vrot.slane %v768_v55, %v2546_v45  ;;  %v791_v0 = vrot.slane %v783_v56, %v2546_v45  ;;  %v798_v2 = vrot.slane %v784_v57, %v2546_v45 }
 0x1d0   : > { %v810_v3 = vrot.slane %v803_v58, %v2526_v29  ;;  %v818_v4 = vrot.slane %v2197_v59, %v2526_v29  ;;  %v826_v5 = vrot.slane %v819_v60, %v2526_v29  ;;  %v834_v6 = vrot.slane %v2198_v61, %v2526_v29 }
 0x1d1   : > { %v871_v7 = vcombine.low %v775_v62, %v782_v63  ;;  %v2199_v9 = vcombine.high %v775_v62, %v782_v63  ;;  %v887_v10 = vcombine.low %v791_v0, %v798_v2  ;;  %v2200_v19 = vcombine.high %v791_v0, %v798_v2 }
 0x1d2   : > { %v835_v20 = vcombine.low %v810_v3, %v818_v4  ;;  %v851_v22 = vcombine.low %v826_v5, %v834_v6  ;;  %v836_v47 = vcombine.high %v810_v3, %v818_v4  ;;  %v852_v48 = vcombine.high %v826_v5, %v834_v6 }
 0x1d3   : > { %v878_v27 = vrot.slane %v871_v7, %v2526_v29  ;;  %v886_v28 = vrot.slane %v2199_v9, %v2526_v29  ;;  %v894_v32 = vrot.slane %v887_v10, %v2526_v29  ;;  %v902_v33 = vrot.slane %v2200_v19, %v2526_v29 }
 0x1d4   : > { %v843_v34 = vrot.slane %v835_v20, %v2546_v45  ;;  %v859_v35 = vrot.slane %v851_v22, %v2546_v45  ;;  %v547_v55 = vrot.slane %v539_v21, %v2546_v45  ;;  %v563_v56 = vrot.slane %v555_v12, %v2546_v45 }
 0x1d5   : > { %v903_v36 = vcombine.low %v878_v27, %v886_v28  ;;  %v919_v37 = vcombine.low %v894_v32, %v902_v33  ;;  %v904_v38 = vcombine.high %v878_v27, %v886_v28  ;;  %v920_v41 = vcombine.high %v894_v32, %v902_v33 }
 0x1d6   : > { %v867_v49 = vcombine.low %v843_v34, %v859_v35  ;;  %v868_v50 = vcombine.high %v843_v34, %v859_v35  ;;  %v615_v57 = vrot.slane %v607_v42, %v2546_v45  ;;  %v631_v58 = vrot.slane %v623_v43, %v2546_v45 }
 0x1d7   : > { %v911_v44 = vrot.slane %v903_v36, %v2546_v45  ;;  %v927_v46 = vrot.slane %v919_v37, %v2546_v45  ;;  %v918_v53 = vrot.slane %v904_v38, %v2546_v45  ;;  %v934_v54 = vrot.slane %v920_v41, %v2546_v45 }
 0x1d8   : > { %v850_v61 = vrot.slane %v836_v47, %v2546_v45  ;;  %v866_v62 = vrot.slane %v852_v48, %v2546_v45  ;;  %v540_v63 = vcombine.high %v2579_v30, %v2589_v39  ;;  %v556_v0 = vcombine.high %v2592_v40, %v538_v23 }
 0x1d9   : > { %v935_v51 = vcombine.low %v911_v44, %v927_v46  ;;  %v936_v52 = vcombine.high %v911_v44, %v927_v46  ;;  %v608_v2 = vcombine.high %v2573_v25, %v2576_v26  ;;  %v624_v3 = vcombine.high %v2582_v31, %v606_v24 }
 0x1da   : > { %v937_v6 = vcombine.low %v918_v53, %v934_v54  ;;  %v938_v7 = vcombine.high %v918_v53, %v934_v54  ;;  %v571_v9 = vcombine.low %v547_v55, %v563_v56  ;;  %v572_v10 = vcombine.high %v547_v55, %v563_v56 }
 0x1db   : > { %v1239_v59 = vpack.c.bf16 %v935_v51, %v867_v49  ;;  %v1240_v60 = vpack.c.bf16 %v936_v52, %v868_v50  ;;  %v639_v19 = vcombine.low %v615_v57, %v631_v58  ;;  %v640_v20 = vcombine.high %v615_v57, %v631_v58 }
 0x1dc   : > { %v869_v30 = vcombine.low %v850_v61, %v866_v62  ;;  %v870_v25 = vcombine.high %v850_v61, %v866_v62  ;;  %v554_v39 = vrot.slane %v540_v63, %v2546_v45  ;;  %v570_v40 = vrot.slane %v556_v0, %v2546_v45 }
 0x1dd   : > { %v1248_v4 = vsel %vm1243_vm2, %v1239_v59, 0  ;;  %v1295_v5 = vsel %vm1243_vm2, %v1240_v60, 0  ;;  %v1235_v22 = vpack.c.bf16 %v639_v19, %v571_v9  ;;  %v1236_v23 = vpack.c.bf16 %v640_v20, %v572_v10 }
 0x1de   : > { %2258 = vmatpush3.bf16.xpose.msra.mxu1 %v1248_v4  ;;  %2264 = vmatpush3.bf16.xpose.msra.mxu0 %v1295_v5  ;;  %v1241_v26 = vpack.c.bf16 %v937_v6, %v869_v30  ;;  %v1242_v31 = vpack.c.bf16 %v938_v7, %v870_v25  ;;  %v622_v24 = vrot.slane %v608_v2, %v2546_v45 }
 0x1df   : > { %2269 = vmatprep.subr.bf16.mxu1 %v2398_v1  ;;  %2275 = vmatprep.subr.bf16.mxu0 %v2398_v1  ;;  %v638_v27 = vrot.slane %v624_v3, %v2546_v45  ;;  %v573_v33 = vcombine.low %v554_v39, %v570_v40  ;;  %v574_v35 = vcombine.high %v554_v39, %v570_v40 }
 0x1e0   : > { %v1342_v28 = vsel %vm1243_vm2, %v1241_v26, 0  ;;  %v1389_v32 = vsel %vm1243_vm2, %v1242_v31, 0 }
 0x1e1   : > { %v641_v34 = vcombine.low %v622_v24, %v638_v27  ;;  %v642_v36 = vcombine.high %v622_v24, %v638_v27 }
 0x1e3   : > { %v1237_v37 = vpack.c.bf16 %v641_v34, %v573_v33  ;;  %v1238_v38 = vpack.c.bf16 %v642_v36, %v574_v35 }
 0x1e5   : > { %2260 = vmatmul.mubr.msk.bf16.vlgmr.msra.gmra.mxu1 %vm1243_vm2, %v1235_v22  ;;  %2266 = vmatmul.mubr.msk.bf16.vlgmr.msra.gmra.mxu0 %vm1243_vm2, %v1236_v23 }
 0x1e6   : > { %2270 = vmatpush3.bf16.xpose.msra.mxu1 %v1342_v28  ;;  %2276 = vmatpush3.bf16.xpose.msra.mxu0 %v1389_v32 }
 0x1e7   : > { %2271 = vmatprep.mubr.msk.bf16.mxu1 %vm2399_vm0, %v2398_v1  ;;  %2277 = vmatprep.mubr.msk.bf16.mxu0 %vm2399_vm0, %v2398_v1 }
 0x1e8   : > { %2281 = vmatprep.subr.bf16.mxu1 %v2398_v1  ;;  %2287 = vmatprep.subr.bf16.mxu0 %v2398_v1 }
 0x1ed   : > { %2272 = vmatmul.mubr.msk.bf16.vlgmr.msra.gmra.mxu1 %vm1243_vm2, %v1237_v37  ;;  %2278 = vmatmul.mubr.msk.bf16.vlgmr.msra.gmra.mxu0 %vm1243_vm2, %v1238_v38 }
 0x1ee   : > { %2283 = vmatprep.mubr.msk.bf16.mxu1 %vm2399_vm0, %v2398_v1  ;;  %2289 = vmatprep.mubr.msk.bf16.mxu0 %vm2399_vm0, %v2398_v1 }
 0x2a5   : > { %v1284_v41 = vpop.f32.mrf.mxu1  ;;  %v1331_v21 = vpop.f32.mrf.mxu0 }
 0x2a6   : > { %v1433_v12 = vsel %vm1432_vm3, %v1284_v41, -inf  ;;  %v1439_v48 = vsel %vm1432_vm3, %v1331_v21, -inf }
 0x2a7   : > { %1434 = vmax.xlane.f32.xlu0 %v1433_v12  ;;  %v2261_v42 = vpop.f32.mrf.mxu1  ;;  %v2267_v43 = vpop.f32.mrf.mxu0 }
 0x2a9   : > { %v1287_v44 = vpop.f32.mrf.mxu1  ;;  %v1334_v46 = vpop.f32.mrf.mxu0 }
 0x2aa   : > { %v1436_v47 = vsel %vm1432_vm3, %v1287_v44, -inf  ;;  %v1442_v54 = vsel %vm1432_vm3, %v1334_v46, -inf }
 0x2ab   : > { %1437 = vmax.xlane.f32.xlu1 %v1436_v47  ;;  %v2262_v49 = vpop.f32.mrf.mxu1  ;;  %1440 = vmax.xlane.f32.xlu0 %v1439_v48  ;;  %v2268_v50 = vpop.f32.mrf.mxu0 }
 0x2ad   : > { %v1378_v51 = vpop.f32.mrf.mxu1  ;;  %v1425_v52 = vpop.f32.mrf.mxu0 }
 0x2ae   : > { %v1445_v53 = vsel %vm1432_vm3, %v1378_v51, -inf  ;;  %v1451_v60 = vsel %vm1432_vm3, %v1425_v52, -inf }
 0x2af   : > { %1446 = vmax.xlane.f32.xlu1 %v1445_v53  ;;  %v2273_v55 = vpop.f32.mrf.mxu1  ;;  %1443 = vmax.xlane.f32.xlu0 %v1442_v54  ;;  %v2279_v56 = vpop.f32.mrf.mxu0 }
 0x2b1   : > { %v2669_v57 = vpop.f32.mrf.mxu1  ;;  %v1428_v58 = vpop.f32.mrf.mxu0 }
 0x2b2   : > { %v1448_v59 = vsel %vm1432_vm3, %v2669_v57, -inf  ;;  %v1454_v63 = vsel %vm1432_vm3, %v1428_v58, -inf }
 0x2b3   : > { %v2274_v61 = vpop.f32.mrf.mxu1  ;;  %1449 = vmax.xlane.f32.xlu0 %v1448_v59  ;;  %1452 = vmax.xlane.f32.xlu1 %v1451_v60  ;;  %v2280_v62 = vpop.f32.mrf.mxu0 }
 0x2b7   : > { %1455 = vmax.xlane.f32.xlu0 %v1454_v63 }
 0x2c4   : > { %939 = vrot.lane.b32.xlu1 %v2490_v8, %s2406_s17 }
 0x2c8   : > { %943 = vrot.lane.b32.xlu1 %v2504_v14, %s2406_s17 }
 0x2cc   : > { %945 = vrot.lane.b32.xlu1 %v2507_v15, %s2406_s17 }
 0x2cd   : > { %941 = vrot.lane.b32.xlu0 %v2494_v11, %s2406_s17 }
 0x2d0   : > { %949 = vrot.lane.b32.xlu1 %v2511_v16, %s2406_s17 }
 0x2d1   : > { %947 = vrot.lane.b32.xlu0 %v2502_v13, %s2406_s17 }
 0x2d5   : > { %951 = vrot.lane.b32.xlu0 %v2513_v17, %s2406_s17 }
 0x330   : > { %v1435_v0 = vpop.xlane.xlu0 %1434 }
 0x331   : > { %v1457_v8 = vsub.f32 %v1284_v41, %v1435_v0 }
 0x333   : > { %v1465_v2 = vmul.f32 1.442695, %v1457_v8 }
 0x334   : > { %v1438_v3 = vpop.xlane.xlu1 %1437  ;;  %v1441_v14 = vpop.xlane.xlu0 %1440 }
 0x335   : > { %2352 = vpow2.f32 %v1465_v2  ;;  %v1458_v4 = vsub.f32 %v1287_v44, %v1438_v3  ;;  %v1459_v15 = vsub.f32 %v1331_v21, %v1441_v14 }
 0x337   : > { %v1467_v5 = vmul.f32 1.442695, %v1458_v4  ;;  %v1469_v6 = vmul.f32 1.442695, %v1459_v15 }
 0x338   : > { %v1447_v11 = vpop.xlane.xlu1 %1446  ;;  %v1444_v7 = vpop.xlane.xlu0 %1443 }
 0x339   : > { %2354 = vpow2.f32 %v1467_v5  ;;  %v1461_v16 = vsub.f32 %v1378_v51, %v1447_v11  ;;  %v1460_v9 = vsub.f32 %v1334_v46, %v1444_v7 }
 0x33a   : > { %2356 = vpow2.f32 %v1469_v6 }
 0x33b   : > { %v1471_v13 = vmul.f32 1.442695, %v1460_v9  ;;  %v1473_v10 = vmul.f32 1.442695, %v1461_v16 }
 0x33c   : > { %v1450_v19 = vpop.xlane.xlu0 %1449  ;;  %v1453_v17 = vpop.xlane.xlu1 %1452 }
 0x33d   : > { %v1463_v20 = vsub.f32 %v1425_v52, %v1453_v17  ;;  %2358 = vpow2.f32 %v1471_v13  ;;  %v1462_v41 = vsub.f32 %v2669_v57, %v1450_v19 }
 0x33e   : > { %2360 = vpow2.f32 %v1473_v10 }
 0x33f   : > { %v1477_v30 = vmul.f32 1.442695, %v1463_v20  ;;  %v1475_v21 = vmul.f32 1.442695, %v1462_v41 }
 0x340   : > { %v1456_v25 = vpop.xlane.xlu0 %1455  ;;  %v940_v44 = vpop.permute.xlu1 %939 }
 0x341   : > { %v1464_v26 = vsub.f32 %v1428_v58, %v1456_v25  ;;  %2362 = vpow2.f32 %v1477_v30 }
 0x342   : > { %v2689_v31 = vpop.eup %2352 }
 0x343   : > { %v1481_v39 = vsel %vm1432_vm3, %v2689_v31, 0.0  ;;  %v1479_v40 = vmul.f32 1.442695, %v1464_v26 }
 0x344   : > { %1482 = vadd.xlane.f32.xlu1 %v1481_v39  ;;  %v942_v43 = vpop.permute.xlu0 %941  ;;  %v944_v47 = vpop.permute.xlu1 %943 }
 0x345   : > { %2364 = vpow2.f32 %v1479_v40 }
 0x346   : > { %v2693_v22 = vpop.eup %2354  ;;  %2366 = vpow2.f32 %v1475_v21 }
 0x347   : > { %v2695_v23 = vpop.eup %2356  ;;  %v1484_v24 = vsel %vm1432_vm3, %v2693_v22, 0.0 }
 0x348   : > { %v1487_v27 = vsel %vm1432_vm3, %v2695_v23, 0.0  ;;  %1485 = vadd.xlane.f32.xlu0 %v1484_v24  ;;  %v948_v46 = vpop.permute.xlu0 %947  ;;  %v946_v49 = vpop.permute.xlu1 %945 }
 0x349   : > { %1488 = vadd.xlane.f32.xlu1 %v1487_v27  ;;  %v963_v52 = vcombine.low %v940_v44, %v948_v46 }
 0x34a   : > { %v2701_v28 = vpop.eup %2358 }
 0x34b   : > { %v1490_v32 = vsel %vm1432_vm3, %v2701_v28, 0.0  ;;  %v2705_v33 = vpop.eup %2360  ;;  %v971_v56 = vrot.slane %v963_v52, %v2526_v29 }
 0x34c   : > { %1491 = vadd.xlane.f32.xlu0 %v1490_v32  ;;  %v1493_v34 = vsel %vm1432_vm3, %v2705_v33, 0.0  ;;  %v952_v48 = vpop.permute.xlu0 %951  ;;  %v950_v53 = vpop.permute.xlu1 %949 }
 0x34d   : > { %v979_v50 = vcombine.low %v944_v47, %v952_v48  ;;  %v980_v51 = vcombine.high %v944_v47, %v952_v48  ;;  %v1031_v4 = vcombine.low %v942_v43, %v950_v53  ;;  %v1032_v15 = vcombine.high %v942_v43, %v950_v53 }
 0x34e   : > { %v2709_v35 = vpop.eup %2362 }
 0x34f   : > { %v1499_v36 = vsel %vm1432_vm3, %v2709_v35, 0.0  ;;  %v987_v54 = vrot.slane %v979_v50, %v2526_v29  ;;  %v994_v55 = vrot.slane %v980_v51, %v2526_v29  ;;  %v1039_v19 = vrot.slane %v1031_v4, %v2526_v29 }
 0x350   : > { %1494 = vadd.xlane.f32.xlu0 %v1493_v34  ;;  %v1046_v17 = vrot.slane %v1032_v15, %v2526_v29 }
 0x351   : > { %v995_v58 = vcombine.low %v971_v56, %v987_v54  ;;  %v996_v59 = vcombine.high %v971_v56, %v987_v54 }
 0x352   : > { %v2713_v37 = vpop.eup %2364 }
 0x353   : > { %v1502_v38 = vsel %vm1432_vm3, %v2713_v37, 0.0  ;;  %v2720_v12 = vpop.eup %2366  ;;  %v1003_v63 = vrot.slane %v995_v58, %v2546_v45  ;;  %v1010_v0 = vrot.slane %v996_v59, %v2546_v45 }
 0x354   : > { %1500 = vadd.xlane.f32.xlu0 %v1499_v36  ;;  %v1496_v42 = vsel %vm1432_vm3, %v2720_v12, 0.0 }
 0x355   : > { %v1099_v5 = vcombine.low %v1003_v63, %v1010_v0  ;;  %v2201_v6 = vcombine.high %v1003_v63, %v1010_v0 }
 0x357   : > { %v1106_v20 = vrot.slane %v1099_v5, %v2526_v29  ;;  %v1114_v26 = vrot.slane %v2201_v6, %v2526_v29 }
 0x358   : > { %1503 = vadd.xlane.f32.xlu0 %v1502_v38 }
 0x35a   : > { %953 = vrot.lane.b32.xlu1 %v2517_v18, %s2406_s17  ;;  %v964_v18 = vcombine.high %v940_v44, %v948_v46  ;;  %v1131_v44 = vcombine.low %v1106_v20, %v1114_v26 }
 0x35c   : > { %v978_v57 = vrot.slane %v964_v18, %v2526_v29 }
 0x35e   : > { %v1011_v61 = vcombine.low %v978_v57, %v994_v55  ;;  %v1012_v62 = vcombine.high %v978_v57, %v994_v55  ;;  %v1139_v55 = vrot.slane %v1131_v44, %v2546_v45  ;;  %v1132_v57 = vcombine.high %v1106_v20, %v1114_v26 }
 0x360   : > { %v1019_v2 = vrot.slane %v1011_v61, %v2546_v45  ;;  %v1026_v3 = vrot.slane %v1012_v62, %v2546_v45  ;;  %v1146_v4 = vrot.slane %v1132_v57, %v2546_v45 }
 0x362   : > { %v1115_v11 = vcombine.low %v1019_v2, %v1026_v3  ;;  %v2202_v7 = vcombine.high %v1019_v2, %v1026_v3 }
 0x364   : > { %v1122_v39 = vrot.slane %v1115_v11, %v2526_v29  ;;  %v1130_v40 = vrot.slane %v2202_v7, %v2526_v29 }
 0x366   : > { %v1147_v46 = vcombine.low %v1122_v39, %v1130_v40  ;;  %v1148_v58 = vcombine.high %v1122_v39, %v1130_v40 }
 0x368   : > { %v1155_v56 = vrot.slane %v1147_v46, %v2546_v45  ;;  %v1162_v15 = vrot.slane %v1148_v58, %v2546_v45 }
 0x36a   : > { %v1163_v11 = vcombine.low %v1139_v55, %v1155_v56  ;;  %v1165_v39 = vcombine.low %v1146_v4, %v1162_v15  ;;  %v1166_v40 = vcombine.high %v1146_v4, %v1162_v15 }
 0x37e   : > { %1497 = vadd.xlane.f32.xlu1 %v1496_v42 }
 0x3cd   : > { %v1483_v60 = vpop.xlane.xlu1 %1482 }
 0x3d1   : > { %v1486_v8 = vpop.xlane.xlu0 %1485 }
 0x3d2   : > { %v1489_v14 = vpop.xlane.xlu1 %1488  ;;  %2368 = vrcp.f32 %v1486_v8 }
 0x3d5   : > { %v1492_v9 = vpop.xlane.xlu0 %1491 }
 0x3d6   : > { %v954_v16 = vpop.permute.xlu1 %953  ;;  %2370 = vrcp.f32 %v1492_v9 }
 0x3d7   : > { %v1047_v13 = vcombine.low %v946_v49, %v954_v16  ;;  %v1048_v10 = vcombine.high %v946_v49, %v954_v16  ;;  %2372 = vrcp.f32 %v1483_v60  ;;  %v1164_v16 = vcombine.high %v1139_v55, %v1155_v56 }
 0x3d8   : > { %2374 = vrcp.f32 %v1489_v14 }
 0x3d9   : > { %v1055_v30 = vrot.slane %v1047_v13, %v2526_v29  ;;  %v1062_v25 = vrot.slane %v1048_v10, %v2526_v29  ;;  %v2740_v24 = vpop.xlane.xlu0 %1494 }
 0x3db   : > { %v1063_v27 = vcombine.low %v1039_v19, %v1055_v30  ;;  %v1064_v32 = vcombine.high %v1039_v19, %v1055_v30  ;;  %v1079_v34 = vcombine.low %v1046_v17, %v1062_v25  ;;  %v1080_v36 = vcombine.high %v1046_v17, %v1062_v25 }
 0x3dd   : > { %v1071_v38 = vrot.slane %v1063_v27, %v2546_v45  ;;  %v1078_v41 = vrot.slane %v1064_v32, %v2546_v45  ;;  %v1087_v21 = vrot.slane %v1079_v34, %v2546_v45  ;;  %v1094_v42 = vrot.slane %v1080_v36, %v2546_v45  ;;  %v1501_v43 = vpop.xlane.xlu0 %1500 }
 0x3de   : > { %2376 = vrcp.f32 %v1501_v43 }
 0x3df   : > { %v1167_v47 = vcombine.low %v1071_v38, %v1078_v41  ;;  %v2203_v48 = vcombine.high %v1071_v38, %v1078_v41  ;;  %v1183_v49 = vcombine.low %v1087_v21, %v1094_v42  ;;  %v2204_v50 = vcombine.high %v1087_v21, %v1094_v42  ;;  %v2369_v62 = vpop.eup %2368 }
 0x3e0   : > { %v1514_v13 = vmul.f32 %v2369_v62, %v2693_v22 }
 0x3e1   : > { %v1174_v51 = vrot.slane %v1167_v47, %v2526_v29  ;;  %v1182_v52 = vrot.slane %v2203_v48, %v2526_v29  ;;  %v1190_v18 = vrot.slane %v1183_v49, %v2526_v29  ;;  %v1198_v53 = vrot.slane %v2204_v50, %v2526_v29  ;;  %v1504_v54 = vpop.xlane.xlu0 %1503 }
 0x3e2   : > { %2378 = vrcp.f32 %v1504_v54 }
 0x3e3   : > { %v1199_v59 = vcombine.low %v1174_v51, %v1182_v52  ;;  %v1215_v60 = vcombine.low %v1190_v18, %v1198_v53  ;;  %v1200_v61 = vcombine.high %v1174_v51, %v1182_v52  ;;  %v1216_v63 = vcombine.high %v1190_v18, %v1198_v53  ;;  %v2371_v0 = vpop.eup %2370 }
 0x3e4   : > { %v2373_v14 = vpop.eup %2372  ;;  %v1516_v10 = vmul.f32 %v2371_v0, %v2701_v28  ;;  %2380 = vrcp.f32 %v2740_v24 }
 0x3e5   : > { %v1207_v8 = vrot.slane %v1199_v59, %v2546_v45  ;;  %v1223_v2 = vrot.slane %v1215_v60, %v2546_v45  ;;  %v1214_v3 = vrot.slane %v1200_v61, %v2546_v45  ;;  %v1230_v5 = vrot.slane %v1216_v63, %v2546_v45  ;;  %v2375_v6 = vpop.eup %2374 }
 0x3e6   : > { %v1513_v25 = vmul.f32 %v2373_v14, %v2689_v31  ;;  %v1515_v26 = vmul.f32 %v2375_v6, %v2695_v23 }
 0x3e7   : > { %v1231_v7 = vcombine.low %v1207_v8, %v1223_v2  ;;  %v1232_v9 = vcombine.high %v1207_v8, %v1223_v2  ;;  %v1233_v20 = vcombine.low %v1214_v3, %v1230_v5  ;;  %v1234_v30 = vcombine.high %v1214_v3, %v1230_v5 }
 0x3e8   : > { %v1521_v27 = vpack.c.bf16 %v1514_v13, %v1513_v25  ;;  %v1522_v32 = vpack.c.bf16 %v1516_v10, %v1515_v26 }
 0x3e9   : > { %v1525_v19 = vpack.c.bf16 %v1231_v7, %v1163_v11  ;;  %v1526_v17 = vpack.c.bf16 %v1232_v9, %v1164_v16  ;;  %v1527_v28 = vpack.c.bf16 %v1233_v20, %v1165_v39  ;;  %v1528_v34 = vpack.c.bf16 %v1234_v30, %v1166_v40 }
 0x3eb   : > { %2282 = vmatpush3.bf16.msra.mxu1 %v1525_v19  ;;  %2288 = vmatpush3.bf16.msra.mxu0 %v1526_v17  ;;  %v2377_v22 = vpop.eup %2376 }
 0x3ec   : > { %2293 = vmatprep.subr.bf16.mxu1 %v2398_v1  ;;  %2299 = vmatprep.subr.bf16.mxu0 %v2398_v1  ;;  %v1519_v23 = vmul.f32 %v2377_v22, %v2709_v35 }
 0x3ee   : > { %2284 = vmatmul.mubr.msk.bf16.vlgmr.msra.gmra.mxu1 %vm1432_vm3, %v1521_v27  ;;  %2290 = vmatmul.mubr.msk.bf16.vlgmr.msra.gmra.mxu0 %vm1432_vm3, %v1522_v32 }
 0x3ef   : > { %2294 = vmatpush3.bf16.msra.mxu1 %v1527_v28  ;;  %2300 = vmatpush3.bf16.msra.mxu0 %v1528_v34  ;;  %v2379_v31 = vpop.eup %2378 }
 0x3f0   : > { %2301 = vmatprep.mubr.msk.bf16.mxu0 %vm2399_vm0, %v2398_v1  ;;  %2295 = vmatprep.mubr.msk.bf16.mxu1 %vm2399_vm0, %v2398_v1  ;;  %v1520_v36 = vmul.f32 %v2379_v31, %v2713_v37 }
 0x3f1   : > { %2305 = vmatprep.subr.bf16.mxu1 %v2398_v1  ;;  %v2381_v21 = vpop.eup %2380 }
 0x3f2   : > { %v1524_v38 = vpack.c.bf16 %v1520_v36, %v1519_v23  ;;  %v1517_v43 = vmul.f32 %v2381_v21, %v2705_v33 }
 0x3f6   : > { %2302 = vmatmul.mubr.msk.bf16.vlgmr.msra.gmra.mxu0 %vm1432_vm3, %v1524_v38 }
 0x407   : > { %v1498_v41 = vpop.xlane.xlu1 %1497 }
 0x408   : > { %2382 = vrcp.f32 %v1498_v41 }
 0x415   : > { %v2383_v42 = vpop.eup %2382 }
 0x416   : > { %v1518_v44 = vmul.f32 %v2383_v42, %v2720_v12 }
 0x418   : > { %v1523_v46 = vpack.c.bf16 %v1518_v44, %v1517_v43 }
 0x41a   : > { %2296 = vmatmul.mubr.msk.bf16.vlgmr.msra.gmra.mxu1 %vm1432_vm3, %v1523_v46  ;;  %v2350_v46 = vld [vmem:[%s2852_s3 + $0x8] sm:$0xff]  }
 0x41b   : > { %2309 = vmatprep.mubr.msk.bf16.mxu1 %vm2399_vm0, %v2398_v1  ;;  %2306 = vmatpush3.bf16.msra.mxu1 %v2350_v46 }
 0x41c   : > { %2307 = vmatprep.subr.bf16.mxu1 %v2398_v1 }
 0x4ae   : > { %v1566_v35 = vpop.f32.mrf.mxu1  ;;  %v1610_v37 = vpop.f32.mrf.mxu0 }
 0x4b0   : > { %v2285_v47 = vpop.f32.mrf.mxu1  ;;  %v2291_v48 = vpop.f32.mrf.mxu0 }
 0x4b2   : > { %v1569_v49 = vpop.f32.mrf.mxu1  ;;  %v1613_v24 = vpop.f32.mrf.mxu0 }
 0x4b4   : > { %v2286_v50 = vpop.f32.mrf.mxu1  ;;  %v2292_v51 = vpop.f32.mrf.mxu0 }
 0x4b6   : > { %v1698_v52 = vpop.f32.mrf.mxu0 }
 0x4b7   : > { %v1721_v54 = vcombine.low %v1610_v37, %v1698_v52  ;;  %v1722_v12 = vcombine.high %v1610_v37, %v1698_v52 }
 0x4b8   : > { %v2303_v18 = vpop.f32.mrf.mxu0 }
 0x4b9   : > { %v1729_v59 = vrot.slane %v1721_v54, %v2526_v29  ;;  %v1736_v60 = vrot.slane %v1722_v12, %v2526_v29  ;;  %v2351_v12 = vld [vmem:[%s2852_s3] sm:$0xff]  }
 0x4ba   : > { %v1701_v53 = vpop.f32.mrf.mxu0  ;;  %2308 = vmatpush3.bf16.msra.mxu1 %v2351_v12 }
 0x4bb   : > { %v1789_v63 = vcombine.low %v1613_v24, %v1701_v53  ;;  %v1790_v0 = vcombine.high %v1613_v24, %v1701_v53 }
 0x4bc   : > { %v2304_v33 = vpop.f32.mrf.mxu0 }
 0x4bd   : > { %v1797_v13 = vrot.slane %v1789_v63, %v2526_v29  ;;  %v1804_v10 = vrot.slane %v1790_v0, %v2526_v29 }
 0x4da   : > { %v1654_v55 = vpop.f32.mrf.mxu1 }
 0x4db   : > { %v1705_v56 = vcombine.low %v1566_v35, %v1654_v55  ;;  %v1706_v57 = vcombine.high %v1566_v35, %v1654_v55 }
 0x4dc   : > { %v2297_v58 = vpop.f32.mrf.mxu1 }
 0x4dd   : > { %v1713_v61 = vrot.slane %v1705_v56, %v2526_v29  ;;  %v1720_v62 = vrot.slane %v1706_v57, %v2526_v29 }
 0x4de   : > { %v1657_v8 = vpop.f32.mrf.mxu1 }
 0x4df   : > { %v1737_v2 = vcombine.low %v1713_v61, %v1729_v59  ;;  %v1738_v3 = vcombine.high %v1713_v61, %v1729_v59  ;;  %v1753_v14 = vcombine.low %v1720_v62, %v1736_v60  ;;  %v1754_v4 = vcombine.high %v1720_v62, %v1736_v60 }
 0x4e0   : > { %v1773_v15 = vcombine.low %v1569_v49, %v1657_v8  ;;  %v1774_v5 = vcombine.high %v1569_v49, %v1657_v8  ;;  %v2298_v6 = vpop.f32.mrf.mxu1 }
 0x4e1   : > { %v1745_v11 = vrot.slane %v1737_v2, %v2546_v45  ;;  %v1752_v7 = vrot.slane %v1738_v3, %v2546_v45  ;;  %v1761_v16 = vrot.slane %v1753_v14, %v2546_v45  ;;  %v1768_v9 = vrot.slane %v1754_v4, %v2546_v45 }
 0x4e2   : > { %v1781_v19 = vrot.slane %v1773_v15, %v2526_v29  ;;  %v1788_v17 = vrot.slane %v1774_v5, %v2526_v29 }
 0x4e3   : > { %v1841_v20 = vcombine.low %v1745_v11, %v1752_v7  ;;  %v2213_v30 = vcombine.high %v1745_v11, %v1752_v7  ;;  %v1857_v25 = vcombine.low %v1761_v16, %v1768_v9  ;;  %v2214_v26 = vcombine.high %v1761_v16, %v1768_v9 }
 0x4e4   : > { %v1805_v39 = vcombine.low %v1781_v19, %v1797_v13  ;;  %v1806_v40 = vcombine.high %v1781_v19, %v1797_v13  ;;  %v1821_v27 = vcombine.low %v1788_v17, %v1804_v10  ;;  %v1822_v32 = vcombine.high %v1788_v17, %v1804_v10 }
 0x4e5   : > { %v1848_v22 = vrot.slane %v1841_v20, %v2526_v29  ;;  %v1856_v28 = vrot.slane %v2213_v30, %v2526_v29  ;;  %v1864_v34 = vrot.slane %v1857_v25, %v2526_v29  ;;  %v1872_v31 = vrot.slane %v2214_v26, %v2526_v29 }
 0x4e6   : > { %v1813_v23 = vrot.slane %v1805_v39, %v2546_v45  ;;  %v1820_v36 = vrot.slane %v1806_v40, %v2546_v45  ;;  %v1829_v38 = vrot.slane %v1821_v27, %v2546_v45  ;;  %v1836_v41 = vrot.slane %v1822_v32, %v2546_v45  ;;  %v2217_v40 = vld [vmem:[%s2853_s4] ss:$0 sm:$0xff] }
 0x4e7   : > { %v1874_v21 = vcombine.high %v1848_v22, %v1856_v28  ;;  %v1890_v42 = vcombine.high %v1864_v34, %v1872_v31  ;;  %v1873_v43 = vcombine.low %v1848_v22, %v1856_v28  ;;  %v1889_v44 = vcombine.low %v1864_v34, %v1872_v31  ;;  %v2388_v28 = vld [vmem:[%s2479_s10] sm:$0xff] }
 0x4e8   : > { %v1909_v35 = vcombine.low %v1813_v23, %v1820_v36  ;;  %v2215_v37 = vcombine.high %v1813_v23, %v1820_v36  ;;  %v1925_v47 = vcombine.low %v1829_v38, %v1836_v41  ;;  %v2216_v48 = vcombine.high %v1829_v38, %v1836_v41  ;;  %v2389_v41 = vld [vmem:[%s2479_s10 + $0x8] sm:$0xff] }
 0x4e9   : > { %v1881_v49 = vrot.slane %v1873_v43, %v2546_v45  ;;  %v1897_v24 = vrot.slane %v1889_v44, %v2546_v45  ;;  %v1888_v53 = vrot.slane %v1874_v21, %v2546_v45  ;;  %v1904_v33 = vrot.slane %v1890_v42, %v2546_v45 }
 0x4ea   : > { %v1916_v50 = vrot.slane %v1909_v35, %v2526_v29  ;;  %v1924_v51 = vrot.slane %v2215_v37, %v2526_v29  ;;  %v1932_v52 = vrot.slane %v1925_v47, %v2526_v29  ;;  %v1940_v18 = vrot.slane %v2216_v48, %v2526_v29 }
 0x4eb   : > { %v1905_v54 = vcombine.low %v1881_v49, %v1897_v24  ;;  %v1907_v61 = vcombine.low %v1888_v53, %v1904_v33  ;;  %v1906_v63 = vcombine.high %v1881_v49, %v1897_v24  ;;  %v1908_v4 = vcombine.high %v1888_v53, %v1904_v33 }
 0x4ec   : > { %v1942_v55 = vcombine.high %v1916_v50, %v1924_v51  ;;  %v1958_v56 = vcombine.high %v1932_v52, %v1940_v18  ;;  %v1941_v57 = vcombine.low %v1916_v50, %v1924_v51  ;;  %v1957_v58 = vcombine.low %v1932_v52, %v1940_v18 }
 0x4ee   : > { %v1956_v59 = vrot.slane %v1942_v55, %v2546_v45  ;;  %v1972_v29 = vrot.slane %v1958_v56, %v2546_v45  ;;  %v1949_v1 = vrot.slane %v1941_v57, %v2546_v45  ;;  %v1965_v60 = vrot.slane %v1957_v58, %v2546_v45  ;;  %v2221_v55 = vld [vmem:[%s2854_s5] ss:$0 sm:$0xff] }
 0x4ef   : > { %v2222_v57 = vld [vmem:[%s2855_s6] ss:$0 sm:$0xff] }
 0x4f0   : > { %v1975_v62 = vcombine.low %v1956_v59, %v1972_v29  ;;  %v1974_v0 = vcombine.high %v1949_v1, %v1965_v60  ;;  %v1973_v8 = vcombine.low %v1949_v1, %v1965_v60  ;;  %v1976_v14 = vcombine.high %v1956_v59, %v1972_v29 }
 0x4f2   : > { %v2338_v2 = vpack.i.bf16 %v1975_v62, %v1907_v61  ;;  %v2333_v3 = vpack.i.bf16 %v1974_v0, %v1906_v63  ;;  %v2343_v15 = vpack.i.bf16 %v1976_v14, %v1908_v4 }
 0x4f4   : > { %2339 = vrot.lane.b32.xlu0 %v2338_v2, %s2407_s22  ;;  %2334 = vrot.lane.b32.xlu1 %v2333_v3, %s2408_s23 }
 0x4f8   : > { %2344 = vrot.lane.b32.xlu1 %v2343_v15, %s2409_s26 }
 0x566   : > { %v2340_v5 = vpop.permute.xlu0 %2339  ;;  %v2335_v6 = vpop.permute.xlu1 %2334 }
 0x567   : > { %v2337_v11 = vunpack.i.h.bf16 %v2335_v6  ;;  %v2336_v45 = vunpack.i.l.bf16 %v2335_v6  ;;  %v2342_v7 = vunpack.i.h.bf16 %v2340_v5  ;;  %v2341_v16 = vunpack.i.l.bf16 %v2340_v5 }
 0x569   : > { %v2001_v9 = vsel %vm1243_vm2, %v1905_v54, %v2336_v45  ;;  %v2002_v13 = vsel %vm1243_vm2, %v1973_v8, %v2337_v11 }
 0x56a   : > { %v2345_v10 = vpop.permute.xlu1 %2344  ;;  %v2003_v20 = vsel %vm1432_vm3, %v2001_v9, %v2341_v16  ;;  %v2004_v30 = vsel %vm1432_vm3, %v2002_v13, %v2342_v7 }
 0x56b   : > { %v2347_v19 = vunpack.i.h.bf16 %v2345_v10  ;;  %v2346_v17 = vunpack.i.l.bf16 %v2345_v10 }
 0x56d   : > { %v2006_v25 = vsel %vm2005_vm4, %v2003_v20, %v2346_v17  ;;  %v2007_v26 = vsel %vm2005_vm4, %v2004_v30, %v2347_v19 }
 0x56e   : > { %v2008_v39 = vpack.c.bf16 %v2007_v26, %v2006_v25 }
 0x570   : > { %2310 = vmatmul.mubr.msk.bf16.vlgmr.msra.gmra.mxu1 %vm306_vm1, %v2008_v39 }
 0x630   : > { %v2069_v27 = vpop.f32.mrf.mxu1 }
 0x631   : > { %v2070_v32 = vadd.f32 %v2217_v40, %v2069_v27 }
 0x632   : > { %v2311_v22 = vpop.f32.mrf.mxu1 }
 0x633   : > { %v2076_v34 = vadd.f32 %v2388_v28, %v2070_v32 }
 0x634   : > { %v2072_v31 = vpop.f32.mrf.mxu1 }
 0x635   : > { %v2073_v23 = vadd.f32 %v2217_v40, %v2072_v31  ;;  %v2080_v36 = vsel %vm306_vm1, %v2076_v34, 0.0 }
 0x636   : > { %2081 = vadd.xlane.f32.xlu1 %v2080_v36  ;;  %v2312_v38 = vpop.f32.mrf.mxu1 }
 0x637   : > { %v2077_v21 = vadd.f32 %v2389_v41, %v2073_v23 }
 0x639   : > { %v2083_v42 = vsel %vm306_vm1, %v2077_v21, 0.0 }
 0x63a   : > { %2084 = vadd.xlane.f32.xlu0 %v2083_v42 }
 0x6bf   : > { %v2082_v43 = vpop.xlane.xlu1 %2081 }
 0x6c0   : > { %v2087_v44 = vmul.f32 0.03125, %v2082_v43 }
 0x6c2   : > { %v2089_v46 = vsub.f32 %v2076_v34, %v2087_v44 }
 0x6c3   : > { %v2085_v35 = vpop.xlane.xlu0 %2084 }
 0x6c4   : > { %v2088_v37 = vmul.f32 0.03125, %v2085_v35  ;;  %v2091_v47 = vmul.f32 %v2089_v46, %v2089_v46 }
 0x6c6   : > { %v2090_v48 = vsub.f32 %v2077_v21, %v2088_v37  ;;  %v2093_v49 = vsel %vm306_vm1, %v2091_v47, 0.0 }
 0x6c7   : > { %2094 = vadd.xlane.f32.xlu0 %v2093_v49 }
 0x6c8   : > { %v2092_v24 = vmul.f32 %v2090_v48, %v2090_v48 }
 0x6ca   : > { %v2096_v50 = vsel %vm306_vm1, %v2092_v24, 0.0 }
 0x6cb   : > { %2097 = vadd.xlane.f32.xlu1 %v2096_v50 }
 0x750   : > { %v2095_v51 = vpop.xlane.xlu0 %2094 }
 0x751   : > { %v2099_v52 = vmul.f32 0.03125, %v2095_v51 }
 0x753   : > { %v2101_v18 = vadd.f32 1e-05, %v2099_v52 }
 0x754   : > { %v2098_v53 = vpop.xlane.xlu1 %2097 }
 0x755   : > { %2384 = vrsqrt.f32 %v2101_v18  ;;  %v2100_v33 = vmul.f32 0.03125, %v2098_v53 }
 0x757   : > { %v2102_v54 = vadd.f32 1e-05, %v2100_v33 }
 0x759   : > { %2386 = vrsqrt.f32 %v2102_v54 }
 0x762   : > { %v2385_v12 = vpop.eup %2384 }
 0x763   : > { %v2105_v56 = vmul.f32 %v2385_v12, %v2089_v46 }
 0x765   : > { %v2113_v58 = vmul.f32 %v2221_v55, %v2105_v56 }
 0x766   : > { %v2387_v59 = vpop.eup %2386 }
 0x767   : > { %v2121_v29 = vadd.f32 %v2222_v57, %v2113_v58  ;;  %v2106_v1 = vmul.f32 %v2387_v59, %v2090_v48 }
 0x769   : > { %2123 = vst.msk [vmem:[%s278_s13] sm:$0xff] %vm306_vm1, %v2121_v29  ;;  %v2114_v60 = vmul.f32 %v2221_v55, %v2106_v1 }
 0x76b   : > { %v2122_v61 = vadd.f32 %v2222_v57, %v2114_v60 }
 0x76d   : > { %2124 = vst.msk [vmem:[%s278_s13 + $0x8] sm:$0xff] %vm306_vm1, %v2122_v61 }
 0x76e PF: > { %s17_s24 = sadd.s32 1, %s2396_s24  }
 0x76f   : > { %p14_p4 = scmp.ge.s32.totalorder %s17_s24, 4  }
 0x771   :  { %16 = sbr.rel (!%p14_p4) target bundleno = 1 (0x1), region = 78 }

// kernel: swin_forward.4
= control target key start
LH: loop header
LB: loop body
LE: loop exit
PB: predicated region body
PF: predicated region fallthrough
CT: control target
= control target key end

     0   :  { %s2520_s30 = smov 0   ;;  %s2934_s0 = inlined_call_operand.vmem [shape: f32[32,64], index: 0, kind: input, shape index: {}]   ;;  %s2935_s1 = inlined_call_operand.vmem [shape: bf16[64,32], index: 1, kind: input, shape index: {}]   ;;  %s2936_s2 = inlined_call_operand.vmem [shape: f32[1,32], index: 2, kind: input, shape index: {}]   ;;  %s2937_s3 = inlined_call_operand.vmem [shape: f32[1,32], index: 3, kind: input, shape index: {}]   ;;  %s2938_s4 = inlined_call_operand.vmem [shape: f32[1,32], index: 4, kind: input, shape index: {}]   ;;  %s2939_s5 = inlined_call_operand.vmem [shape: bf16[7,32,128], index: 5, kind: input, shape index: {}]   ;;  %s2940_s6 = inlined_call_operand.vmem [shape: f32[7,1,128], index: 6, kind: input, shape index: {}]   ;;  %s2941_s7 = inlined_call_operand.vmem [shape: bf16[7,128,32], index: 7, kind: input, shape index: {}]   ;;  %s2942_s8 = inlined_call_operand.vmem [shape: f32[7,1,32], index: 8, kind: input, shape index: {}]   ;;  %s2943_s9 = inlined_call_operand.vmem [shape: f32[32,32], index: 9, kind: output, shape index: {}]  }
   0x1 LB: > { %s1833_s10 = sadd.s32 4294967295, %s2466_s30   ;;  %p1837_p0 = scmp.ge.s32.totalorder %s2466_s30, 1  ;;  %s2466_s30 = sphi %s2520_s30, %s19_s30  }
   0x2   : > { %p288_p1 = scmp.lt.s32.totalorder %s2466_s30, 3 }
   0x4   : > { %p289_p2 = pnand %p1837_p0, %p288_p1 }
   0x5   : > { %s1838_s15 = sshll.u32 (!%p289_p2), %s1833_s10, 1 }
   0x6   : > { %292 = sbr.rel (%p289_p2) target bundleno = 3364 (0xd24), region = 56  ;;  %p325_p3 = scmp.lt.s32.totalorder (!%p289_p2), %s1838_s15, 3 }
   0xb   : > { %v2382_v0 = vld [vmem:[%s2935_s1 + $0x18] sm:$0xff]   ;;  %v2468_v1 = vmov 0.0   ;;  %v2383_v2 = vld [vmem:[%s2935_s1 + $0x10] sm:$0xff]   ;;  %vm2469_vm0 = vmmov 0   ;;  %v2384_v3 = vld [vmem:[%s2935_s1 + $0x8] sm:$0xff]   ;;  %s2945_s15 = smov (!%p325_p3, %s1838_s15), 3 }
   0xc   : > { %2164 = vmatprep.subr.bf16.mxu0 %v2468_v1  ;;  %2184 = vmatprep.subr.bf16.mxu1 %v2468_v1  ;;  %s1839_s18 = sshll.u32 %s2945_s15, 3  ;;  %v2385_v4 = vld [vmem:[%s2935_s1] sm:$0xff]   ;;  %vm379_vm1 = vcmask 523264   ;;  %vm426_vm2 = vcmask 261120   ;;  %v2386_v27 = vld [vmem:[%s2939_s5 + $0x8] sm:$0xff]   ;;  %v2388_v29 = vld [vmem:[%s2941_s7 + $0x38] sm:$0xff]  }
   0xd   : > { %2165 = vmatpush3.bf16.msra.mxu0 %v2382_v0  ;;  %2172 = vmatprep.mubr.msk.bf16.mxu0 %vm2469_vm0, %v2468_v1  ;;  %s328_s23 = scalar_lea.vmem %s2934_s0, %s1839_s18  ;;  %v1842_v8 = vld [vmem:[%s2936_s2] ss:$0 sm:$0xff]  ;;  %v2389_v30 = vld [vmem:[%s2941_s7 + $0x30] sm:$0xff]   ;;  %v2390_v31 = vld [vmem:[%s2941_s7 + $0x28] sm:$0xff]   ;;  %s334_s20 = scalar_lea.vmem %s2943_s9, %s1839_s18 }
   0xe   : > { %2166 = vmatprep.subr.bf16.mxu0 %v2468_v1  ;;  %2200 = vmatprep.mubr.msk.bf16.mxu1 %vm2469_vm0, %v2468_v1  ;;  %v337_v5 = vld [vmem:[%s328_s23] sm:$0xff]  ;;  %v338_v6 = vld [vmem:[%s328_s23 + $0x8] sm:$0xff]  ;;  %v2392_v33 = vld [vmem:[%s2941_s7 + $0x18] sm:$0xff]  }
   0xf   : > { %v339_v7 = vpack.c.bf16 %v338_v6, %v337_v5  ;;  %v2387_v28 = vld [vmem:[%s2939_s5] sm:$0xff]   ;;  %2185 = vmatpush3.bf16.msra.mxu1 %v2388_v29  ;;  %v2393_v51 = vld [vmem:[%s2941_s7 + $0x10] sm:$0xff]   ;;  %v2394_v52 = vld [vmem:[%s2941_s7 + $0x8] sm:$0xff]  }
  0x10   : > { %2186 = vmatprep.subr.bf16.mxu1 %v2468_v1  ;;  %v2391_v32 = vld [vmem:[%s2941_s7 + $0x20] sm:$0xff]   ;;  %v2396_v0 = vld [vmem:[%s2939_s5 + $0x18] sm:$0xff]   ;;  %v2406_v29 = vld [vmem:[%s2939_s5 + $0x28] sm:$0xff]  }
  0x11   : > { %2167 = vmatpush3.bf16.msra.mxu0 %v2383_v2  ;;  %v1848_v42 = vld [vmem:[%s2937_s3] ss:$0 sm:$0xff]  ;;  %v2397_v2 = vld [vmem:[%s2939_s5 + $0x10] sm:$0xff]  }
  0x12   : > { %2168 = vmatprep.subr.bf16.mxu0 %v2468_v1  ;;  %v1849_v46 = vld [vmem:[%s2938_s4] ss:$0 sm:$0xff] }
  0x13   : > { %2187 = vmatpush3.bf16.msra.mxu1 %v2389_v30  ;;  %v2395_v53 = vld [vmem:[%s2941_s7] sm:$0xff]  }
  0x14   : > { %2188 = vmatprep.subr.bf16.mxu1 %v2468_v1  ;;  %v1850_v54 = vld [vmem:[%s2940_s6] ss:$0 sm:$0xff] }
  0x15   : > { %2169 = vmatpush3.bf16.msra.mxu0 %v2384_v3  ;;  %v2407_v30 = vld [vmem:[%s2939_s5 + $0x20] sm:$0xff]  }
  0x16   : > { %2170 = vmatprep.subr.bf16.mxu0 %v2468_v1 }
  0x17   : > { %2189 = vmatpush3.bf16.msra.mxu1 %v2390_v31 }
  0x18   : > { %2190 = vmatprep.subr.bf16.mxu1 %v2468_v1 }
  0x19   : > { %2171 = vmatpush3.bf16.msra.mxu0 %v2385_v4  ;;  %v1854_v4 = vld [vmem:[%s2942_s8] ss:$0 sm:$0xff] }
  0x1a   : > { %2176 = vmatprep.subr.bf16.mxu0 %v2468_v1 }
  0x1b   : > { %2191 = vmatpush3.bf16.msra.mxu1 %v2391_v32  ;;  %v1889_v32 = vld [vmem:[%s2942_s8 + $0x1] ss:$0 sm:$0xff] }
  0x1c   : > { %2173 = vmatmul.mubr.msk.bf16.vlgmr.msra.gmra.mxu0 %vm379_vm1, %v339_v7  ;;  %2192 = vmatprep.subr.bf16.mxu1 %v2468_v1 }
  0x1d   : > { %2180 = vmatprep.mubr.msk.bf16.mxu0 %vm2469_vm0, %v2468_v1  ;;  %2177 = vmatpush3.bf16.msra.mxu0 %v2386_v27 }
  0x1e   : > { %2178 = vmatprep.subr.bf16.mxu0 %v2468_v1 }
  0x1f   : > { %2193 = vmatpush3.bf16.msra.mxu1 %v2392_v33 }
  0x20   : > { %2194 = vmatprep.subr.bf16.mxu1 %v2468_v1 }
  0x21   : > { %2179 = vmatpush3.bf16.msra.mxu0 %v2387_v28 }
  0x22   : > { %2204 = vmatprep.subr.bf16.mxu0 %v2468_v1 }
  0x23   : > { %2195 = vmatpush3.bf16.msra.mxu1 %v2393_v51 }
  0x24   : > { %2196 = vmatprep.subr.bf16.mxu1 %v2468_v1 }
  0x27   : > { %2197 = vmatpush3.bf16.msra.mxu1 %v2394_v52 }
  0x28   : > { %2198 = vmatprep.subr.bf16.mxu1 %v2468_v1 }
  0x2b   : > { %2199 = vmatpush3.bf16.msra.mxu1 %v2395_v53 }
  0x2c   : > { %2232 = vmatprep.subr.bf16.mxu1 %v2468_v1 }
  0xdc   : > { %v417_v9 = vpop.f32.mrf.mxu0 }
  0xdd   : > { %v418_v10 = vadd.f32 %v1842_v8, %v417_v9 }
  0xde   : > { %v2174_v11 = vpop.f32.mrf.mxu0 }
  0xdf   : > { %v427_v12 = vsel %vm426_vm2, %v418_v10, 0.0 }
  0xe0   : > { %428 = vadd.xlane.f32.xlu0 %v427_v12  ;;  %v420_v13 = vpop.f32.mrf.mxu0  ;;  %v2399_v12 = vld [vmem:[%s2941_s7 + $0x70] sm:$0xff]  }
  0xe1   : > { %v421_v14 = vadd.f32 %v1842_v8, %v420_v13  ;;  %v2400_v13 = vld [vmem:[%s2941_s7 + $0x68] sm:$0xff]  }
  0xe2   : > { %v2175_v15 = vpop.f32.mrf.mxu0 }
  0xe3   : > { %v430_v16 = vsel %vm426_vm2, %v421_v14, 0.0  ;;  %v2402_v15 = vld [vmem:[%s2941_s7 + $0x58] sm:$0xff]  }
  0xe4   : > { %431 = vadd.xlane.f32.xlu0 %v430_v16  ;;  %v2403_v16 = vld [vmem:[%s2941_s7 + $0x50] sm:$0xff]  }
 0x169   : > { %v429_v17 = vpop.xlane.xlu0 %428 }
 0x16a   : > { %v434_v18 = vmul.f32 0.03125, %v429_v17  ;;  %v2404_v17 = vld [vmem:[%s2941_s7 + $0x48] sm:$0xff]  }
 0x16c   : > { %v436_v19 = vsub.f32 %v418_v10, %v434_v18  ;;  %v2398_v10 = vld [vmem:[%s2941_s7 + $0x78] sm:$0xff]   ;;  %v2405_v18 = vld [vmem:[%s2941_s7 + $0x40] sm:$0xff]  }
 0x16d   : > { %v432_v20 = vpop.xlane.xlu0 %431 }
 0x16e   : > { %v435_v21 = vmul.f32 0.03125, %v432_v20  ;;  %v438_v22 = vmul.f32 %v436_v19, %v436_v19 }
 0x170   : > { %v437_v23 = vsub.f32 %v421_v14, %v435_v21  ;;  %v440_v24 = vsel %vm426_vm2, %v438_v22, 0.0  ;;  %v2401_v14 = vld [vmem:[%s2941_s7 + $0x60] sm:$0xff]  }
 0x171   : > { %441 = vadd.xlane.f32.xlu1 %v440_v24 }
 0x172   : > { %v439_v25 = vmul.f32 %v437_v23, %v437_v23 }
 0x174   : > { %v443_v26 = vsel %vm426_vm2, %v439_v25, 0.0 }
 0x175   : > { %444 = vadd.xlane.f32.xlu1 %v443_v26 }
 0x1fa   : > { %v442_v34 = vpop.xlane.xlu1 %441 }
 0x1fb   : > { %v446_v35 = vmul.f32 0.03125, %v442_v34 }
 0x1fd   : > { %v448_v36 = vadd.f32 1e-05, %v446_v35 }
 0x1fe   : > { %v445_v37 = vpop.xlane.xlu1 %444 }
 0x1ff   : > { %2456 = vrsqrt.f32 %v448_v36  ;;  %v447_v38 = vmul.f32 0.03125, %v445_v37 }
 0x201   : > { %v449_v39 = vadd.f32 1e-05, %v447_v38  ;;  %v2408_v38 = vld [vmem:[%s2941_s7 + $0xb8] sm:$0xff]  }
 0x203   : > { %2458 = vrsqrt.f32 %v449_v39 }
 0x20c   : > { %v2457_v40 = vpop.eup %2456 }
 0x20d   : > { %v452_v41 = vmul.f32 %v2457_v40, %v436_v19  ;;  %v1868_v19 = vld [vmem:[%s2940_s6 + $0x1] ss:$0 sm:$0xff]  ;;  %v2409_v40 = vld [vmem:[%s2941_s7 + $0xb0] sm:$0xff]  }
 0x20f   : > { %v460_v45 = vmul.f32 %v1848_v42, %v452_v41  ;;  %v2410_v41 = vld [vmem:[%s2941_s7 + $0xa8] sm:$0xff]  }
 0x210   : > { %v2459_v43 = vpop.eup %2458 }
 0x211   : > { %v453_v44 = vmul.f32 %v2459_v43, %v437_v23  ;;  %v468_v48 = vadd.f32 %v1849_v46, %v460_v45  ;;  %v2412_v43 = vld [vmem:[%s2941_s7 + $0x98] sm:$0xff]   ;;  %v2414_v45 = vld [vmem:[%s2941_s7 + $0x88] sm:$0xff]  }
 0x213   : > { %v461_v47 = vmul.f32 %v1848_v42, %v453_v44  ;;  %v2411_v42 = vld [vmem:[%s2941_s7 + $0xa0] sm:$0xff]   ;;  %v2413_v44 = vld [vmem:[%s2941_s7 + $0x90] sm:$0xff]  }
 0x215   : > { %v469_v49 = vadd.f32 %v1849_v46, %v461_v47  ;;  %v2415_v46 = vld [vmem:[%s2941_s7 + $0x80] sm:$0xff]  }
 0x216   : > { %v1903_v47 = vld [vmem:[%s2940_s6 + $0x2] ss:$0 sm:$0xff] }
 0x217   : > { %v470_v50 = vpack.c.bf16 %v469_v49, %v468_v48 }
 0x219   : > { %2181 = vmatmul.mubr.msk.bf16.vlgmr.msra.gmra.mxu0 %vm426_vm2, %v470_v50 }
 0x21a   : > { %2208 = vmatprep.mubr.msk.bf16.mxu0 %vm2469_vm0, %v2468_v1  ;;  %2205 = vmatpush3.bf16.msra.mxu0 %v2396_v0 }
 0x21b   : > { %2206 = vmatprep.subr.bf16.mxu0 %v2468_v1 }
 0x21e   : > { %2207 = vmatpush3.bf16.msra.mxu0 %v2397_v2 }
 0x21f   : > { %2212 = vmatprep.subr.bf16.mxu0 %v2468_v1 }
 0x2d9   : > { %v531_v55 = vpop.f32.mrf.mxu0 }
 0x2da   : > { %v532_v57 = vadd.f32 %v1850_v54, %v531_v55 }
 0x2db   : > { %v2182_v56 = vpop.f32.mrf.mxu0 }
 0x2dc   : > { %v538_v61 = vmax.f32 %v532_v57, 0.0  ;;  %v2416_v57 = vld [vmem:[%s2939_s5 + $0x38] sm:$0xff]  }
 0x2dd   : > { %v534_v58 = vpop.f32.mrf.mxu0 }
 0x2de   : > { %v535_v59 = vadd.f32 %v1850_v54, %v534_v58  ;;  %v2417_v58 = vld [vmem:[%s2939_s5 + $0x30] sm:$0xff]  }
 0x2df   : > { %v2183_v60 = vpop.f32.mrf.mxu0 }
 0x2e0   : > { %v539_v62 = vmax.f32 %v535_v59, 0.0  ;;  %v1924_v60 = vld [vmem:[%s2942_s8 + $0x2] ss:$0 sm:$0xff] }
 0x2e2   : > { %v540_v63 = vpack.c.bf16 %v539_v62, %v538_v61 }
 0x2e4   : > { %2201 = vmatmul.mubr.bf16.vlgmr.msra.gmra.mxu1 %v540_v63 }
 0x2e5   : > { %2236 = vmatprep.mubr.msk.bf16.mxu1 %vm2469_vm0, %v2468_v1  ;;  %2233 = vmatpush3.bf16.msra.mxu1 %v2406_v29 }
 0x2e6   : > { %2234 = vmatprep.subr.bf16.mxu1 %v2468_v1 }
 0x2e9   : > { %2235 = vmatpush3.bf16.msra.mxu1 %v2407_v30 }
 0x2ea   : > { %2240 = vmatprep.subr.bf16.mxu1 %v2468_v1 }
 0x3a4   : > { %v646_v3 = vpop.f32.mrf.mxu1 }
 0x3a5   : > { %v647_v7 = vadd.f32 %v1854_v4, %v646_v3  ;;  %v2418_v3 = vld [vmem:[%s2941_s7 + $0xf8] sm:$0xff]  }
 0x3a6   : > { %v2202_v5 = vpop.f32.mrf.mxu1 }
 0x3a7   : > { %v2419_v5 = vld [vmem:[%s2941_s7 + $0xf0] sm:$0xff]  }
 0x3a8   : > { %v649_v6 = vpop.f32.mrf.mxu1 }
 0x3a9   : > { %v650_v8 = vadd.f32 %v1854_v4, %v649_v6  ;;  %v2420_v6 = vld [vmem:[%s2941_s7 + $0xe8] sm:$0xff]  }
 0x3aa   : > { %v2203_v9 = vpop.f32.mrf.mxu1 }
 0x3ab   : > { %v653_v11 = vpack.c.bf16 %v650_v8, %v647_v7  ;;  %v2421_v7 = vld [vmem:[%s2941_s7 + $0xe0] sm:$0xff]   ;;  %v2422_v8 = vld [vmem:[%s2941_s7 + $0xd8] sm:$0xff]   ;;  %v2423_v9 = vld [vmem:[%s2941_s7 + $0xd0] sm:$0xff]  }
 0x3ad   : > { %2209 = vmatmul.mubr.msk.bf16.vlgmr.msra.gmra.mxu0 %vm426_vm2, %v653_v11  ;;  %v2425_v11 = vld [vmem:[%s2941_s7 + $0xc0] sm:$0xff]  }
 0x3ae   : > { %2213 = vmatpush3.bf16.msra.mxu0 %v2398_v10  ;;  %2228 = vmatprep.mubr.msk.bf16.mxu0 %vm2469_vm0, %v2468_v1  ;;  %v2424_v10 = vld [vmem:[%s2941_s7 + $0xc8] sm:$0xff]  }
 0x3af   : > { %2214 = vmatprep.subr.bf16.mxu0 %v2468_v1 }
 0x3b2   : > { %2215 = vmatpush3.bf16.msra.mxu0 %v2399_v12  ;;  %v1938_v12 = vld [vmem:[%s2940_s6 + $0x3] ss:$0 sm:$0xff] }
 0x3b3   : > { %2216 = vmatprep.subr.bf16.mxu0 %v2468_v1 }
 0x3b6   : > { %2217 = vmatpush3.bf16.msra.mxu0 %v2400_v13 }
 0x3b7   : > { %2218 = vmatprep.subr.bf16.mxu0 %v2468_v1 }
 0x3ba   : > { %2219 = vmatpush3.bf16.msra.mxu0 %v2401_v14 }
 0x3bb   : > { %2220 = vmatprep.subr.bf16.mxu0 %v2468_v1 }
 0x3be   : > { %2221 = vmatpush3.bf16.msra.mxu0 %v2402_v15 }
 0x3bf   : > { %2222 = vmatprep.subr.bf16.mxu0 %v2468_v1 }
 0x3c2   : > { %2223 = vmatpush3.bf16.msra.mxu0 %v2403_v16 }
 0x3c3   : > { %2224 = vmatprep.subr.bf16.mxu0 %v2468_v1 }
 0x3c6   : > { %2225 = vmatpush3.bf16.msra.mxu0 %v2404_v17 }
 0x3c7   : > { %2226 = vmatprep.subr.bf16.mxu0 %v2468_v1 }
 0x3ca   : > { %2227 = vmatpush3.bf16.msra.mxu0 %v2405_v18 }
 0x3cb   : > { %2260 = vmatprep.subr.bf16.mxu0 %v2468_v1 }
 0x46d   : > { %v716_v20 = vpop.f32.mrf.mxu0 }
 0x46e   : > { %v717_v22 = vadd.f32 %v1868_v19, %v716_v20 }
 0x46f   : > { %v2210_v21 = vpop.f32.mrf.mxu0 }
 0x470   : > { %v723_v26 = vmax.f32 %v717_v22, 0.0  ;;  %v2426_v22 = vld [vmem:[%s2939_s5 + $0x48] sm:$0xff]  }
 0x471   : > { %v719_v23 = vpop.f32.mrf.mxu0 }
 0x472   : > { %v720_v24 = vadd.f32 %v1868_v19, %v719_v23  ;;  %v2427_v23 = vld [vmem:[%s2939_s5 + $0x40] sm:$0xff]  }
 0x473   : > { %v2211_v25 = vpop.f32.mrf.mxu0 }
 0x474   : > { %v724_v27 = vmax.f32 %v720_v24, 0.0  ;;  %v1959_v25 = vld [vmem:[%s2942_s8 + $0x3] ss:$0 sm:$0xff] }
 0x476   : > { %v725_v28 = vpack.c.bf16 %v724_v27, %v723_v26 }
 0x478   : > { %2229 = vmatmul.mubr.bf16.vlgmr.msra.gmra.mxu0 %v725_v28 }
 0x479   : > { %2264 = vmatprep.mubr.msk.bf16.mxu0 %vm2469_vm0, %v2468_v1  ;;  %2261 = vmatpush3.bf16.msra.mxu0 %v2416_v57 }
 0x47a   : > { %2262 = vmatprep.subr.bf16.mxu0 %v2468_v1 }
 0x47d   : > { %2263 = vmatpush3.bf16.msra.mxu0 %v2417_v58 }
 0x47e   : > { %2268 = vmatprep.subr.bf16.mxu0 %v2468_v1 }
 0x538   : > { %v833_v31 = vpop.f32.mrf.mxu0 }
 0x539   : > { %v834_v35 = vadd.f32 %v1889_v32, %v833_v31  ;;  %v2428_v31 = vld [vmem:[%s2941_s7 + $0x138] sm:$0xff]  }
 0x53a   : > { %v2230_v33 = vpop.f32.mrf.mxu0 }
 0x53b   : > { %v2429_v33 = vld [vmem:[%s2941_s7 + $0x130] sm:$0xff]  }
 0x53c   : > { %v836_v34 = vpop.f32.mrf.mxu0 }
 0x53d   : > { %v837_v36 = vadd.f32 %v1889_v32, %v836_v34  ;;  %v2430_v34 = vld [vmem:[%s2941_s7 + $0x128] sm:$0xff]  }
 0x53e   : > { %v2231_v37 = vpop.f32.mrf.mxu0 }
 0x53f   : > { %v840_v39 = vpack.c.bf16 %v837_v36, %v834_v35  ;;  %v2431_v35 = vld [vmem:[%s2941_s7 + $0x120] sm:$0xff]   ;;  %v2432_v36 = vld [vmem:[%s2941_s7 + $0x118] sm:$0xff]   ;;  %v2433_v37 = vld [vmem:[%s2941_s7 + $0x110] sm:$0xff]  }
 0x541   : > { %2237 = vmatmul.mubr.msk.bf16.vlgmr.msra.gmra.mxu1 %vm426_vm2, %v840_v39  ;;  %v2435_v39 = vld [vmem:[%s2941_s7 + $0x100] sm:$0xff]  }
 0x542   : > { %2241 = vmatpush3.bf16.msra.mxu1 %v2408_v38  ;;  %2256 = vmatprep.mubr.msk.bf16.mxu1 %vm2469_vm0, %v2468_v1  ;;  %v2434_v38 = vld [vmem:[%s2941_s7 + $0x108] sm:$0xff]  }
 0x543   : > { %2242 = vmatprep.subr.bf16.mxu1 %v2468_v1 }
 0x546   : > { %2243 = vmatpush3.bf16.msra.mxu1 %v2409_v40  ;;  %v1973_v40 = vld [vmem:[%s2940_s6 + $0x4] ss:$0 sm:$0xff] }
 0x547   : > { %2244 = vmatprep.subr.bf16.mxu1 %v2468_v1 }
 0x54a   : > { %2245 = vmatpush3.bf16.msra.mxu1 %v2410_v41 }
 0x54b   : > { %2246 = vmatprep.subr.bf16.mxu1 %v2468_v1 }
 0x54e   : > { %2247 = vmatpush3.bf16.msra.mxu1 %v2411_v42 }
 0x54f   : > { %2248 = vmatprep.subr.bf16.mxu1 %v2468_v1 }
 0x552   : > { %2249 = vmatpush3.bf16.msra.mxu1 %v2412_v43 }
 0x553   : > { %2250 = vmatprep.subr.bf16.mxu1 %v2468_v1 }
 0x556   : > { %2251 = vmatpush3.bf16.msra.mxu1 %v2413_v44 }
 0x557   : > { %2252 = vmatprep.subr.bf16.mxu1 %v2468_v1 }
 0x55a   : > { %2253 = vmatpush3.bf16.msra.mxu1 %v2414_v45 }
 0x55b   : > { %2254 = vmatprep.subr.bf16.mxu1 %v2468_v1 }
 0x55e   : > { %2255 = vmatpush3.bf16.msra.mxu1 %v2415_v46 }
 0x55f   : > { %2288 = vmatprep.subr.bf16.mxu1 %v2468_v1 }
 0x601   : > { %v903_v48 = vpop.f32.mrf.mxu1 }
 0x602   : > { %v904_v50 = vadd.f32 %v1903_v47, %v903_v48 }
 0x603   : > { %v2238_v49 = vpop.f32.mrf.mxu1 }
 0x604   : > { %v910_v54 = vmax.f32 %v904_v50, 0.0  ;;  %v2436_v50 = vld [vmem:[%s2939_s5 + $0x58] sm:$0xff]  }
 0x605   : > { %v906_v51 = vpop.f32.mrf.mxu1 }
 0x606   : > { %v907_v52 = vadd.f32 %v1903_v47, %v906_v51  ;;  %v2437_v51 = vld [vmem:[%s2939_s5 + $0x50] sm:$0xff]  }
 0x607   : > { %v2239_v53 = vpop.f32.mrf.mxu1 }
 0x608   : > { %v911_v55 = vmax.f32 %v907_v52, 0.0  ;;  %v1994_v53 = vld [vmem:[%s2942_s8 + $0x4] ss:$0 sm:$0xff] }
 0x60a   : > { %v912_v56 = vpack.c.bf16 %v911_v55, %v910_v54 }
 0x60c   : > { %2257 = vmatmul.mubr.bf16.vlgmr.msra.gmra.mxu1 %v912_v56 }
 0x60d   : > { %2292 = vmatprep.mubr.msk.bf16.mxu1 %vm2469_vm0, %v2468_v1  ;;  %2289 = vmatpush3.bf16.msra.mxu1 %v2426_v22 }
 0x60e   : > { %2290 = vmatprep.subr.bf16.mxu1 %v2468_v1 }
 0x611   : > { %2291 = vmatpush3.bf16.msra.mxu1 %v2427_v23 }
 0x612   : > { %2296 = vmatprep.subr.bf16.mxu1 %v2468_v1 }
 0x6cc   : > { %v1020_v59 = vpop.f32.mrf.mxu1 }
 0x6cd   : > { %v1021_v63 = vadd.f32 %v1924_v60, %v1020_v59  ;;  %v2438_v59 = vld [vmem:[%s2941_s7 + $0x178] sm:$0xff]  }
 0x6ce   : > { %v2258_v61 = vpop.f32.mrf.mxu1 }
 0x6cf   : > { %v2439_v61 = vld [vmem:[%s2941_s7 + $0x170] sm:$0xff]  }
 0x6d0   : > { %v1023_v62 = vpop.f32.mrf.mxu1 }
 0x6d1   : > { %v1024_v0 = vadd.f32 %v1924_v60, %v1023_v62  ;;  %v2440_v62 = vld [vmem:[%s2941_s7 + $0x168] sm:$0xff]  }
 0x6d2   : > { %v2259_v2 = vpop.f32.mrf.mxu1 }
 0x6d3   : > { %v1027_v4 = vpack.c.bf16 %v1024_v0, %v1021_v63  ;;  %v2441_v63 = vld [vmem:[%s2941_s7 + $0x160] sm:$0xff]   ;;  %v2442_v0 = vld [vmem:[%s2941_s7 + $0x158] sm:$0xff]   ;;  %v2443_v2 = vld [vmem:[%s2941_s7 + $0x150] sm:$0xff]  }
 0x6d5   : > { %2265 = vmatmul.mubr.msk.bf16.vlgmr.msra.gmra.mxu0 %vm426_vm2, %v1027_v4  ;;  %v2445_v4 = vld [vmem:[%s2941_s7 + $0x140] sm:$0xff]  }
 0x6d6   : > { %2269 = vmatpush3.bf16.msra.mxu0 %v2418_v3  ;;  %2284 = vmatprep.mubr.msk.bf16.mxu0 %vm2469_vm0, %v2468_v1  ;;  %v2444_v3 = vld [vmem:[%s2941_s7 + $0x148] sm:$0xff]  }
 0x6d7   : > { %2270 = vmatprep.subr.bf16.mxu0 %v2468_v1 }
 0x6da   : > { %2271 = vmatpush3.bf16.msra.mxu0 %v2419_v5  ;;  %v2008_v5 = vld [vmem:[%s2940_s6 + $0x5] ss:$0 sm:$0xff] }
 0x6db   : > { %2272 = vmatprep.subr.bf16.mxu0 %v2468_v1 }
 0x6de   : > { %2273 = vmatpush3.bf16.msra.mxu0 %v2420_v6 }
 0x6df   : > { %2274 = vmatprep.subr.bf16.mxu0 %v2468_v1 }
 0x6e2   : > { %2275 = vmatpush3.bf16.msra.mxu0 %v2421_v7 }
 0x6e3   : > { %2276 = vmatprep.subr.bf16.mxu0 %v2468_v1 }
 0x6e6   : > { %2277 = vmatpush3.bf16.msra.mxu0 %v2422_v8 }
 0x6e7   : > { %2278 = vmatprep.subr.bf16.mxu0 %v2468_v1 }
 0x6ea   : > { %2279 = vmatpush3.bf16.msra.mxu0 %v2423_v9 }
 0x6eb   : > { %2280 = vmatprep.subr.bf16.mxu0 %v2468_v1 }
 0x6ee   : > { %2281 = vmatpush3.bf16.msra.mxu0 %v2424_v10 }
 0x6ef   : > { %2282 = vmatprep.subr.bf16.mxu0 %v2468_v1 }
 0x6f2   : > { %2283 = vmatpush3.bf16.msra.mxu0 %v2425_v11 }
 0x6f3   : > { %2316 = vmatprep.subr.bf16.mxu0 %v2468_v1 }
 0x795   : > { %v1090_v13 = vpop.f32.mrf.mxu0 }
 0x796   : > { %v1091_v15 = vadd.f32 %v1938_v12, %v1090_v13 }
 0x797   : > { %v2266_v14 = vpop.f32.mrf.mxu0 }
 0x798   : > { %v1097_v19 = vmax.f32 %v1091_v15, 0.0  ;;  %v2446_v15 = vld [vmem:[%s2939_s5 + $0x68] sm:$0xff]  }
 0x799   : > { %v1093_v16 = vpop.f32.mrf.mxu0 }
 0x79a   : > { %v1094_v17 = vadd.f32 %v1938_v12, %v1093_v16  ;;  %v2447_v16 = vld [vmem:[%s2939_s5 + $0x60] sm:$0xff]  }
 0x79b   : > { %v2267_v18 = vpop.f32.mrf.mxu0 }
 0x79c   : > { %v1098_v20 = vmax.f32 %v1094_v17, 0.0  ;;  %v2029_v18 = vld [vmem:[%s2942_s8 + $0x5] ss:$0 sm:$0xff] }
 0x79e   : > { %v1099_v21 = vpack.c.bf16 %v1098_v20, %v1097_v19 }
 0x7a0   : > { %2285 = vmatmul.mubr.bf16.vlgmr.msra.gmra.mxu0 %v1099_v21 }
 0x7a1   : > { %2320 = vmatprep.mubr.msk.bf16.mxu0 %vm2469_vm0, %v2468_v1  ;;  %2317 = vmatpush3.bf16.msra.mxu0 %v2436_v50 }
 0x7a2   : > { %2318 = vmatprep.subr.bf16.mxu0 %v2468_v1 }
 0x7a5   : > { %2319 = vmatpush3.bf16.msra.mxu0 %v2437_v51 }
 0x7a6   : > { %2324 = vmatprep.subr.bf16.mxu0 %v2468_v1 }
 0x860   : > { %v1207_v24 = vpop.f32.mrf.mxu0 }
 0x861   : > { %v1208_v28 = vadd.f32 %v1959_v25, %v1207_v24  ;;  %v2448_v24 = vld [vmem:[%s2941_s7 + $0x1b8] sm:$0xff]  }
 0x862   : > { %v2286_v26 = vpop.f32.mrf.mxu0 }
 0x863   : > { %v2449_v26 = vld [vmem:[%s2941_s7 + $0x1b0] sm:$0xff]  }
 0x864   : > { %v1210_v27 = vpop.f32.mrf.mxu0 }
 0x865   : > { %v1211_v29 = vadd.f32 %v1959_v25, %v1210_v27  ;;  %v2450_v27 = vld [vmem:[%s2941_s7 + $0x1a8] sm:$0xff]  }
 0x866   : > { %v2287_v30 = vpop.f32.mrf.mxu0 }
 0x867   : > { %v1214_v32 = vpack.c.bf16 %v1211_v29, %v1208_v28  ;;  %v2451_v28 = vld [vmem:[%s2941_s7 + $0x1a0] sm:$0xff]   ;;  %v2452_v29 = vld [vmem:[%s2941_s7 + $0x198] sm:$0xff]   ;;  %v2453_v30 = vld [vmem:[%s2941_s7 + $0x190] sm:$0xff]  }
 0x869   : > { %2293 = vmatmul.mubr.msk.bf16.vlgmr.msra.gmra.mxu1 %vm426_vm2, %v1214_v32  ;;  %v2455_v32 = vld [vmem:[%s2941_s7 + $0x180] sm:$0xff]  }
 0x86a   : > { %2297 = vmatpush3.bf16.msra.mxu1 %v2428_v31  ;;  %2312 = vmatprep.mubr.msk.bf16.mxu1 %vm2469_vm0, %v2468_v1  ;;  %v2454_v31 = vld [vmem:[%s2941_s7 + $0x188] sm:$0xff]  }
 0x86b   : > { %2298 = vmatprep.subr.bf16.mxu1 %v2468_v1 }
 0x86e   : > { %2299 = vmatpush3.bf16.msra.mxu1 %v2429_v33  ;;  %v2043_v33 = vld [vmem:[%s2940_s6 + $0x6] ss:$0 sm:$0xff] }
 0x86f   : > { %2300 = vmatprep.subr.bf16.mxu1 %v2468_v1 }
 0x872   : > { %2301 = vmatpush3.bf16.msra.mxu1 %v2430_v34 }
 0x873   : > { %2302 = vmatprep.subr.bf16.mxu1 %v2468_v1 }
 0x876   : > { %2303 = vmatpush3.bf16.msra.mxu1 %v2431_v35 }
 0x877   : > { %2304 = vmatprep.subr.bf16.mxu1 %v2468_v1 }
 0x87a   : > { %2305 = vmatpush3.bf16.msra.mxu1 %v2432_v36 }
 0x87b   : > { %2306 = vmatprep.subr.bf16.mxu1 %v2468_v1 }
 0x87e   : > { %2307 = vmatpush3.bf16.msra.mxu1 %v2433_v37 }
 0x87f   : > { %2308 = vmatprep.subr.bf16.mxu1 %v2468_v1 }
 0x882   : > { %2309 = vmatpush3.bf16.msra.mxu1 %v2434_v38 }
 0x883   : > { %2310 = vmatprep.subr.bf16.mxu1 %v2468_v1 }
 0x886   : > { %2311 = vmatpush3.bf16.msra.mxu1 %v2435_v39 }
 0x887   : > { %2344 = vmatprep.subr.bf16.mxu1 %v2468_v1 }
 0x929   : > { %v1277_v41 = vpop.f32.mrf.mxu1 }
 0x92a   : > { %v1278_v43 = vadd.f32 %v1973_v40, %v1277_v41 }
 0x92b   : > { %v2294_v42 = vpop.f32.mrf.mxu1 }
 0x92c   : > { %v1284_v47 = vmax.f32 %v1278_v43, 0.0 }
 0x92d   : > { %v1280_v44 = vpop.f32.mrf.mxu1 }
 0x92e   : > { %v1281_v45 = vadd.f32 %v1973_v40, %v1280_v44 }
 0x92f   : > { %v2295_v46 = vpop.f32.mrf.mxu1 }
 0x930   : > { %v1285_v48 = vmax.f32 %v1281_v45, 0.0 }
 0x932   : > { %v1286_v49 = vpack.c.bf16 %v1285_v48, %v1284_v47 }
 0x934   : > { %2313 = vmatmul.mubr.bf16.vlgmr.msra.gmra.mxu1 %v1286_v49 }
 0x935   : > { %2348 = vmatprep.mubr.msk.bf16.mxu1 %vm2469_vm0, %v2468_v1  ;;  %2345 = vmatpush3.bf16.msra.mxu1 %v2446_v15 }
 0x936   : > { %2346 = vmatprep.subr.bf16.mxu1 %v2468_v1 }
 0x939   : > { %2347 = vmatpush3.bf16.msra.mxu1 %v2447_v16 }
 0x93a   : > { %2352 = vmatprep.subr.bf16.mxu1 %v2468_v1 }
 0x9f4   : > { %v1394_v52 = vpop.f32.mrf.mxu1 }
 0x9f5   : > { %v1395_v56 = vadd.f32 %v1994_v53, %v1394_v52 }
 0x9f6   : > { %v2314_v54 = vpop.f32.mrf.mxu1 }
 0x9f8   : > { %v1397_v55 = vpop.f32.mrf.mxu1 }
 0x9f9   : > { %v1398_v57 = vadd.f32 %v1994_v53, %v1397_v55 }
 0x9fa   : > { %v2315_v58 = vpop.f32.mrf.mxu1 }
 0x9fb   : > { %v1401_v60 = vpack.c.bf16 %v1398_v57, %v1395_v56 }
 0x9fd   : > { %2321 = vmatmul.mubr.msk.bf16.vlgmr.msra.gmra.mxu0 %vm426_vm2, %v1401_v60 }
 0x9fe   : > { %2325 = vmatpush3.bf16.msra.mxu0 %v2438_v59  ;;  %2340 = vmatprep.mubr.msk.bf16.mxu0 %vm2469_vm0, %v2468_v1 }
 0x9ff   : > { %2326 = vmatprep.subr.bf16.mxu0 %v2468_v1 }
 0xa02   : > { %2327 = vmatpush3.bf16.msra.mxu0 %v2439_v61 }
 0xa03   : > { %2328 = vmatprep.subr.bf16.mxu0 %v2468_v1 }
 0xa06   : > { %2329 = vmatpush3.bf16.msra.mxu0 %v2440_v62 }
 0xa07   : > { %2330 = vmatprep.subr.bf16.mxu0 %v2468_v1 }
 0xa0a   : > { %2331 = vmatpush3.bf16.msra.mxu0 %v2441_v63 }
 0xa0b   : > { %2332 = vmatprep.subr.bf16.mxu0 %v2468_v1 }
 0xa0e   : > { %2333 = vmatpush3.bf16.msra.mxu0 %v2442_v0 }
 0xa0f   : > { %2334 = vmatprep.subr.bf16.mxu0 %v2468_v1 }
 0xa12   : > { %2335 = vmatpush3.bf16.msra.mxu0 %v2443_v2 }
 0xa13   : > { %2336 = vmatprep.subr.bf16.mxu0 %v2468_v1 }
 0xa16   : > { %2337 = vmatpush3.bf16.msra.mxu0 %v2444_v3 }
 0xa17   : > { %2338 = vmatprep.subr.bf16.mxu0 %v2468_v1 }
 0xa1a   : > { %2339 = vmatpush3.bf16.msra.mxu0 %v2445_v4 }
 0xabd   : > { %v1464_v6 = vpop.f32.mrf.mxu0 }
 0xabe   : > { %v1465_v8 = vadd.f32 %v2008_v5, %v1464_v6 }
 0xabf   : > { %v2322_v7 = vpop.f32.mrf.mxu0 }
 0xac0   : > { %v1471_v12 = vmax.f32 %v1465_v8, 0.0 }
 0xac1   : > { %v1467_v9 = vpop.f32.mrf.mxu0 }
 0xac2   : > { %v1468_v10 = vadd.f32 %v2008_v5, %v1467_v9 }
 0xac3   : > { %v2323_v11 = vpop.f32.mrf.mxu0 }
 0xac4   : > { %v1472_v13 = vmax.f32 %v1468_v10, 0.0 }
 0xac6   : > { %v1473_v14 = vpack.c.bf16 %v1472_v13, %v1471_v12 }
 0xac8   : > { %2341 = vmatmul.mubr.bf16.vlgmr.msra.gmra.mxu0 %v1473_v14 }
 0xb88   : > { %v1581_v17 = vpop.f32.mrf.mxu0 }
 0xb89   : > { %v1582_v21 = vadd.f32 %v2029_v18, %v1581_v17 }
 0xb8a   : > { %v2342_v19 = vpop.f32.mrf.mxu0 }
 0xb8c   : > { %v1584_v20 = vpop.f32.mrf.mxu0 }
 0xb8d   : > { %v1585_v22 = vadd.f32 %v2029_v18, %v1584_v20 }
 0xb8e   : > { %v2343_v23 = vpop.f32.mrf.mxu0 }
 0xb8f   : > { %v1588_v25 = vpack.c.bf16 %v1585_v22, %v1582_v21 }
 0xb91   : > { %2349 = vmatmul.mubr.msk.bf16.vlgmr.msra.gmra.mxu1 %vm426_vm2, %v1588_v25 }
 0xb92   : > { %2353 = vmatpush3.bf16.msra.mxu1 %v2448_v24  ;;  %2368 = vmatprep.mubr.msk.bf16.mxu1 %vm2469_vm0, %v2468_v1 }
 0xb93   : > { %2354 = vmatprep.subr.bf16.mxu1 %v2468_v1 }
 0xb96   : > { %2355 = vmatpush3.bf16.msra.mxu1 %v2449_v26 }
 0xb97   : > { %2356 = vmatprep.subr.bf16.mxu1 %v2468_v1 }
 0xb9a   : > { %2357 = vmatpush3.bf16.msra.mxu1 %v2450_v27 }
 0xb9b   : > { %2358 = vmatprep.subr.bf16.mxu1 %v2468_v1 }
 0xb9e   : > { %2359 = vmatpush3.bf16.msra.mxu1 %v2451_v28 }
 0xb9f   : > { %2360 = vmatprep.subr.bf16.mxu1 %v2468_v1 }
 0xba2   : > { %2361 = vmatpush3.bf16.msra.mxu1 %v2452_v29 }
 0xba3   : > { %2362 = vmatprep.subr.bf16.mxu1 %v2468_v1 }
 0xba6   : > { %2363 = vmatpush3.bf16.msra.mxu1 %v2453_v30 }
 0xba7   : > { %2364 = vmatprep.subr.bf16.mxu1 %v2468_v1 }
 0xbaa   : > { %2365 = vmatpush3.bf16.msra.mxu1 %v2454_v31 }
 0xbab   : > { %2366 = vmatprep.subr.bf16.mxu1 %v2468_v1  ;;  %v2064_v1 = vld [vmem:[%s2942_s8 + $0x6] ss:$0 sm:$0xff] }
 0xbae   : > { %2367 = vmatpush3.bf16.msra.mxu1 %v2455_v32 }
 0xc51   : > { %v1651_v34 = vpop.f32.mrf.mxu1 }
 0xc52   : > { %v1652_v36 = vadd.f32 %v2043_v33, %v1651_v34 }
 0xc53   : > { %v2350_v35 = vpop.f32.mrf.mxu1 }
 0xc54   : > { %v1658_v40 = vmax.f32 %v1652_v36, 0.0 }
 0xc55   : > { %v1654_v37 = vpop.f32.mrf.mxu1 }
 0xc56   : > { %v1655_v38 = vadd.f32 %v2043_v33, %v1654_v37 }
 0xc57   : > { %v2351_v39 = vpop.f32.mrf.mxu1 }
 0xc58   : > { %v1659_v41 = vmax.f32 %v1655_v38, 0.0 }
 0xc5a   : > { %v1660_v42 = vpack.c.bf16 %v1659_v41, %v1658_v40 }
 0xc5c   : > { %2369 = vmatmul.mubr.bf16.vlgmr.msra.gmra.mxu1 %v1660_v42 }
 0xd1c   : > { %v1768_v43 = vpop.f32.mrf.mxu1 }
 0xd1d   : > { %v1769_v44 = vadd.f32 %v2064_v1, %v1768_v43 }
 0xd1e   : > { %v2370_v45 = vpop.f32.mrf.mxu1 }
 0xd1f   : > { %1775 = vst.msk [vmem:[%s334_s20] sm:$0xff] %vm426_vm2, %v1769_v44 }
 0xd20   : > { %v1771_v46 = vpop.f32.mrf.mxu1 }
 0xd21   : > { %v1772_v47 = vadd.f32 %v2064_v1, %v1771_v46 }
 0xd22   : > { %v2371_v48 = vpop.f32.mrf.mxu1 }
 0xd23   : > { %1776 = vst.msk [vmem:[%s334_s20 + $0x8] sm:$0xff] %vm426_vm2, %v1772_v47 }
 0xd24 PF: > { %s19_s30 = sadd.s32 1, %s2466_s30  }
 0xd25   : > { %p16_p4 = scmp.ge.s32.totalorder %s19_s30, 4  }
 0xd27   :  { %18 = sbr.rel (!%p16_p4) target bundleno = 1 (0x1), region = 110 }

// kernel: swin_forward.7
= control target key start
LH: loop header
LB: loop body
LE: loop exit
PB: predicated region body
PF: predicated region fallthrough
CT: control target
= control target key end

     0   :  { %s514_s15 = smov 0   ;;  %s555_s0 = inlined_call_operand.vmem [shape: f32[2,16,32], index: 0, kind: input, shape index: {}]   ;;  %s556_s1 = inlined_call_operand.vmem [shape: bf16[32,8], index: 1, kind: input, shape index: {}]   ;;  %s557_s2 = inlined_call_operand.vmem [shape: f32[1,8], index: 2, kind: input, shape index: {}]   ;;  %s558_s3 = inlined_call_operand.vmem [shape: f32[16,256], index: 3, kind: input, shape index: {}]   ;;  %s559_s4 = inlined_call_operand.vmem [shape: f32[2,8,256], index: 4, kind: output, shape index: {}]  }
   0x1 LB: > { %s438_s16 = sadd.s32 4294967295, %s485_s15   ;;  %p442_p0 = scmp.ge.s32.totalorder %s485_s15, 1  ;;  %s485_s15 = sphi %s514_s15, %s14_s15  }
   0x2   : > { %p162_p1 = scmp.lt.s32.totalorder %s485_s15, 3 }
   0x4   : > { %p163_p2 = pnand %p442_p0, %p162_p1 }
   0x5   : > { %p188_p3 = scmp.lt.s32.totalorder (!%p163_p2), %s438_s16, 1 }
   0x6   : > { %166 = sbr.rel (%p163_p2) target bundleno = 536 (0x218), region = 36 }
   0xb   : > { %v477_v0 = vld [vmem:[%s556_s1 + $0x8] sm:$0xff]   ;;  %v487_v1 = vmov 0.0   ;;  %v478_v2 = vld [vmem:[%s556_s1] sm:$0xff]   ;;  %vm488_vm0 = vmmov 0   ;;  %s561_s16 = smov (!%p188_p3, %s438_s16), 1  ;;  %vm225_vm1 = vcmask 261120  }
   0xc   : > { %459 = vmatprep.subr.bf16.mxu0 %v487_v1  ;;  %374 = vmatprep.mubr.f32.mxu1 %v487_v1  ;;  %s454_s21 = sshll.u32 %s561_s16, 4  ;;  %v273_v6 = vld [vmem:[%s558_s3 + $0x18] sm:$0xff]  ;;  %v272_v7 = vld [vmem:[%s558_s3 + $0x10] sm:$0xff]  ;;  %v271_v8 = vld [vmem:[%s558_s3 + $0x8] sm:$0xff]  ;;  %vm306_vm2 = vcmask 130048  }
   0xd   : > { %460 = vmatpush3.bf16.msra.mxu0 %v477_v0  ;;  %463 = vmatprep.mubr.msk.bf16.mxu0 %vm488_vm0, %v487_v1  ;;  %s192_s24 = scalar_lea.vmem %s555_s0, %s454_s21  ;;  %v270_v9 = vld [vmem:[%s558_s3] sm:$0xff]  ;;  %s197_s11 = scalar_lea.vmem %s559_s4, %s454_s21 }
   0xe   : > { %461 = vmatprep.subr.bf16.mxu0 %v487_v1  ;;  %v199_v3 = vld [vmem:[%s192_s24] sm:$0xff]  ;;  %v200_v4 = vld [vmem:[%s192_s24 + $0x8] sm:$0xff]  ;;  %338 = vmatprep.subr.mxu1 %v273_v6 }
   0xf   : > { %v201_v5 = vpack.c.bf16 %v200_v4, %v199_v3  ;;  %339 = vmatpush1.msra.mxu1 %v272_v7  ;;  %v447_v10 = vld [vmem:[%s557_s2] ss:$0 sm:$0xff] }
  0x10   : > { %340 = vmatprep.subr.mxu1 %v271_v8 }
  0x11   : > { %462 = vmatpush3.bf16.msra.mxu0 %v478_v2  ;;  %341 = vmatpush1.msra.mxu1 %v270_v9 }
  0x14   : > { %464 = vmatmul.mubr.msk.bf16.vlgmr.msra.gmra.mxu0 %vm225_vm1, %v201_v5 }
  0xd4   : > { %v263_v11 = vpop.f32.mrf.mxu0 }
  0xd5   : > { %v264_v12 = vadd.f32 %v447_v10, %v263_v11 }
  0xd6   : > { %v465_v13 = vpop.f32.mrf.mxu0 }
  0xd7   : > { %274 = vxpose.xlu0.b32.start [1/2] (short) (narrow) %v264_v12, 8 }
  0xd8   : > { %v266_v14 = vpop.f32.mrf.mxu0 }
  0xd9   : > { %v267_v15 = vadd.f32 %v447_v10, %v266_v14 }
  0xda   : > { %v466_v16 = vpop.f32.mrf.mxu0 }
  0xdb   : > { %275 = vxpose.xlu0.b32.end [2/2] (short) (narrow) %v267_v15, 8 }
 0x153   : > { %v290_v17 = vpop.trf.xlu0 }
 0x154   : > { %451 = vmatmul.mubr.msk.f32.vlgmr.msra.gmra.mxu1 %vm306_vm2, %v290_v17 }
 0x214   : > { %v376_v18 = vpop.f32.mrf.mxu1 }
 0x215   : > { %381 = vst [vmem:[%s197_s11] sm:$0xff] %v376_v18 }
 0x216   : > { %v378_v19 = vpop.f32.mrf.mxu1 }
 0x217   : > { %382 = vst [vmem:[%s197_s11 + $0x8] sm:$0xff] %v378_v19 }
 0x218 PF: > { %s14_s15 = sadd.s32 1, %s485_s15  }
 0x219   : > { %p11_p4 = scmp.ge.s32.totalorder %s14_s15, 4  }
 0x21b   :  { %13 = sbr.rel (!%p11_p4) target bundleno = 1 (0x1), region = 66 }

// kernel: swin_forward.6
= control target key start
LH: loop header
LB: loop body
LE: loop exit
PB: predicated region body
PF: predicated region fallthrough
CT: control target
= control target key end

     0   :  { %s2872_s24 = smov 0   ;;  %s3390_s0 = inlined_call_operand.vmem [shape: f32[32,32], index: 0, kind: input, shape index: {}]   ;;  %s3391_s1 = inlined_call_operand.vmem [shape: bf16[8,32,128], index: 1, kind: input, shape index: {}]   ;;  %s3392_s2 = inlined_call_operand.vmem [shape: f32[8,1,128], index: 2, kind: input, shape index: {}]   ;;  %s3393_s3 = inlined_call_operand.vmem [shape: bf16[8,128,32], index: 3, kind: input, shape index: {}]   ;;  %s3394_s4 = inlined_call_operand.vmem [shape: f32[8,1,32], index: 4, kind: input, shape index: {}]   ;;  %s3395_s5 = inlined_call_operand.vmem [shape: f32[1,32], index: 5, kind: input, shape index: {}]   ;;  %s3396_s6 = inlined_call_operand.vmem [shape: f32[1,32], index: 6, kind: input, shape index: {}]   ;;  %s3397_s7 = inlined_call_operand.vmem [shape: f32[32,32], index: 7, kind: output, shape index: {}]  }
   0x1 LB: > { %s2107_s25 = sadd.s32 4294967295, %s2828_s24   ;;  %p2111_p0 = scmp.ge.s32.totalorder %s2828_s24, 1  ;;  %s2828_s24 = sphi %s2872_s24, %s17_s24  }
   0x2   : > { %p238_p1 = scmp.lt.s32.totalorder %s2828_s24, 3 }
   0x4   : > { %p239_p2 = pnand %p2111_p0, %p238_p1 }
   0x5   : > { %s2112_s30 = sshll.u32 (!%p239_p2), %s2107_s25, 1 }
   0x6   : > { %242 = sbr.rel (%p239_p2) target bundleno = 5731 (0x1663), region = 48  ;;  %p271_p3 = scmp.lt.s32.totalorder (!%p239_p2), %s2112_s30, 3 }
   0xb   : > { %v2708_v0 = vld [vmem:[%s3391_s1 + $0x8] sm:$0xff]   ;;  %v2830_v1 = vmov 0.0   ;;  %v2709_v2 = vld [vmem:[%s3391_s1] sm:$0xff]   ;;  %vm2831_vm0 = vmmov 0   ;;  %s3399_s30 = smov (!%p271_p3, %s2112_s30), 3  ;;  %v2710_v3 = vld [vmem:[%s3393_s3 + $0x38] sm:$0xff]  }
   0xc   : > { %2474 = vmatprep.subr.bf16.mxu1 %v2830_v1  ;;  %2502 = vmatprep.subr.bf16.mxu0 %v2830_v1  ;;  %s2113_s8 = sshll.u32 %s3399_s30, 3  ;;  %vm311_vm1 = vcmask 261120   ;;  %v2711_v7 = vld [vmem:[%s3393_s3 + $0x30] sm:$0xff]   ;;  %v2712_v8 = vld [vmem:[%s3393_s3 + $0x28] sm:$0xff]   ;;  %v2713_v9 = vld [vmem:[%s3393_s3 + $0x20] sm:$0xff]  }
   0xd   : > { %2475 = vmatpush3.bf16.msra.mxu1 %v2708_v0  ;;  %2478 = vmatprep.mubr.msk.bf16.mxu1 %vm2831_vm0, %v2830_v1  ;;  %s274_s13 = scalar_lea.vmem %s3390_s0, %s2113_s8  ;;  %v2714_v10 = vld [vmem:[%s3393_s3 + $0x18] sm:$0xff]   ;;  %v2715_v11 = vld [vmem:[%s3393_s3 + $0x10] sm:$0xff]   ;;  %v2716_v12 = vld [vmem:[%s3393_s3 + $0x8] sm:$0xff]   ;;  %s280_s10 = scalar_lea.vmem %s3397_s7, %s2113_s8 }
   0xe   : > { %2476 = vmatprep.subr.bf16.mxu1 %v2830_v1  ;;  %2506 = vmatprep.mubr.msk.bf16.mxu0 %vm2831_vm0, %v2830_v1  ;;  %v283_v4 = vld [vmem:[%s274_s13] sm:$0xff]  ;;  %v284_v5 = vld [vmem:[%s274_s13 + $0x8] sm:$0xff]  ;;  %v2718_v45 = vld [vmem:[%s3391_s1 + $0x18] sm:$0xff]  }
   0xf   : > { %v287_v6 = vpack.c.bf16 %v284_v5, %v283_v4  ;;  %v2717_v13 = vld [vmem:[%s3393_s3] sm:$0xff]   ;;  %2503 = vmatpush3.bf16.msra.mxu0 %v2718_v45  ;;  %v2719_v46 = vld [vmem:[%s3391_s1 + $0x10] sm:$0xff]   ;;  %v2720_v63 = vld [vmem:[%s3393_s3 + $0x78] sm:$0xff]  }
  0x10   : > { %v2116_v14 = vld [vmem:[%s3392_s2] ss:$0 sm:$0xff]  ;;  %2504 = vmatprep.subr.bf16.mxu0 %v2830_v1 }
  0x11   : > { %2477 = vmatpush3.bf16.msra.mxu1 %v2709_v2  ;;  %v2120_v24 = vld [vmem:[%s3394_s4] ss:$0 sm:$0xff]  ;;  %v2721_v2 = vld [vmem:[%s3393_s3 + $0x70] sm:$0xff]  }
  0x12   : > { %2482 = vmatprep.subr.bf16.mxu1 %v2830_v1  ;;  %v2960_v55 = vld [vmem:[%s3395_s5] ss:$0 sm:$0xff] }
  0x13   : > { %2505 = vmatpush3.bf16.msra.mxu0 %v2719_v46  ;;  %v2966_v59 = vld [vmem:[%s3396_s6] ss:$0 sm:$0xff] }
  0x14   : > { %2479 = vmatmul.mubr.msk.bf16.vlgmr.msra.gmra.mxu1 %vm311_vm1, %v287_v6  ;;  %2510 = vmatprep.subr.bf16.mxu0 %v2830_v1  ;;  %v2725_v6 = vld [vmem:[%s3393_s3 + $0x50] sm:$0xff]  }
  0x15   : > { %2483 = vmatpush3.bf16.msra.mxu1 %v2710_v3  ;;  %2498 = vmatprep.mubr.msk.bf16.mxu1 %vm2831_vm0, %v2830_v1  ;;  %v2722_v3 = vld [vmem:[%s3393_s3 + $0x68] sm:$0xff]  }
  0x16   : > { %2484 = vmatprep.subr.bf16.mxu1 %v2830_v1 }
  0x19   : > { %2485 = vmatpush3.bf16.msra.mxu1 %v2711_v7  ;;  %v2726_v7 = vld [vmem:[%s3393_s3 + $0x48] sm:$0xff]  }
  0x1a   : > { %2486 = vmatprep.subr.bf16.mxu1 %v2830_v1 }
  0x1d   : > { %2487 = vmatpush3.bf16.msra.mxu1 %v2712_v8  ;;  %v2727_v8 = vld [vmem:[%s3393_s3 + $0x40] sm:$0xff]  }
  0x1e   : > { %2488 = vmatprep.subr.bf16.mxu1 %v2830_v1 }
  0x21   : > { %2489 = vmatpush3.bf16.msra.mxu1 %v2713_v9  ;;  %v2136_v9 = vld [vmem:[%s3392_s2 + $0x1] ss:$0 sm:$0xff] }
  0x22   : > { %2490 = vmatprep.subr.bf16.mxu1 %v2830_v1 }
  0x25   : > { %2491 = vmatpush3.bf16.msra.mxu1 %v2714_v10 }
  0x26   : > { %2492 = vmatprep.subr.bf16.mxu1 %v2830_v1 }
  0x29   : > { %2493 = vmatpush3.bf16.msra.mxu1 %v2715_v11 }
  0x2a   : > { %2494 = vmatprep.subr.bf16.mxu1 %v2830_v1 }
  0x2d   : > { %2495 = vmatpush3.bf16.msra.mxu1 %v2716_v12 }
  0x2e   : > { %2496 = vmatprep.subr.bf16.mxu1 %v2830_v1 }
  0x31   : > { %2497 = vmatpush3.bf16.msra.mxu1 %v2717_v13 }
  0x32   : > { %2530 = vmatprep.subr.bf16.mxu1 %v2830_v1 }
  0xd4   : > { %v349_v15 = vpop.f32.mrf.mxu1 }
  0xd5   : > { %v350_v17 = vadd.f32 %v2116_v14, %v349_v15 }
  0xd6   : > { %v2480_v16 = vpop.f32.mrf.mxu1 }
  0xd7   : > { %v356_v21 = vmax.f32 %v350_v17, 0.0 }
  0xd8   : > { %v352_v18 = vpop.f32.mrf.mxu1 }
  0xd9   : > { %v353_v19 = vadd.f32 %v2116_v14, %v352_v18 }
  0xda   : > { %v2481_v20 = vpop.f32.mrf.mxu1 }
  0xdb   : > { %v357_v22 = vmax.f32 %v353_v19, 0.0  ;;  %v2157_v19 = vld [vmem:[%s3394_s4 + $0x1] ss:$0 sm:$0xff] }
  0xdd   : > { %v358_v23 = vpack.c.bf16 %v357_v22, %v356_v21 }
  0xdf   : > { %2499 = vmatmul.mubr.bf16.vlgmr.msra.gmra.mxu1 %v358_v23 }
  0xe0   : > { %2534 = vmatprep.mubr.msk.bf16.mxu1 %vm2831_vm0, %v2830_v1 }
 0x19f   : > { %v464_v25 = vpop.f32.mrf.mxu1 }
 0x1a0   : > { %v465_v26 = vadd.f32 %v2120_v24, %v464_v25 }
 0x1a1   : > { %v2500_v27 = vpop.f32.mrf.mxu1 }
 0x1a2   : > { %v471_v28 = vadd.f32 %v465_v26, %v283_v4  ;;  %v2723_v4 = vld [vmem:[%s3393_s3 + $0x60] sm:$0xff]  }
 0x1a3   : > { %v467_v29 = vpop.f32.mrf.mxu1 }
 0x1a4   : > { %v468_v30 = vadd.f32 %v2120_v24, %v467_v29  ;;  %v473_v31 = vsel %vm311_vm1, %v471_v28, 0.0 }
 0x1a5   : > { %474 = vadd.xlane.f32.xlu0 %v473_v31  ;;  %v2501_v32 = vpop.f32.mrf.mxu1 }
 0x1a6   : > { %v472_v33 = vadd.f32 %v468_v30, %v284_v5  ;;  %v2724_v5 = vld [vmem:[%s3393_s3 + $0x58] sm:$0xff]  }
 0x1a8   : > { %v476_v34 = vsel %vm311_vm1, %v472_v33, 0.0 }
 0x1a9   : > { %477 = vadd.xlane.f32.xlu0 %v476_v34 }
 0x22e   : > { %v475_v35 = vpop.xlane.xlu0 %474 }
 0x22f   : > { %v480_v36 = vmul.f32 0.03125, %v475_v35 }
 0x231   : > { %v482_v37 = vsub.f32 %v471_v28, %v480_v36 }
 0x232   : > { %v478_v38 = vpop.xlane.xlu0 %477 }
 0x233   : > { %v481_v39 = vmul.f32 0.03125, %v478_v38  ;;  %v484_v40 = vmul.f32 %v482_v37, %v482_v37 }
 0x235   : > { %v483_v41 = vsub.f32 %v472_v33, %v481_v39  ;;  %v486_v42 = vsel %vm311_vm1, %v484_v40, 0.0  ;;  %v2728_v40 = vld [vmem:[%s3391_s1 + $0x28] sm:$0xff]  }
 0x236   : > { %487 = vadd.xlane.f32.xlu1 %v486_v42  ;;  %2531 = vmatpush3.bf16.msra.mxu1 %v2728_v40 }
 0x237   : > { %v485_v43 = vmul.f32 %v483_v41, %v483_v41  ;;  %2532 = vmatprep.subr.bf16.mxu1 %v2830_v1 }
 0x239   : > { %v489_v44 = vsel %vm311_vm1, %v485_v43, 0.0 }
 0x23a   : > { %490 = vadd.xlane.f32.xlu1 %v489_v44 }
 0x2bf   : > { %v488_v47 = vpop.xlane.xlu1 %487 }
 0x2c0   : > { %v492_v48 = vmul.f32 0.03125, %v488_v47 }
 0x2c2   : > { %v494_v49 = vadd.f32 1e-05, %v492_v48 }
 0x2c3   : > { %v491_v50 = vpop.xlane.xlu1 %490 }
 0x2c4   : > { %2788 = vrsqrt.f32 %v494_v49  ;;  %v493_v51 = vmul.f32 0.03125, %v491_v50 }
 0x2c6   : > { %v495_v52 = vadd.f32 1e-05, %v493_v51 }
 0x2c8   : > { %2790 = vrsqrt.f32 %v495_v52 }
 0x2d1   : > { %v2789_v53 = vpop.eup %2788 }
 0x2d2   : > { %v498_v54 = vmul.f32 %v2789_v53, %v482_v37 }
 0x2d4   : > { %v506_v58 = vmul.f32 %v2960_v55, %v498_v54 }
 0x2d5   : > { %v2791_v56 = vpop.eup %2790 }
 0x2d6   : > { %v499_v57 = vmul.f32 %v2791_v56, %v483_v41  ;;  %v514_v61 = vadd.f32 %v2966_v59, %v506_v58  ;;  %v2729_v41 = vld [vmem:[%s3391_s1 + $0x20] sm:$0xff]  }
 0x2d7   : > { %2533 = vmatpush3.bf16.msra.mxu1 %v2729_v41 }
 0x2d8   : > { %v507_v60 = vmul.f32 %v2960_v55, %v499_v57  ;;  %2538 = vmatprep.subr.bf16.mxu1 %v2830_v1  ;;  %v2730_v57 = vld [vmem:[%s3393_s3 + $0xb8] sm:$0xff]  }
 0x2da   : > { %v515_v62 = vadd.f32 %v2966_v59, %v507_v60  ;;  %v2731_v60 = vld [vmem:[%s3393_s3 + $0xb0] sm:$0xff]  }
 0x2dc   : > { %v516_v0 = vpack.c.bf16 %v515_v62, %v514_v61 }
 0x2de   : > { %2507 = vmatmul.mubr.msk.bf16.vlgmr.msra.gmra.mxu0 %vm311_vm1, %v516_v0  ;;  %v2735_v0 = vld [vmem:[%s3393_s3 + $0x90] sm:$0xff]  }
 0x2df   : > { %2511 = vmatpush3.bf16.msra.mxu0 %v2720_v63  ;;  %2526 = vmatprep.mubr.msk.bf16.mxu0 %vm2831_vm0, %v2830_v1  ;;  %v2734_v63 = vld [vmem:[%s3393_s3 + $0x98] sm:$0xff]  }
 0x2e0   : > { %2512 = vmatprep.subr.bf16.mxu0 %v2830_v1 }
 0x2e3   : > { %2513 = vmatpush3.bf16.msra.mxu0 %v2721_v2  ;;  %v2736_v2 = vld [vmem:[%s3393_s3 + $0x88] sm:$0xff]  }
 0x2e4   : > { %2514 = vmatprep.subr.bf16.mxu0 %v2830_v1 }
 0x2e7   : > { %2515 = vmatpush3.bf16.msra.mxu0 %v2722_v3  ;;  %v2737_v3 = vld [vmem:[%s3393_s3 + $0x80] sm:$0xff]  }
 0x2e8   : > { %2516 = vmatprep.subr.bf16.mxu0 %v2830_v1 }
 0x2eb   : > { %2517 = vmatpush3.bf16.msra.mxu0 %v2723_v4  ;;  %v2171_v4 = vld [vmem:[%s3392_s2 + $0x2] ss:$0 sm:$0xff] }
 0x2ec   : > { %2518 = vmatprep.subr.bf16.mxu0 %v2830_v1 }
 0x2ef   : > { %2519 = vmatpush3.bf16.msra.mxu0 %v2724_v5 }
 0x2f0   : > { %2520 = vmatprep.subr.bf16.mxu0 %v2830_v1 }
 0x2f3   : > { %2521 = vmatpush3.bf16.msra.mxu0 %v2725_v6 }
 0x2f4   : > { %2522 = vmatprep.subr.bf16.mxu0 %v2830_v1 }
 0x2f7   : > { %2523 = vmatpush3.bf16.msra.mxu0 %v2726_v7 }
 0x2f8   : > { %2524 = vmatprep.subr.bf16.mxu0 %v2830_v1 }
 0x2fb   : > { %2525 = vmatpush3.bf16.msra.mxu0 %v2727_v8 }
 0x2fc   : > { %2558 = vmatprep.subr.bf16.mxu0 %v2830_v1 }
 0x39e   : > { %v579_v10 = vpop.f32.mrf.mxu0 }
 0x39f   : > { %v580_v12 = vadd.f32 %v2136_v9, %v579_v10 }
 0x3a0   : > { %v2508_v11 = vpop.f32.mrf.mxu0 }
 0x3a1   : > { %v586_v16 = vmax.f32 %v580_v12, 0.0 }
 0x3a2   : > { %v582_v13 = vpop.f32.mrf.mxu0 }
 0x3a3   : > { %v583_v14 = vadd.f32 %v2136_v9, %v582_v13 }
 0x3a4   : > { %v2509_v15 = vpop.f32.mrf.mxu0 }
 0x3a5   : > { %v587_v17 = vmax.f32 %v583_v14, 0.0  ;;  %v2192_v14 = vld [vmem:[%s3394_s4 + $0x2] ss:$0 sm:$0xff] }
 0x3a7   : > { %v588_v18 = vpack.c.bf16 %v587_v17, %v586_v16 }
 0x3a9   : > { %2527 = vmatmul.mubr.bf16.vlgmr.msra.gmra.mxu0 %v588_v18 }
 0x3aa   : > { %2562 = vmatprep.mubr.msk.bf16.mxu0 %vm2831_vm0, %v2830_v1 }
 0x469   : > { %v696_v20 = vpop.f32.mrf.mxu0 }
 0x46a   : > { %v697_v21 = vadd.f32 %v2157_v19, %v696_v20 }
 0x46b   : > { %v2528_v22 = vpop.f32.mrf.mxu0 }
 0x46c   : > { %v703_v23 = vadd.f32 %v697_v21, %v514_v61  ;;  %v2732_v61 = vld [vmem:[%s3393_s3 + $0xa8] sm:$0xff]  }
 0x46d   : > { %v699_v24 = vpop.f32.mrf.mxu0 }
 0x46e   : > { %v700_v25 = vadd.f32 %v2157_v19, %v699_v24  ;;  %v705_v26 = vsel %vm311_vm1, %v703_v23, 0.0 }
 0x46f   : > { %706 = vadd.xlane.f32.xlu0 %v705_v26  ;;  %v2529_v27 = vpop.f32.mrf.mxu0 }
 0x470   : > { %v704_v28 = vadd.f32 %v700_v25, %v515_v62  ;;  %v2733_v62 = vld [vmem:[%s3393_s3 + $0xa0] sm:$0xff]  }
 0x472   : > { %v708_v29 = vsel %vm311_vm1, %v704_v28, 0.0 }
 0x473   : > { %709 = vadd.xlane.f32.xlu1 %v708_v29 }
 0x4f8   : > { %v707_v30 = vpop.xlane.xlu0 %706 }
 0x4f9   : > { %v711_v31 = vmul.f32 0.03125, %v707_v30 }
 0x4fb   : > { %v713_v32 = vsub.f32 %v703_v23, %v711_v31 }
 0x4fc   : > { %v710_v33 = vpop.xlane.xlu1 %709 }
 0x4fd   : > { %v712_v34 = vmul.f32 0.03125, %v710_v33  ;;  %v715_v35 = vmul.f32 %v713_v32, %v713_v32 }
 0x4ff   : > { %v714_v36 = vsub.f32 %v704_v28, %v712_v34  ;;  %v717_v37 = vsel %vm311_vm1, %v715_v35, 0.0  ;;  %v2738_v35 = vld [vmem:[%s3391_s1 + $0x38] sm:$0xff]  }
 0x500   : > { %718 = vadd.xlane.f32.xlu0 %v717_v37  ;;  %2559 = vmatpush3.bf16.msra.mxu0 %v2738_v35 }
 0x501   : > { %v716_v38 = vmul.f32 %v714_v36, %v714_v36  ;;  %2560 = vmatprep.subr.bf16.mxu0 %v2830_v1 }
 0x503   : > { %v720_v39 = vsel %vm311_vm1, %v716_v38, 0.0 }
 0x504   : > { %721 = vadd.xlane.f32.xlu1 %v720_v39 }
 0x589   : > { %v719_v42 = vpop.xlane.xlu0 %718 }
 0x58a   : > { %v723_v43 = vmul.f32 0.03125, %v719_v42 }
 0x58c   : > { %v725_v44 = vadd.f32 1e-05, %v723_v43 }
 0x58d   : > { %v722_v45 = vpop.xlane.xlu1 %721 }
 0x58e   : > { %2792 = vrsqrt.f32 %v725_v44  ;;  %v724_v46 = vmul.f32 0.03125, %v722_v45 }
 0x590   : > { %v726_v47 = vadd.f32 1e-05, %v724_v46 }
 0x592   : > { %2794 = vrsqrt.f32 %v726_v47 }
 0x59b   : > { %v2793_v48 = vpop.eup %2792 }
 0x59c   : > { %v729_v49 = vmul.f32 %v2793_v48, %v713_v32 }
 0x59e   : > { %v731_v52 = vmul.f32 %v2960_v55, %v729_v49 }
 0x59f   : > { %v2795_v50 = vpop.eup %2794 }
 0x5a0   : > { %v730_v51 = vmul.f32 %v2795_v50, %v714_v36  ;;  %v733_v54 = vadd.f32 %v2966_v59, %v731_v52  ;;  %v2739_v36 = vld [vmem:[%s3391_s1 + $0x30] sm:$0xff]  }
 0x5a1   : > { %2561 = vmatpush3.bf16.msra.mxu0 %v2739_v36 }
 0x5a2   : > { %v732_v53 = vmul.f32 %v2960_v55, %v730_v51  ;;  %2566 = vmatprep.subr.bf16.mxu0 %v2830_v1  ;;  %v2740_v51 = vld [vmem:[%s3393_s3 + $0xf8] sm:$0xff]  }
 0x5a4   : > { %v734_v56 = vadd.f32 %v2966_v59, %v732_v53  ;;  %v2741_v53 = vld [vmem:[%s3393_s3 + $0xf0] sm:$0xff]  }
 0x5a6   : > { %v735_v58 = vpack.c.bf16 %v734_v56, %v733_v54 }
 0x5a8   : > { %2535 = vmatmul.mubr.msk.bf16.vlgmr.msra.gmra.mxu1 %vm311_vm1, %v735_v58  ;;  %v2745_v58 = vld [vmem:[%s3393_s3 + $0xd0] sm:$0xff]  }
 0x5a9   : > { %2539 = vmatpush3.bf16.msra.mxu1 %v2730_v57  ;;  %2554 = vmatprep.mubr.msk.bf16.mxu1 %vm2831_vm0, %v2830_v1  ;;  %v2744_v57 = vld [vmem:[%s3393_s3 + $0xd8] sm:$0xff]  }
 0x5aa   : > { %2540 = vmatprep.subr.bf16.mxu1 %v2830_v1 }
 0x5ad   : > { %2541 = vmatpush3.bf16.msra.mxu1 %v2731_v60  ;;  %v2746_v60 = vld [vmem:[%s3393_s3 + $0xc8] sm:$0xff]  }
 0x5ae   : > { %2542 = vmatprep.subr.bf16.mxu1 %v2830_v1 }
 0x5b1   : > { %2543 = vmatpush3.bf16.msra.mxu1 %v2732_v61  ;;  %v2747_v61 = vld [vmem:[%s3393_s3 + $0xc0] sm:$0xff]  }
 0x5b2   : > { %2544 = vmatprep.subr.bf16.mxu1 %v2830_v1 }
 0x5b5   : > { %2545 = vmatpush3.bf16.msra.mxu1 %v2733_v62  ;;  %v2206_v62 = vld [vmem:[%s3392_s2 + $0x3] ss:$0 sm:$0xff] }
 0x5b6   : > { %2546 = vmatprep.subr.bf16.mxu1 %v2830_v1 }
 0x5b9   : > { %2547 = vmatpush3.bf16.msra.mxu1 %v2734_v63 }
 0x5ba   : > { %2548 = vmatprep.subr.bf16.mxu1 %v2830_v1 }
 0x5bd   : > { %2549 = vmatpush3.bf16.msra.mxu1 %v2735_v0 }
 0x5be   : > { %2550 = vmatprep.subr.bf16.mxu1 %v2830_v1 }
 0x5c1   : > { %2551 = vmatpush3.bf16.msra.mxu1 %v2736_v2 }
 0x5c2   : > { %2552 = vmatprep.subr.bf16.mxu1 %v2830_v1 }
 0x5c5   : > { %2553 = vmatpush3.bf16.msra.mxu1 %v2737_v3 }
 0x5c6   : > { %2586 = vmatprep.subr.bf16.mxu1 %v2830_v1 }
 0x668   : > { %v798_v5 = vpop.f32.mrf.mxu1 }
 0x669   : > { %v799_v7 = vadd.f32 %v2171_v4, %v798_v5 }
 0x66a   : > { %v2536_v6 = vpop.f32.mrf.mxu1 }
 0x66b   : > { %v805_v11 = vmax.f32 %v799_v7, 0.0 }
 0x66c   : > { %v801_v8 = vpop.f32.mrf.mxu1 }
 0x66d   : > { %v802_v9 = vadd.f32 %v2171_v4, %v801_v8 }
 0x66e   : > { %v2537_v10 = vpop.f32.mrf.mxu1 }
 0x66f   : > { %v806_v12 = vmax.f32 %v802_v9, 0.0  ;;  %v2227_v9 = vld [vmem:[%s3394_s4 + $0x3] ss:$0 sm:$0xff] }
 0x671   : > { %v807_v13 = vpack.c.bf16 %v806_v12, %v805_v11 }
 0x673   : > { %2555 = vmatmul.mubr.bf16.vlgmr.msra.gmra.mxu1 %v807_v13 }
 0x674   : > { %2590 = vmatprep.mubr.msk.bf16.mxu1 %vm2831_vm0, %v2830_v1 }
 0x733   : > { %v915_v15 = vpop.f32.mrf.mxu1 }
 0x734   : > { %v916_v16 = vadd.f32 %v2192_v14, %v915_v15 }
 0x735   : > { %v2556_v17 = vpop.f32.mrf.mxu1 }
 0x736   : > { %v922_v18 = vadd.f32 %v916_v16, %v733_v54  ;;  %v2742_v54 = vld [vmem:[%s3393_s3 + $0xe8] sm:$0xff]  }
 0x737   : > { %v918_v19 = vpop.f32.mrf.mxu1 }
 0x738   : > { %v919_v20 = vadd.f32 %v2192_v14, %v918_v19  ;;  %v924_v21 = vsel %vm311_vm1, %v922_v18, 0.0 }
 0x739   : > { %925 = vadd.xlane.f32.xlu0 %v924_v21  ;;  %v2557_v22 = vpop.f32.mrf.mxu1 }
 0x73a   : > { %v923_v23 = vadd.f32 %v919_v20, %v734_v56  ;;  %v2743_v56 = vld [vmem:[%s3393_s3 + $0xe0] sm:$0xff]  }
 0x73c   : > { %v927_v24 = vsel %vm311_vm1, %v923_v23, 0.0 }
 0x73d   : > { %928 = vadd.xlane.f32.xlu1 %v927_v24 }
 0x7c2   : > { %v926_v25 = vpop.xlane.xlu0 %925 }
 0x7c3   : > { %v930_v26 = vmul.f32 0.03125, %v926_v25 }
 0x7c5   : > { %v932_v27 = vsub.f32 %v922_v18, %v930_v26 }
 0x7c6   : > { %v929_v28 = vpop.xlane.xlu1 %928 }
 0x7c7   : > { %v931_v29 = vmul.f32 0.03125, %v929_v28  ;;  %v934_v30 = vmul.f32 %v932_v27, %v932_v27 }
 0x7c9   : > { %v933_v31 = vsub.f32 %v923_v23, %v931_v29  ;;  %v936_v32 = vsel %vm311_vm1, %v934_v30, 0.0  ;;  %v2748_v30 = vld [vmem:[%s3391_s1 + $0x48] sm:$0xff]  }
 0x7ca   : > { %937 = vadd.xlane.f32.xlu0 %v936_v32  ;;  %2587 = vmatpush3.bf16.msra.mxu1 %v2748_v30 }
 0x7cb   : > { %v935_v33 = vmul.f32 %v933_v31, %v933_v31  ;;  %2588 = vmatprep.subr.bf16.mxu1 %v2830_v1 }
 0x7cd   : > { %v939_v34 = vsel %vm311_vm1, %v935_v33, 0.0 }
 0x7ce   : > { %940 = vadd.xlane.f32.xlu1 %v939_v34 }
 0x853   : > { %v938_v37 = vpop.xlane.xlu0 %937 }
 0x854   : > { %v942_v38 = vmul.f32 0.03125, %v938_v37 }
 0x856   : > { %v944_v39 = vadd.f32 1e-05, %v942_v38 }
 0x857   : > { %v941_v40 = vpop.xlane.xlu1 %940 }
 0x858   : > { %2796 = vrsqrt.f32 %v944_v39  ;;  %v943_v41 = vmul.f32 0.03125, %v941_v40 }
 0x85a   : > { %v945_v42 = vadd.f32 1e-05, %v943_v41 }
 0x85c   : > { %2798 = vrsqrt.f32 %v945_v42 }
 0x865   : > { %v2797_v43 = vpop.eup %2796 }
 0x866   : > { %v948_v44 = vmul.f32 %v2797_v43, %v932_v27 }
 0x868   : > { %v950_v47 = vmul.f32 %v2960_v55, %v948_v44 }
 0x869   : > { %v2799_v45 = vpop.eup %2798 }
 0x86a   : > { %v949_v46 = vmul.f32 %v2799_v45, %v933_v31  ;;  %v952_v49 = vadd.f32 %v2966_v59, %v950_v47  ;;  %v2749_v31 = vld [vmem:[%s3391_s1 + $0x40] sm:$0xff]  }
 0x86b   : > { %2589 = vmatpush3.bf16.msra.mxu1 %v2749_v31 }
 0x86c   : > { %v951_v48 = vmul.f32 %v2960_v55, %v949_v46  ;;  %2594 = vmatprep.subr.bf16.mxu1 %v2830_v1  ;;  %v2750_v46 = vld [vmem:[%s3393_s3 + $0x138] sm:$0xff]  }
 0x86e   : > { %v953_v50 = vadd.f32 %v2966_v59, %v951_v48  ;;  %v2751_v48 = vld [vmem:[%s3393_s3 + $0x130] sm:$0xff]  }
 0x870   : > { %v954_v52 = vpack.c.bf16 %v953_v50, %v952_v49 }
 0x872   : > { %2563 = vmatmul.mubr.msk.bf16.vlgmr.msra.gmra.mxu0 %vm311_vm1, %v954_v52  ;;  %v2755_v52 = vld [vmem:[%s3393_s3 + $0x110] sm:$0xff]  }
 0x873   : > { %2567 = vmatpush3.bf16.msra.mxu0 %v2740_v51  ;;  %2582 = vmatprep.mubr.msk.bf16.mxu0 %vm2831_vm0, %v2830_v1  ;;  %v2754_v51 = vld [vmem:[%s3393_s3 + $0x118] sm:$0xff]  }
 0x874   : > { %2568 = vmatprep.subr.bf16.mxu0 %v2830_v1 }
 0x877   : > { %2569 = vmatpush3.bf16.msra.mxu0 %v2741_v53  ;;  %v2756_v53 = vld [vmem:[%s3393_s3 + $0x108] sm:$0xff]  }
 0x878   : > { %2570 = vmatprep.subr.bf16.mxu0 %v2830_v1 }
 0x87b   : > { %2571 = vmatpush3.bf16.msra.mxu0 %v2742_v54  ;;  %v2757_v54 = vld [vmem:[%s3393_s3 + $0x100] sm:$0xff]  }
 0x87c   : > { %2572 = vmatprep.subr.bf16.mxu0 %v2830_v1 }
 0x87f   : > { %2573 = vmatpush3.bf16.msra.mxu0 %v2743_v56  ;;  %v2241_v56 = vld [vmem:[%s3392_s2 + $0x4] ss:$0 sm:$0xff] }
 0x880   : > { %2574 = vmatprep.subr.bf16.mxu0 %v2830_v1 }
 0x883   : > { %2575 = vmatpush3.bf16.msra.mxu0 %v2744_v57 }
 0x884   : > { %2576 = vmatprep.subr.bf16.mxu0 %v2830_v1 }
 0x887   : > { %2577 = vmatpush3.bf16.msra.mxu0 %v2745_v58 }
 0x888   : > { %2578 = vmatprep.subr.bf16.mxu0 %v2830_v1 }
 0x88b   : > { %2579 = vmatpush3.bf16.msra.mxu0 %v2746_v60 }
 0x88c   : > { %2580 = vmatprep.subr.bf16.mxu0 %v2830_v1 }
 0x88f   : > { %2581 = vmatpush3.bf16.msra.mxu0 %v2747_v61 }
 0x890   : > { %2614 = vmatprep.subr.bf16.mxu0 %v2830_v1 }
 0x932   : > { %v1017_v63 = vpop.f32.mrf.mxu0 }
 0x933   : > { %v1018_v2 = vadd.f32 %v2206_v62, %v1017_v63 }
 0x934   : > { %v2564_v0 = vpop.f32.mrf.mxu0 }
 0x935   : > { %v1024_v6 = vmax.f32 %v1018_v2, 0.0 }
 0x936   : > { %v1020_v3 = vpop.f32.mrf.mxu0 }
 0x937   : > { %v1021_v4 = vadd.f32 %v2206_v62, %v1020_v3 }
 0x938   : > { %v2565_v5 = vpop.f32.mrf.mxu0 }
 0x939   : > { %v1025_v7 = vmax.f32 %v1021_v4, 0.0  ;;  %v2262_v4 = vld [vmem:[%s3394_s4 + $0x4] ss:$0 sm:$0xff] }
 0x93b   : > { %v1026_v8 = vpack.c.bf16 %v1025_v7, %v1024_v6 }
 0x93d   : > { %2583 = vmatmul.mubr.bf16.vlgmr.msra.gmra.mxu0 %v1026_v8 }
 0x93e   : > { %2618 = vmatprep.mubr.msk.bf16.mxu0 %vm2831_vm0, %v2830_v1 }
 0x9fd   : > { %v1134_v10 = vpop.f32.mrf.mxu0 }
 0x9fe   : > { %v1135_v11 = vadd.f32 %v2227_v9, %v1134_v10 }
 0x9ff   : > { %v2584_v12 = vpop.f32.mrf.mxu0 }
 0xa00   : > { %v1141_v13 = vadd.f32 %v1135_v11, %v952_v49  ;;  %v2752_v49 = vld [vmem:[%s3393_s3 + $0x128] sm:$0xff]  }
 0xa01   : > { %v1137_v14 = vpop.f32.mrf.mxu0 }
 0xa02   : > { %v1138_v15 = vadd.f32 %v2227_v9, %v1137_v14  ;;  %v1143_v16 = vsel %vm311_vm1, %v1141_v13, 0.0 }
 0xa03   : > { %1144 = vadd.xlane.f32.xlu0 %v1143_v16  ;;  %v2585_v17 = vpop.f32.mrf.mxu0 }
 0xa04   : > { %v1142_v18 = vadd.f32 %v1138_v15, %v953_v50  ;;  %v2753_v50 = vld [vmem:[%s3393_s3 + $0x120] sm:$0xff]  }
 0xa06   : > { %v1146_v19 = vsel %vm311_vm1, %v1142_v18, 0.0 }
 0xa07   : > { %1147 = vadd.xlane.f32.xlu1 %v1146_v19 }
 0xa8c   : > { %v1145_v20 = vpop.xlane.xlu0 %1144 }
 0xa8d   : > { %v1149_v21 = vmul.f32 0.03125, %v1145_v20 }
 0xa8f   : > { %v1151_v22 = vsub.f32 %v1141_v13, %v1149_v21 }
 0xa90   : > { %v1148_v23 = vpop.xlane.xlu1 %1147 }
 0xa91   : > { %v1150_v24 = vmul.f32 0.03125, %v1148_v23  ;;  %v1153_v25 = vmul.f32 %v1151_v22, %v1151_v22 }
 0xa93   : > { %v1152_v26 = vsub.f32 %v1142_v18, %v1150_v24  ;;  %v1155_v27 = vsel %vm311_vm1, %v1153_v25, 0.0  ;;  %v2758_v25 = vld [vmem:[%s3391_s1 + $0x58] sm:$0xff]  }
 0xa94   : > { %1156 = vadd.xlane.f32.xlu0 %v1155_v27  ;;  %2615 = vmatpush3.bf16.msra.mxu0 %v2758_v25 }
 0xa95   : > { %v1154_v28 = vmul.f32 %v1152_v26, %v1152_v26  ;;  %2616 = vmatprep.subr.bf16.mxu0 %v2830_v1 }
 0xa97   : > { %v1158_v29 = vsel %vm311_vm1, %v1154_v28, 0.0 }
 0xa98   : > { %1159 = vadd.xlane.f32.xlu1 %v1158_v29 }
 0xb1d   : > { %v1157_v32 = vpop.xlane.xlu0 %1156 }
 0xb1e   : > { %v1161_v33 = vmul.f32 0.03125, %v1157_v32 }
 0xb20   : > { %v1163_v34 = vadd.f32 1e-05, %v1161_v33 }
 0xb21   : > { %v1160_v35 = vpop.xlane.xlu1 %1159 }
 0xb22   : > { %2800 = vrsqrt.f32 %v1163_v34  ;;  %v1162_v36 = vmul.f32 0.03125, %v1160_v35 }
 0xb24   : > { %v1164_v37 = vadd.f32 1e-05, %v1162_v36 }
 0xb26   : > { %2802 = vrsqrt.f32 %v1164_v37 }
 0xb2f   : > { %v2801_v38 = vpop.eup %2800 }
 0xb30   : > { %v1167_v39 = vmul.f32 %v2801_v38, %v1151_v22 }
 0xb32   : > { %v1169_v42 = vmul.f32 %v2960_v55, %v1167_v39 }
 0xb33   : > { %v2803_v40 = vpop.eup %2802 }
 0xb34   : > { %v1168_v41 = vmul.f32 %v2803_v40, %v1152_v26  ;;  %v1171_v44 = vadd.f32 %v2966_v59, %v1169_v42  ;;  %v2759_v26 = vld [vmem:[%s3391_s1 + $0x50] sm:$0xff]  }
 0xb35   : > { %2617 = vmatpush3.bf16.msra.mxu0 %v2759_v26 }
 0xb36   : > { %v1170_v43 = vmul.f32 %v2960_v55, %v1168_v41  ;;  %2622 = vmatprep.subr.bf16.mxu0 %v2830_v1  ;;  %v2760_v41 = vld [vmem:[%s3393_s3 + $0x178] sm:$0xff]  }
 0xb38   : > { %v1172_v45 = vadd.f32 %v2966_v59, %v1170_v43  ;;  %v2761_v43 = vld [vmem:[%s3393_s3 + $0x170] sm:$0xff]  }
 0xb3a   : > { %v1173_v47 = vpack.c.bf16 %v1172_v45, %v1171_v44 }
 0xb3c   : > { %2591 = vmatmul.mubr.msk.bf16.vlgmr.msra.gmra.mxu1 %vm311_vm1, %v1173_v47  ;;  %v2765_v47 = vld [vmem:[%s3393_s3 + $0x150] sm:$0xff]  }
 0xb3d   : > { %2595 = vmatpush3.bf16.msra.mxu1 %v2750_v46  ;;  %2610 = vmatprep.mubr.msk.bf16.mxu1 %vm2831_vm0, %v2830_v1  ;;  %v2764_v46 = vld [vmem:[%s3393_s3 + $0x158] sm:$0xff]  }
 0xb3e   : > { %2596 = vmatprep.subr.bf16.mxu1 %v2830_v1 }
 0xb41   : > { %2597 = vmatpush3.bf16.msra.mxu1 %v2751_v48  ;;  %v2766_v48 = vld [vmem:[%s3393_s3 + $0x148] sm:$0xff]  }
 0xb42   : > { %2598 = vmatprep.subr.bf16.mxu1 %v2830_v1 }
 0xb45   : > { %2599 = vmatpush3.bf16.msra.mxu1 %v2752_v49  ;;  %v2767_v49 = vld [vmem:[%s3393_s3 + $0x140] sm:$0xff]  }
 0xb46   : > { %2600 = vmatprep.subr.bf16.mxu1 %v2830_v1 }
 0xb49   : > { %2601 = vmatpush3.bf16.msra.mxu1 %v2753_v50  ;;  %v2276_v50 = vld [vmem:[%s3392_s2 + $0x5] ss:$0 sm:$0xff] }
 0xb4a   : > { %2602 = vmatprep.subr.bf16.mxu1 %v2830_v1 }
 0xb4d   : > { %2603 = vmatpush3.bf16.msra.mxu1 %v2754_v51 }
 0xb4e   : > { %2604 = vmatprep.subr.bf16.mxu1 %v2830_v1 }
 0xb51   : > { %2605 = vmatpush3.bf16.msra.mxu1 %v2755_v52 }
 0xb52   : > { %2606 = vmatprep.subr.bf16.mxu1 %v2830_v1 }
 0xb55   : > { %2607 = vmatpush3.bf16.msra.mxu1 %v2756_v53 }
 0xb56   : > { %2608 = vmatprep.subr.bf16.mxu1 %v2830_v1 }
 0xb59   : > { %2609 = vmatpush3.bf16.msra.mxu1 %v2757_v54 }
 0xb5a   : > { %2642 = vmatprep.subr.bf16.mxu1 %v2830_v1 }
 0xbfc   : > { %v1236_v57 = vpop.f32.mrf.mxu1 }
 0xbfd   : > { %v1237_v60 = vadd.f32 %v2241_v56, %v1236_v57 }
 0xbfe   : > { %v2592_v58 = vpop.f32.mrf.mxu1 }
 0xbff   : > { %v1243_v0 = vmax.f32 %v1237_v60, 0.0 }
 0xc00   : > { %v1239_v61 = vpop.f32.mrf.mxu1 }
 0xc01   : > { %v1240_v62 = vadd.f32 %v2241_v56, %v1239_v61 }
 0xc02   : > { %v2593_v63 = vpop.f32.mrf.mxu1 }
 0xc03   : > { %v1244_v2 = vmax.f32 %v1240_v62, 0.0  ;;  %v2297_v62 = vld [vmem:[%s3394_s4 + $0x5] ss:$0 sm:$0xff] }
 0xc05   : > { %v1245_v3 = vpack.c.bf16 %v1244_v2, %v1243_v0 }
 0xc07   : > { %2611 = vmatmul.mubr.bf16.vlgmr.msra.gmra.mxu1 %v1245_v3 }
 0xc08   : > { %2646 = vmatprep.mubr.msk.bf16.mxu1 %vm2831_vm0, %v2830_v1 }
 0xcc7   : > { %v1353_v5 = vpop.f32.mrf.mxu1 }
 0xcc8   : > { %v1354_v6 = vadd.f32 %v2262_v4, %v1353_v5 }
 0xcc9   : > { %v2612_v7 = vpop.f32.mrf.mxu1 }
 0xcca   : > { %v1360_v8 = vadd.f32 %v1354_v6, %v1171_v44  ;;  %v2762_v44 = vld [vmem:[%s3393_s3 + $0x168] sm:$0xff]  }
 0xccb   : > { %v1356_v9 = vpop.f32.mrf.mxu1 }
 0xccc   : > { %v1357_v10 = vadd.f32 %v2262_v4, %v1356_v9  ;;  %v1362_v11 = vsel %vm311_vm1, %v1360_v8, 0.0 }
 0xccd   : > { %1363 = vadd.xlane.f32.xlu0 %v1362_v11  ;;  %v2613_v12 = vpop.f32.mrf.mxu1 }
 0xcce   : > { %v1361_v13 = vadd.f32 %v1357_v10, %v1172_v45  ;;  %v2763_v45 = vld [vmem:[%s3393_s3 + $0x160] sm:$0xff]  }
 0xcd0   : > { %v1365_v14 = vsel %vm311_vm1, %v1361_v13, 0.0 }
 0xcd1   : > { %1366 = vadd.xlane.f32.xlu1 %v1365_v14 }
 0xd56   : > { %v1364_v15 = vpop.xlane.xlu0 %1363 }
 0xd57   : > { %v1368_v16 = vmul.f32 0.03125, %v1364_v15 }
 0xd59   : > { %v1370_v17 = vsub.f32 %v1360_v8, %v1368_v16 }
 0xd5a   : > { %v1367_v18 = vpop.xlane.xlu1 %1366 }
 0xd5b   : > { %v1369_v19 = vmul.f32 0.03125, %v1367_v18  ;;  %v1372_v20 = vmul.f32 %v1370_v17, %v1370_v17 }
 0xd5d   : > { %v1371_v21 = vsub.f32 %v1361_v13, %v1369_v19  ;;  %v1374_v22 = vsel %vm311_vm1, %v1372_v20, 0.0  ;;  %v2768_v20 = vld [vmem:[%s3391_s1 + $0x68] sm:$0xff]  }
 0xd5e   : > { %1375 = vadd.xlane.f32.xlu0 %v1374_v22  ;;  %2643 = vmatpush3.bf16.msra.mxu1 %v2768_v20 }
 0xd5f   : > { %v1373_v23 = vmul.f32 %v1371_v21, %v1371_v21  ;;  %2644 = vmatprep.subr.bf16.mxu1 %v2830_v1 }
 0xd61   : > { %v1377_v24 = vsel %vm311_vm1, %v1373_v23, 0.0 }
 0xd62   : > { %1378 = vadd.xlane.f32.xlu1 %v1377_v24 }
 0xde7   : > { %v1376_v27 = vpop.xlane.xlu0 %1375 }
 0xde8   : > { %v1380_v28 = vmul.f32 0.03125, %v1376_v27 }
 0xdea   : > { %v1382_v29 = vadd.f32 1e-05, %v1380_v28 }
 0xdeb   : > { %v1379_v30 = vpop.xlane.xlu1 %1378 }
 0xdec   : > { %2804 = vrsqrt.f32 %v1382_v29  ;;  %v1381_v31 = vmul.f32 0.03125, %v1379_v30 }
 0xdee   : > { %v1383_v32 = vadd.f32 1e-05, %v1381_v31 }
 0xdf0   : > { %2806 = vrsqrt.f32 %v1383_v32 }
 0xdf9   : > { %v2805_v33 = vpop.eup %2804 }
 0xdfa   : > { %v1386_v34 = vmul.f32 %v2805_v33, %v1370_v17 }
 0xdfc   : > { %v1388_v37 = vmul.f32 %v2960_v55, %v1386_v34 }
 0xdfd   : > { %v2807_v35 = vpop.eup %2806 }
 0xdfe   : > { %v1387_v36 = vmul.f32 %v2807_v35, %v1371_v21  ;;  %v1390_v39 = vadd.f32 %v2966_v59, %v1388_v37  ;;  %v2769_v21 = vld [vmem:[%s3391_s1 + $0x60] sm:$0xff]  }
 0xdff   : > { %2645 = vmatpush3.bf16.msra.mxu1 %v2769_v21 }
 0xe00   : > { %v1389_v38 = vmul.f32 %v2960_v55, %v1387_v36  ;;  %2650 = vmatprep.subr.bf16.mxu1 %v2830_v1  ;;  %v2770_v36 = vld [vmem:[%s3393_s3 + $0x1b8] sm:$0xff]  }
 0xe02   : > { %v1391_v40 = vadd.f32 %v2966_v59, %v1389_v38  ;;  %v2771_v38 = vld [vmem:[%s3393_s3 + $0x1b0] sm:$0xff]  }
 0xe04   : > { %v1392_v42 = vpack.c.bf16 %v1391_v40, %v1390_v39 }
 0xe06   : > { %2619 = vmatmul.mubr.msk.bf16.vlgmr.msra.gmra.mxu0 %vm311_vm1, %v1392_v42  ;;  %v2777_v42 = vld [vmem:[%s3393_s3 + $0x180] sm:$0xff]  }
 0xe07   : > { %2623 = vmatpush3.bf16.msra.mxu0 %v2760_v41  ;;  %2638 = vmatprep.mubr.msk.bf16.mxu0 %vm2831_vm0, %v2830_v1  ;;  %v2776_v41 = vld [vmem:[%s3393_s3 + $0x188] sm:$0xff]  }
 0xe08   : > { %2624 = vmatprep.subr.bf16.mxu0 %v2830_v1 }
 0xe0b   : > { %2625 = vmatpush3.bf16.msra.mxu0 %v2761_v43  ;;  %v2311_v43 = vld [vmem:[%s3392_s2 + $0x6] ss:$0 sm:$0xff] }
 0xe0c   : > { %2626 = vmatprep.subr.bf16.mxu0 %v2830_v1 }
 0xe0f   : > { %2627 = vmatpush3.bf16.msra.mxu0 %v2762_v44 }
 0xe10   : > { %2628 = vmatprep.subr.bf16.mxu0 %v2830_v1 }
 0xe13   : > { %2629 = vmatpush3.bf16.msra.mxu0 %v2763_v45 }
 0xe14   : > { %2630 = vmatprep.subr.bf16.mxu0 %v2830_v1 }
 0xe17   : > { %2631 = vmatpush3.bf16.msra.mxu0 %v2764_v46 }
 0xe18   : > { %2632 = vmatprep.subr.bf16.mxu0 %v2830_v1 }
 0xe1b   : > { %2633 = vmatpush3.bf16.msra.mxu0 %v2765_v47 }
 0xe1c   : > { %2634 = vmatprep.subr.bf16.mxu0 %v2830_v1 }
 0xe1f   : > { %2635 = vmatpush3.bf16.msra.mxu0 %v2766_v48 }
 0xe20   : > { %2636 = vmatprep.subr.bf16.mxu0 %v2830_v1 }
 0xe23   : > { %2637 = vmatpush3.bf16.msra.mxu0 %v2767_v49 }
 0xe24   : > { %2670 = vmatprep.subr.bf16.mxu0 %v2830_v1 }
 0xec6   : > { %v1455_v51 = vpop.f32.mrf.mxu0 }
 0xec7   : > { %v1456_v53 = vadd.f32 %v2276_v50, %v1455_v51 }
 0xec8   : > { %v2620_v52 = vpop.f32.mrf.mxu0 }
 0xec9   : > { %v1462_v58 = vmax.f32 %v1456_v53, 0.0  ;;  %v2332_v53 = vld [vmem:[%s3394_s4 + $0x6] ss:$0 sm:$0xff] }
 0xeca   : > { %v1458_v54 = vpop.f32.mrf.mxu0 }
 0xecb   : > { %v1459_v56 = vadd.f32 %v2276_v50, %v1458_v54 }
 0xecc   : > { %v2621_v57 = vpop.f32.mrf.mxu0 }
 0xecd   : > { %v1463_v60 = vmax.f32 %v1459_v56, 0.0 }
 0xecf   : > { %v1464_v61 = vpack.c.bf16 %v1463_v60, %v1462_v58 }
 0xed1   : > { %2639 = vmatmul.mubr.bf16.vlgmr.msra.gmra.mxu0 %v1464_v61 }
 0xed2   : > { %2674 = vmatprep.mubr.msk.bf16.mxu0 %vm2831_vm0, %v2830_v1 }
 0xf91   : > { %v1572_v63 = vpop.f32.mrf.mxu0 }
 0xf92   : > { %v1573_v0 = vadd.f32 %v2297_v62, %v1572_v63 }
 0xf93   : > { %v2640_v2 = vpop.f32.mrf.mxu0 }
 0xf94   : > { %v1579_v3 = vadd.f32 %v1573_v0, %v1390_v39  ;;  %v2774_v39 = vld [vmem:[%s3393_s3 + $0x198] sm:$0xff]  }
 0xf95   : > { %v1575_v4 = vpop.f32.mrf.mxu0 }
 0xf96   : > { %v1576_v5 = vadd.f32 %v2297_v62, %v1575_v4  ;;  %v1581_v6 = vsel %vm311_vm1, %v1579_v3, 0.0 }
 0xf97   : > { %1582 = vadd.xlane.f32.xlu0 %v1581_v6  ;;  %v2641_v7 = vpop.f32.mrf.mxu0 }
 0xf98   : > { %v1580_v8 = vadd.f32 %v1576_v5, %v1391_v40  ;;  %v2775_v40 = vld [vmem:[%s3393_s3 + $0x190] sm:$0xff]  }
 0xf9a   : > { %v1584_v9 = vsel %vm311_vm1, %v1580_v8, 0.0 }
 0xf9b   : > { %1585 = vadd.xlane.f32.xlu1 %v1584_v9 }
0x1020   : > { %v1583_v10 = vpop.xlane.xlu0 %1582 }
0x1021   : > { %v1587_v11 = vmul.f32 0.03125, %v1583_v10 }
0x1023   : > { %v1589_v12 = vsub.f32 %v1579_v3, %v1587_v11 }
0x1024   : > { %v1586_v13 = vpop.xlane.xlu1 %1585 }
0x1025   : > { %v1588_v14 = vmul.f32 0.03125, %v1586_v13  ;;  %v1591_v15 = vmul.f32 %v1589_v12, %v1589_v12  ;;  %v2778_v13 = vld [vmem:[%s3391_s1 + $0x78] sm:$0xff]  }
0x1026   : > { %2671 = vmatpush3.bf16.msra.mxu0 %v2778_v13 }
0x1027   : > { %v1590_v16 = vsub.f32 %v1580_v8, %v1588_v14  ;;  %v1593_v17 = vsel %vm311_vm1, %v1591_v15, 0.0  ;;  %v2779_v14 = vld [vmem:[%s3391_s1 + $0x70] sm:$0xff]   ;;  %2672 = vmatprep.subr.bf16.mxu0 %v2830_v1 }
0x1028   : > { %1594 = vadd.xlane.f32.xlu0 %v1593_v17 }
0x1029   : > { %v1592_v18 = vmul.f32 %v1590_v16, %v1590_v16 }
0x102a   : > { %2673 = vmatpush3.bf16.msra.mxu0 %v2779_v14 }
0x102b   : > { %v1596_v19 = vsel %vm311_vm1, %v1592_v18, 0.0  ;;  %2678 = vmatprep.subr.bf16.mxu0 %v2830_v1 }
0x102c   : > { %1597 = vadd.xlane.f32.xlu1 %v1596_v19 }
0x10b1   : > { %v1595_v22 = vpop.xlane.xlu0 %1594 }
0x10b2   : > { %v1599_v23 = vmul.f32 0.03125, %v1595_v22 }
0x10b4   : > { %v1601_v24 = vadd.f32 1e-05, %v1599_v23 }
0x10b5   : > { %v1598_v25 = vpop.xlane.xlu1 %1597 }
0x10b6   : > { %2808 = vrsqrt.f32 %v1601_v24  ;;  %v1600_v26 = vmul.f32 0.03125, %v1598_v25  ;;  %v3321_v25 = vld [vmem:[%s3395_s5] ss:$0 sm:$0xff] }
0x10b8   : > { %v1602_v27 = vadd.f32 1e-05, %v1600_v26 }
0x10ba   : > { %2810 = vrsqrt.f32 %v1602_v27 }
0x10c3   : > { %v2809_v28 = vpop.eup %2808 }
0x10c4   : > { %v1605_v29 = vmul.f32 %v2809_v28, %v1589_v12  ;;  %v3328_v28 = vld [vmem:[%s3396_s6] ss:$0 sm:$0xff] }
0x10c6   : > { %v1607_v32 = vmul.f32 %v2960_v55, %v1605_v29 }
0x10c7   : > { %v2811_v30 = vpop.eup %2810 }
0x10c8   : > { %v1606_v31 = vmul.f32 %v2811_v30, %v1590_v16  ;;  %v1609_v34 = vadd.f32 %v2966_v59, %v1607_v32 }
0x10ca   : > { %v1608_v33 = vmul.f32 %v2960_v55, %v1606_v31  ;;  %v2772_v55 = vld [vmem:[%s3393_s3 + $0x1a8] sm:$0xff]   ;;  %v2780_v31 = vld [vmem:[%s3393_s3 + $0x1f8] sm:$0xff]  }
0x10cc   : > { %v1610_v35 = vadd.f32 %v2966_v59, %v1608_v33  ;;  %v2773_v59 = vld [vmem:[%s3393_s3 + $0x1a0] sm:$0xff]   ;;  %v2781_v33 = vld [vmem:[%s3393_s3 + $0x1f0] sm:$0xff]  }
0x10ce   : > { %v1611_v37 = vpack.c.bf16 %v1610_v35, %v1609_v34 }
0x10d0   : > { %2647 = vmatmul.mubr.msk.bf16.vlgmr.msra.gmra.mxu1 %vm311_vm1, %v1611_v37  ;;  %v2785_v37 = vld [vmem:[%s3393_s3 + $0x1d0] sm:$0xff]  }
0x10d1   : > { %2651 = vmatpush3.bf16.msra.mxu1 %v2770_v36  ;;  %2666 = vmatprep.mubr.msk.bf16.mxu1 %vm2831_vm0, %v2830_v1  ;;  %v2784_v36 = vld [vmem:[%s3393_s3 + $0x1d8] sm:$0xff]  }
0x10d2   : > { %2652 = vmatprep.subr.bf16.mxu1 %v2830_v1 }
0x10d5   : > { %2653 = vmatpush3.bf16.msra.mxu1 %v2771_v38  ;;  %v2786_v38 = vld [vmem:[%s3393_s3 + $0x1c8] sm:$0xff]  }
0x10d6   : > { %2654 = vmatprep.subr.bf16.mxu1 %v2830_v1 }
0x10d9   : > { %2655 = vmatpush3.bf16.msra.mxu1 %v2772_v55  ;;  %v2787_v55 = vld [vmem:[%s3393_s3 + $0x1c0] sm:$0xff]  }
0x10da   : > { %2656 = vmatprep.subr.bf16.mxu1 %v2830_v1 }
0x10dd   : > { %2657 = vmatpush3.bf16.msra.mxu1 %v2773_v59  ;;  %v2346_v59 = vld [vmem:[%s3392_s2 + $0x7] ss:$0 sm:$0xff] }
0x10de   : > { %2658 = vmatprep.subr.bf16.mxu1 %v2830_v1 }
0x10e1   : > { %2659 = vmatpush3.bf16.msra.mxu1 %v2774_v39 }
0x10e2   : > { %2660 = vmatprep.subr.bf16.mxu1 %v2830_v1 }
0x10e5   : > { %2661 = vmatpush3.bf16.msra.mxu1 %v2775_v40 }
0x10e6   : > { %2662 = vmatprep.subr.bf16.mxu1 %v2830_v1 }
0x10e9   : > { %2663 = vmatpush3.bf16.msra.mxu1 %v2776_v41 }
0x10ea   : > { %2664 = vmatprep.subr.bf16.mxu1 %v2830_v1 }
0x10ed   : > { %2665 = vmatpush3.bf16.msra.mxu1 %v2777_v42 }
0x1190   : > { %v1674_v44 = vpop.f32.mrf.mxu1 }
0x1191   : > { %v1675_v46 = vadd.f32 %v2311_v43, %v1674_v44 }
0x1192   : > { %v2648_v45 = vpop.f32.mrf.mxu1 }
0x1193   : > { %v1681_v50 = vmax.f32 %v1675_v46, 0.0 }
0x1194   : > { %v1677_v47 = vpop.f32.mrf.mxu1 }
0x1195   : > { %v1678_v48 = vadd.f32 %v2311_v43, %v1677_v47 }
0x1196   : > { %v2649_v49 = vpop.f32.mrf.mxu1 }
0x1197   : > { %v1682_v51 = vmax.f32 %v1678_v48, 0.0 }
0x1199   : > { %v1683_v52 = vpack.c.bf16 %v1682_v51, %v1681_v50 }
0x119b   : > { %2667 = vmatmul.mubr.bf16.vlgmr.msra.gmra.mxu1 %v1683_v52 }
0x125b   : > { %v1791_v54 = vpop.f32.mrf.mxu1 }
0x125c   : > { %v1792_v56 = vadd.f32 %v2332_v53, %v1791_v54 }
0x125d   : > { %v2668_v57 = vpop.f32.mrf.mxu1 }
0x125e   : > { %v1798_v58 = vadd.f32 %v1792_v56, %v1609_v34  ;;  %v2782_v34 = vld [vmem:[%s3393_s3 + $0x1e8] sm:$0xff]  }
0x125f   : > { %v1794_v60 = vpop.f32.mrf.mxu1 }
0x1260   : > { %v1795_v61 = vadd.f32 %v2332_v53, %v1794_v60  ;;  %v1800_v62 = vsel %vm311_vm1, %v1798_v58, 0.0 }
0x1261   : > { %1801 = vadd.xlane.f32.xlu0 %v1800_v62  ;;  %v2669_v63 = vpop.f32.mrf.mxu1 }
0x1262   : > { %v1799_v0 = vadd.f32 %v1795_v61, %v1610_v35  ;;  %v2783_v35 = vld [vmem:[%s3393_s3 + $0x1e0] sm:$0xff]  }
0x1264   : > { %v1803_v2 = vsel %vm311_vm1, %v1799_v0, 0.0 }
0x1265   : > { %1804 = vadd.xlane.f32.xlu1 %v1803_v2 }
0x12ea   : > { %v1802_v3 = vpop.xlane.xlu0 %1801 }
0x12eb   : > { %v1806_v4 = vmul.f32 0.03125, %v1802_v3 }
0x12ed   : > { %v1808_v5 = vsub.f32 %v1798_v58, %v1806_v4 }
0x12ee   : > { %v1805_v6 = vpop.xlane.xlu1 %1804 }
0x12ef   : > { %v1807_v7 = vmul.f32 0.03125, %v1805_v6  ;;  %v1810_v8 = vmul.f32 %v1808_v5, %v1808_v5 }
0x12f1   : > { %v1809_v9 = vsub.f32 %v1799_v0, %v1807_v7  ;;  %v1812_v10 = vsel %vm311_vm1, %v1810_v8, 0.0 }
0x12f2   : > { %1813 = vadd.xlane.f32.xlu0 %v1812_v10 }
0x12f3   : > { %v1811_v11 = vmul.f32 %v1809_v9, %v1809_v9 }
0x12f5   : > { %v1815_v12 = vsel %vm311_vm1, %v1811_v11, 0.0 }
0x12f6   : > { %1816 = vadd.xlane.f32.xlu1 %v1815_v12 }
0x137b   : > { %v1814_v15 = vpop.xlane.xlu0 %1813 }
0x137c   : > { %v1818_v16 = vmul.f32 0.03125, %v1814_v15 }
0x137e   : > { %v1820_v17 = vadd.f32 1e-05, %v1818_v16 }
0x137f   : > { %v1817_v18 = vpop.xlane.xlu1 %1816 }
0x1380   : > { %2812 = vrsqrt.f32 %v1820_v17  ;;  %v1819_v19 = vmul.f32 0.03125, %v1817_v18 }
0x1382   : > { %v1821_v20 = vadd.f32 1e-05, %v1819_v19 }
0x1384   : > { %2814 = vrsqrt.f32 %v1821_v20 }
0x138d   : > { %v2813_v21 = vpop.eup %2812 }
0x138e   : > { %v1824_v22 = vmul.f32 %v2813_v21, %v1808_v5 }
0x1390   : > { %v1826_v26 = vmul.f32 %v3321_v25, %v1824_v22 }
0x1391   : > { %v2815_v23 = vpop.eup %2814 }
0x1392   : > { %v1825_v24 = vmul.f32 %v2815_v23, %v1809_v9  ;;  %v1828_v29 = vadd.f32 %v3328_v28, %v1826_v26 }
0x1394   : > { %v1827_v27 = vmul.f32 %v3321_v25, %v1825_v24 }
0x1396   : > { %v1829_v30 = vadd.f32 %v3328_v28, %v1827_v27 }
0x1398   : > { %v1830_v32 = vpack.c.bf16 %v1829_v30, %v1828_v29 }
0x139a   : > { %2675 = vmatmul.mubr.msk.bf16.vlgmr.msra.gmra.mxu0 %vm311_vm1, %v1830_v32 }
0x139b   : > { %2679 = vmatpush3.bf16.msra.mxu0 %v2780_v31  ;;  %2694 = vmatprep.mubr.msk.bf16.mxu0 %vm2831_vm0, %v2830_v1 }
0x139c   : > { %2680 = vmatprep.subr.bf16.mxu0 %v2830_v1 }
0x139f   : > { %2681 = vmatpush3.bf16.msra.mxu0 %v2781_v33 }
0x13a0   : > { %2682 = vmatprep.subr.bf16.mxu0 %v2830_v1 }
0x13a3   : > { %2683 = vmatpush3.bf16.msra.mxu0 %v2782_v34 }
0x13a4   : > { %2684 = vmatprep.subr.bf16.mxu0 %v2830_v1 }
0x13a7   : > { %2685 = vmatpush3.bf16.msra.mxu0 %v2783_v35 }
0x13a8   : > { %2686 = vmatprep.subr.bf16.mxu0 %v2830_v1 }
0x13ab   : > { %2687 = vmatpush3.bf16.msra.mxu0 %v2784_v36 }
0x13ac   : > { %2688 = vmatprep.subr.bf16.mxu0 %v2830_v1 }
0x13af   : > { %2689 = vmatpush3.bf16.msra.mxu0 %v2785_v37 }
0x13b0   : > { %2690 = vmatprep.subr.bf16.mxu0 %v2830_v1 }
0x13b3   : > { %2691 = vmatpush3.bf16.msra.mxu0 %v2786_v38 }
0x13b4   : > { %2692 = vmatprep.subr.bf16.mxu0 %v2830_v1  ;;  %v2367_v1 = vld [vmem:[%s3394_s4 + $0x7] ss:$0 sm:$0xff] }
0x13b7   : > { %2693 = vmatpush3.bf16.msra.mxu0 %v2787_v55 }
0x145a   : > { %v1893_v39 = vpop.f32.mrf.mxu0 }
0x145b   : > { %v1894_v41 = vadd.f32 %v2346_v59, %v1893_v39 }
0x145c   : > { %v2676_v40 = vpop.f32.mrf.mxu0 }
0x145d   : > { %v1900_v45 = vmax.f32 %v1894_v41, 0.0 }
0x145e   : > { %v1896_v42 = vpop.f32.mrf.mxu0 }
0x145f   : > { %v1897_v43 = vadd.f32 %v2346_v59, %v1896_v42 }
0x1460   : > { %v2677_v44 = vpop.f32.mrf.mxu0 }
0x1461   : > { %v1901_v46 = vmax.f32 %v1897_v43, 0.0 }
0x1463   : > { %v1902_v47 = vpack.c.bf16 %v1901_v46, %v1900_v45 }
0x1465   : > { %2695 = vmatmul.mubr.bf16.vlgmr.msra.gmra.mxu0 %v1902_v47 }
0x1525   : > { %v2010_v48 = vpop.f32.mrf.mxu0 }
0x1526   : > { %v2011_v49 = vadd.f32 %v2367_v1, %v2010_v48 }
0x1527   : > { %v2696_v50 = vpop.f32.mrf.mxu0 }
0x1528   : > { %v2017_v51 = vadd.f32 %v2011_v49, %v1828_v29 }
0x1529   : > { %v2013_v52 = vpop.f32.mrf.mxu0 }
0x152a   : > { %v2014_v53 = vadd.f32 %v2367_v1, %v2013_v52  ;;  %v2019_v54 = vsel %vm311_vm1, %v2017_v51, 0.0 }
0x152b   : > { %2020 = vadd.xlane.f32.xlu0 %v2019_v54  ;;  %v2697_v56 = vpop.f32.mrf.mxu0 }
0x152c   : > { %v2018_v57 = vadd.f32 %v2014_v53, %v1829_v30 }
0x152e   : > { %v2022_v58 = vsel %vm311_vm1, %v2018_v57, 0.0 }
0x152f   : > { %2023 = vadd.xlane.f32.xlu1 %v2022_v58 }
0x15b4   : > { %v2021_v60 = vpop.xlane.xlu0 %2020 }
0x15b5   : > { %v2025_v61 = vmul.f32 0.03125, %v2021_v60 }
0x15b7   : > { %v2027_v62 = vsub.f32 %v2017_v51, %v2025_v61 }
0x15b8   : > { %v2024_v63 = vpop.xlane.xlu1 %2023 }
0x15b9   : > { %v2026_v0 = vmul.f32 0.03125, %v2024_v63  ;;  %v2029_v2 = vmul.f32 %v2027_v62, %v2027_v62 }
0x15bb   : > { %v2028_v3 = vsub.f32 %v2018_v57, %v2026_v0  ;;  %v2031_v4 = vsel %vm311_vm1, %v2029_v2, 0.0 }
0x15bc   : > { %2032 = vadd.xlane.f32.xlu0 %v2031_v4 }
0x15bd   : > { %v2030_v5 = vmul.f32 %v2028_v3, %v2028_v3 }
0x15bf   : > { %v2034_v6 = vsel %vm311_vm1, %v2030_v5, 0.0 }
0x15c0   : > { %2035 = vadd.xlane.f32.xlu1 %v2034_v6 }
0x1645   : > { %v2033_v7 = vpop.xlane.xlu0 %2032 }
0x1646   : > { %v2037_v8 = vmul.f32 0.03125, %v2033_v7 }
0x1648   : > { %v2039_v9 = vadd.f32 1e-05, %v2037_v8 }
0x1649   : > { %v2036_v10 = vpop.xlane.xlu1 %2035 }
0x164a   : > { %2816 = vrsqrt.f32 %v2039_v9  ;;  %v2038_v11 = vmul.f32 0.03125, %v2036_v10 }
0x164c   : > { %v2040_v12 = vadd.f32 1e-05, %v2038_v11 }
0x164e   : > { %2818 = vrsqrt.f32 %v2040_v12 }
0x1657   : > { %v2817_v13 = vpop.eup %2816 }
0x1658   : > { %v2043_v14 = vmul.f32 %v2817_v13, %v2027_v62 }
0x165a   : > { %v2045_v15 = vmul.f32 %v3321_v25, %v2043_v14 }
0x165b   : > { %v2819_v16 = vpop.eup %2818 }
0x165c   : > { %v2047_v17 = vadd.f32 %v3328_v28, %v2045_v15  ;;  %v2044_v18 = vmul.f32 %v2819_v16, %v2028_v3 }
0x165e   : > { %2049 = vst.msk [vmem:[%s280_s10] sm:$0xff] %vm311_vm1, %v2047_v17  ;;  %v2046_v19 = vmul.f32 %v3321_v25, %v2044_v18 }
0x1660   : > { %v2048_v20 = vadd.f32 %v3328_v28, %v2046_v19 }
0x1662   : > { %2050 = vst.msk [vmem:[%s280_s10 + $0x8] sm:$0xff] %vm311_vm1, %v2048_v20 }
0x1663 PF: > { %s17_s24 = sadd.s32 1, %s2828_s24  }
0x1664   : > { %p14_p4 = scmp.ge.s32.totalorder %s17_s24, 4  }
0x1666   :  { %16 = sbr.rel (!%p14_p4) target bundleno = 1 (0x1), region = 106 }

</bundles_post_ra>
